<compile_context>
chip_gen: v5e
topology: v5e:2x2
jax: 0.10.0
libtpu: 0.0.40
codegen_flags: <defaults>
</compile_context>

<pallas_src>
import functools

import jax
import jax.numpy as jnp
from jax import lax
from jax.experimental import pallas as pl
from jax.experimental.pallas import tpu as pltpu


# ----------------------------------------------------------------------------
# Generation-aware sizing helpers
# ----------------------------------------------------------------------------

def _round_up(n, m):
    return -(-n // m) * m


@functools.lru_cache(maxsize=None)
def _vmem_capacity_bytes():
    """Per-core VMEM capacity (v5e/v6e: 128 MiB, v7x: 64 MiB); conservative fallback."""
    try:
        return int(pltpu.get_tpu_info().vmem_capacity_bytes)
    except Exception:
        return 64 << 20


def _pick_time_block(seq_len, batch_shard, din, hidden, budget_bytes):
    """Largest divisor of seq_len whose FULL working set (double-buffered x/out streams,
    per-gate gi scratch, weights, biases, lengths column, hidden-state scratch) fits the
    VMEM budget."""
    f32 = 4
    dpad = _round_up(din, 128)
    hpad = _round_up(hidden, 128)
    bpad = _round_up(batch_shard, 8)
    fixed = f32 * (2 * 3 * _round_up(din, 8) * hpad       # W_ih (2 bufs)
                   + 2 * 3 * _round_up(hidden, 8) * hpad  # W_hh (2 bufs)
                   + 2 * 3 * 2 * 8 * hpad                 # b_ih / b_hh (2 bufs)
                   + 2 * 8 * 128                          # lengths column block
                   + bpad * hpad)                         # hidden-state scratch
    best = 1
    for bt in range(1, seq_len + 1):
        if seq_len % bt:
            continue
        stream = f32 * bt * bpad * (2 * dpad    # x block (2 bufs)
                                    + 2 * hpad  # out block (2 bufs)
                                    + 3 * hpad)  # gi_r / gi_z / gi_n scratch
        if fixed + stream <= budget_bytes:
            best = bt
    return best


def _pick_col_tile(cout, cin, budget_bytes):
    """Tile output columns when the double-buffered weight block alone would dominate the
    VMEM budget (v7x-safe). Only legal when cout is 128-divisible; else full extent."""
    if cout % 128 != 0:
        return cout
    for tn in (cout, 4096, 2048, 1024, 512, 256, 128):
        if tn <= cout and cout % tn == 0 and 8 * _round_up(cin, 8) * tn <= budget_bytes // 2:
            return tn
    return 128


def _pick_row_tile(rows, cin, cout_blk, budget_bytes):
    """Largest row tile whose streams + weight block fit the VMEM budget."""
    f32 = 4
    fixed = 2 * f32 * _round_up(cin, 8) * _round_up(cout_blk, 128)
    for tm in (2048, 1024, 512, 256, 128, 64, 32, 16, 8):
        if rows % tm == 0 and fixed + 2 * f32 * tm * (
                _round_up(cin, 128) + _round_up(cout_blk, 128)) <= budget_bytes:
            return tm
    return 8


# ----------------------------------------------------------------------------
# Pallas kernels
# ----------------------------------------------------------------------------

def _linear_kernel(x_ref, w_ref, b_ref, o_ref):
    """Per-frame linear (Conv1d k=1): [tm, Cin] @ [Cin, tn] + b."""
    o_ref[...] = (
        jnp.dot(x_ref[...], w_ref[...], preferred_element_type=jnp.float32)
        + b_ref[...]
    )


def _gru_fused_kernel(lens_ref, x_ref, wih_ref, whh_ref, bih_ref, bhh_ref,
                      out_ref, gi_r_ref, gi_z_ref, gi_n_ref, h_ref):
    """Fused GRU layer over one (batch-shard, time-block) grid cell.

    lens_ref : [Bs, 1]  int32 valid lengths for this batch shard
    x_ref    : [bt, Bs, Din]   raw layer input (time-major)
    wih_ref  : [3, Din, H]     gate-major input weights (r|z|n)
    whh_ref  : [3, H, H]       gate-major hidden weights
    bih_ref  : [3, 1, H]
    bhh_ref  : [3, 1, H]
    out_ref  : [bt, Bs, H]     masked per-step outputs (pad_packed_sequence semantics)
    gi_*_ref : [bt, Bs, H]     VMEM scratch holding the hoisted input projection
    h_ref    : [Bs, H]         VMEM scratch carrying the hidden state across time blocks
    """
    bt, Bs, Din = x_ref.shape
    H = h_ref.shape[1]

    @pl.when(pl.program_id(1) == 0)                 # fresh sequence for this shard
    def _():
        h_ref[...] = jnp.zeros_like(h_ref)

    # Hoisted input projection for the whole time block: one [bt*Bs, Din] @ [Din, H]
    # MXU matmul per gate (no HBM round trip, no lane-crossing gate slices).
    x_blk = x_ref[...].reshape(bt * Bs, Din)
    gi_refs = (gi_r_ref, gi_z_ref, gi_n_ref)
    for g in range(3):
        gi_refs[g][...] = (
            jnp.dot(x_blk, wih_ref[g], preferred_element_type=jnp.float32)
            + bih_ref[g]
        ).reshape(bt, Bs, H)

    lens = lens_ref[...]                            # [Bs, 1] int32
    t0 = pl.program_id(1) * bt
    whh_r, whh_z, whh_n = whh_ref[0], whh_ref[1], whh_ref[2]
    bhh_r, bhh_z, bhh_n = bhh_ref[0], bhh_ref[1], bhh_ref[2]

    def step(t, h):
        gh_r = jnp.dot(h, whh_r, preferred_element_type=jnp.float32) + bhh_r
        gh_z = jnp.dot(h, whh_z, preferred_element_type=jnp.float32) + bhh_z
        gh_n = jnp.dot(h, whh_n, preferred_element_type=jnp.float32) + bhh_n
        r = jax.nn.sigmoid(gi_r_ref[t] + gh_r)
        z = jax.nn.sigmoid(gi_z_ref[t] + gh_z)
        n = jnp.tanh(gi_n_ref[t] + r * gh_n)
        h_new = (1.0 - z) * n + z * h
        # pad_packed_sequence semantics: zero outputs at padded frames (mask rebuilt
        # in-kernel from the lengths column -> no [T, B, 1] mask stream).
        mask = ((t0 + t) < lens).astype(jnp.float32)          # [Bs, 1]
        out_ref[t] = h_new * mask
        return h_new

    unroll = True if bt <= 16 else 4                # LLO visibility across timesteps
    h_ref[...] = lax.fori_loop(0, bt, step, h_ref[...], unroll=unroll)


def _enc_head_kernel(h_ref, wm_ref, wv_ref, bm_ref, bv_ref, eps_ref, out_ref):
    """Fused enc_means | enc_logvars | latentSampler; single packed output stream.

    out_ref : [3, tm, bn] = [ mu | logvar | z ]
    """
    h = h_ref[...]
    mu = jnp.dot(h, wm_ref[...], preferred_element_type=jnp.float32) + bm_ref[...]
    lv = jnp.dot(h, wv_ref[...], preferred_element_type=jnp.float32) + bv_ref[...]
    z = mu + jnp.exp(lv) * eps_ref[...]             # latentSampler reparameterization
    out_ref[0] = mu
    out_ref[1] = lv
    out_ref[2] = z


# ----------------------------------------------------------------------------
# pallas_call wrappers
# ----------------------------------------------------------------------------

def linear_rows(x, w, b, *, vmem_budget, vmem_limit):
    """x: [N, Cin], w: [Cin, Cout], b: [1, Cout] -> [N, Cout]; row- and col-tiled."""
    rows, cin = x.shape
    cout = w.shape[1]
    tn = _pick_col_tile(cout, cin, vmem_budget)
    tm = _pick_row_tile(rows, cin, tn, vmem_budget)
    return pl.pallas_call(
        _linear_kernel,
        out_shape=jax.ShapeDtypeStruct((rows, cout), jnp.float32),
        grid_spec=pltpu.PrefetchScalarGridSpec(
            num_scalar_prefetch=0,
            grid=(rows // tm, cout // tn),
            in_specs=[pl.BlockSpec((tm, cin), lambda i, j: (i, 0)),
                      pl.BlockSpec((cin, tn), lambda i, j: (0, j)),
                      pl.BlockSpec((1, tn), lambda i, j: (0, j))],
            out_specs=pl.BlockSpec((tm, tn), lambda i, j: (i, j)),
        ),
        compiler_params=pltpu.CompilerParams(
            dimension_semantics=("parallel", "parallel"),
            vmem_limit_bytes=vmem_limit),
    )(x, w, b)


def gru_layer(x_tbd, lens_col, p, *, seq_len, batch_pad, n_shards, time_block,
              vmem_budget, vmem_limit):
    """One fused GRU layer, time-major in/out: [T, B_pad, Din] -> [T, B_pad, H]."""
    H = p["whh"].shape[-1]
    din = p["wih"].shape[1]
    Bs = batch_pad // n_shards
    if time_block is not None and seq_len % time_block == 0:
        bt = time_block
    else:
        bt = _pick_time_block(seq_len, Bs, din, H, vmem_budget)

    return pl.pallas_call(
        _gru_fused_kernel,
        out_shape=jax.ShapeDtypeStruct((seq_len, batch_pad, H), jnp.float32),
        grid_spec=pltpu.PrefetchScalarGridSpec(
            num_scalar_prefetch=0,
            grid=(n_shards, seq_len // bt),
            in_specs=[pl.BlockSpec((Bs, 1), lambda s, t: (s, 0)),            # lengths
                      pl.BlockSpec((bt, Bs, din), lambda s, t: (t, s, 0)),   # x
                      pl.BlockSpec((3, din, H), lambda s, t: (0, 0, 0)),     # W_ih
                      pl.BlockSpec((3, H, H), lambda s, t: (0, 0, 0)),       # W_hh
                      pl.BlockSpec((3, 1, H), lambda s, t: (0, 0, 0)),       # b_ih
                      pl.BlockSpec((3, 1, H), lambda s, t: (0, 0, 0))],      # b_hh
            out_specs=pl.BlockSpec((bt, Bs, H), lambda s, t: (t, s, 0)),
            scratch_shapes=[pltpu.VMEM((bt, Bs, H), jnp.float32),   # gi_r
                            pltpu.VMEM((bt, Bs, H), jnp.float32),   # gi_z
                            pltpu.VMEM((bt, Bs, H), jnp.float32),   # gi_n
                            pltpu.VMEM((Bs, H), jnp.float32)],      # hidden state
        ),
        compiler_params=pltpu.CompilerParams(
            # batch shards are independent -> megacore-splittable on v7x;
            # time is the serial recurrence -> "arbitrary".
            dimension_semantics=("parallel", "arbitrary"),
            vmem_limit_bytes=vmem_limit),
    )(lens_col, x_tbd, p["wih"], p["whh"], p["bih"], p["bhh"])


def enc_head_sample(h_flat, wm, wv, bm, bv, eps_flat, *, vmem_budget, vmem_limit):
    """Fused means/logvars/sampler. Returns packed [3, rows, bn] = [mu | logvar | z]."""
    rows, hidden = h_flat.shape
    bn = wm.shape[1]
    tm = _pick_row_tile(rows, hidden, 3 * bn, vmem_budget)
    return pl.pallas_call(
        _enc_head_kernel,
        out_shape=jax.ShapeDtypeStruct((3, rows, bn), jnp.float32),
        grid_spec=pltpu.PrefetchScalarGridSpec(
            num_scalar_prefetch=0,
            grid=(rows // tm,),
            in_specs=[pl.BlockSpec((tm, hidden), lambda i: (i, 0)),
                      pl.BlockSpec((hidden, bn), lambda i: (0, 0)),
                      pl.BlockSpec((hidden, bn), lambda i: (0, 0)),
                      pl.BlockSpec((1, bn), lambda i: (0, 0)),
                      pl.BlockSpec((1, bn), lambda i: (0, 0)),
                      pl.BlockSpec((tm, bn), lambda i: (i, 0))],
            out_specs=pl.BlockSpec((3, tm, bn), lambda i: (0, i, 0)),
        ),
        compiler_params=pltpu.CompilerParams(
            dimension_semantics=("parallel",),
            vmem_limit_bytes=vmem_limit),
    )(h_flat, wm, wv, bm, bv, eps_flat)


# ----------------------------------------------------------------------------
# Parameter construction (gate-major layouts)
# ----------------------------------------------------------------------------

def _init_gru_params(key, in_size, hidden_size):
    k1, k2, k3, k4 = jax.random.split(key, 4)
    s = float(hidden_size) ** -0.5
    return dict(
        wih=jax.random.uniform(k1, (3, in_size, hidden_size), jnp.float32, -s, s),
        whh=jax.random.uniform(k2, (3, hidden_size, hidden_size), jnp.float32, -s, s),
        bih=jax.random.uniform(k3, (3, 1, hidden_size), jnp.float32, -s, s),
        bhh=jax.random.uniform(k4, (3, 1, hidden_size), jnp.float32, -s, s),
    )


def _init_linear_params(key, in_ch, out_ch):
    k1, k2 = jax.random.split(key)
    s = float(in_ch) ** -0.5
    return dict(
        w=jax.random.uniform(k1, (in_ch, out_ch), jnp.float32, -s, s),
        b=jax.random.uniform(k2, (1, out_ch), jnp.float32, -s, s),
    )


def init_nnet_vae_params(key, input_size, num_layers_enc, num_layers_dec,
                         hidden_size, bn_size):
    keys = jax.random.split(key, num_layers_enc + num_layers_dec + 4)
    ki = iter(keys)

    enc_in = [input_size] + [hidden_size] * (num_layers_enc - 1)
    enc_layers = [_init_gru_params(next(ki), s, hidden_size) for s in enc_in]
    enc_means = _init_linear_params(next(ki), hidden_size, bn_size)
    enc_vars = _init_linear_params(next(ki), hidden_size, bn_size)

    dec_in = [bn_size] + [hidden_size] * (num_layers_dec - 1)
    dec_layers = [_init_gru_params(next(ki), s, hidden_size) for s in dec_in]
    dec_means = _init_linear_params(next(ki), hidden_size, input_size)
    dec_vars = _init_linear_params(next(ki), hidden_size, input_size)  # unused (unit var)

    return dict(enc_layers=enc_layers, enc_means=enc_means, enc_vars=enc_vars,
                dec_layers=dec_layers, dec_means=dec_means, dec_vars=dec_vars)


# ----------------------------------------------------------------------------
# nnetVAE forward
# ----------------------------------------------------------------------------

def nnet_vae_forward(params, inputs, lengths, noise, *, time_block=None, core_shards=1):
    """inputs: [B, T, D], lengths: [B] int32, noise: [B, T, bn].

    core_shards: set to 2 on parts with 2 TensorCores per chip (v7x) so the dominant
    recurrence gets a leading "parallel" grid axis over independent batch halves.
    """
    B, T, D = inputs.shape
    bn = params["enc_means"]["w"].shape[1]
    H = params["enc_layers"][0]["whh"].shape[-1]

    vmem_cap = _vmem_capacity_bytes()
    vmem_limit = int(min(vmem_cap * 3 // 4, 112 << 20))
    rec_budget = vmem_cap // 3
    gemm_budget = vmem_cap // 3

    # Batch padded to full sublanes (8); padded rows carry length 0 -> fully masked.
    B_pad = _round_up(B, 8)
    pad_b = B_pad - B
    n_shards = core_shards if (core_shards >= 1 and B_pad % (8 * core_shards) == 0) else 1

    # Time-major layout, one transpose in / one per returned tensor out.
    x_tb = jnp.transpose(inputs, (1, 0, 2))                    # [T, B, D]
    eps_tb = jnp.transpose(noise, (1, 0, 2))                   # [T, B, bn]
    lens = lengths.astype(jnp.int32)
    if pad_b:
        x_tb = jnp.pad(x_tb, ((0, 0), (0, pad_b), (0, 0)))
        eps_tb = jnp.pad(eps_tb, ((0, 0), (0, pad_b), (0, 0)))
        lens = jnp.pad(lens, (0, pad_b))
    lens_col = lens.reshape(B_pad, 1)

    # ---- Encoder (fused GRU stack; dropout = identity in eval) ----
    h = x_tb
    for lp in params["enc_layers"]:
        h = gru_layer(h, lens_col, lp, seq_len=T, batch_pad=B_pad, n_shards=n_shards,
                      time_block=time_block, vmem_budget=rec_budget,
                      vmem_limit=vmem_limit)
    enc_h = h                                                  # [T, B_pad, H], masked

    # ---- Fused means | logvars | latentSampler (single packed output) ----
    rows = T * B_pad
    packed = enc_head_sample(enc_h.reshape(rows, H),
                             params["enc_means"]["w"], params["enc_vars"]["w"],
                             params["enc_means"]["b"], params["enc_vars"]["b"],
                             eps_tb.reshape(rows, bn),
                             vmem_budget=gemm_budget, vmem_limit=vmem_limit)
    mu_flat, lv_flat, z_flat = packed[0], packed[1], packed[2]

    # ---- Decoder (fused GRU stack) ----
    h = z_flat.reshape(T, B_pad, bn)
    for lp in params["dec_layers"]:
        h = gru_layer(h, lens_col, lp, seq_len=T, batch_pad=B_pad, n_shards=n_shards,
                      time_block=time_block, vmem_budget=rec_budget,
                      vmem_limit=vmem_limit)
    dec_means_flat = linear_rows(h.reshape(rows, H), params["dec_means"]["w"],
                                 params["dec_means"]["b"],
                                 vmem_budget=gemm_budget, vmem_limit=vmem_limit)

    # Back to batch-first [B, T, *] only for the returned tensors (drop batch padding).
    def unflat(a_flat, feat):
        return jnp.transpose(a_flat.reshape(T, B_pad, feat)[:, :B], (1, 0, 2))

    enc_means = unflat(mu_flat, bn)
    enc_logvars = unflat(lv_flat, bn)
    enc_hidden = jnp.transpose(enc_h[:, :B], (1, 0, 2))
    dec_means = unflat(dec_means_flat, D)
    dec_vars = jnp.zeros_like(dec_means)                       # unit decoder variance

    return (dec_means, dec_vars), (enc_means, enc_logvars, enc_hidden)


# ----------------------------------------------------------------------------
# Main
# ----------------------------------------------------------------------------

if __name__ == "__main__":
    B, T = 2, 8
    input_size, hidden_size, bn_size = 16, 32, 8
    num_layers_enc, num_layers_dec = 2, 2

    key = jax.random.PRNGKey(0)
    k_param, k_x, k_noise = jax.random.split(key, 3)

    params = init_nnet_vae_params(k_param, input_size, num_layers_enc,
                                  num_layers_dec, hidden_size, bn_size)

    x = jax.random.normal(k_x, (B, T, input_size), jnp.float32)
    lengths = jnp.array([T, T - 2], dtype=jnp.int32)           # sorted descending
    noise = jax.random.normal(k_noise, (B, T, bn_size), jnp.float32)

    # time_block=4 -> 2 time blocks per GRU layer (exercises the carried-h grid path).
    fwd = jax.jit(functools.partial(nnet_vae_forward, time_block=4, core_shards=1))
    (dec_means, dec_vars), (enc_means, enc_logvars, enc_hidden) = \
        fwd(params, x, lengths, noise)

    jax.block_until_ready((dec_means, dec_vars, enc_means, enc_logvars, enc_hidden))

    assert dec_means.shape == (B, T, input_size)
    assert dec_vars.shape == (B, T, input_size)
    assert enc_means.shape == (B, T, bn_size)
    assert enc_logvars.shape == (B, T, bn_size)
    assert enc_hidden.shape == (B, T, hidden_size)

    # Shape-coverage run: exercises the batch-sharded ("parallel" core axis) recurrence
    # path used on 2-TensorCore parts (v7x).
    B2 = 16
    x2 = jax.random.normal(k_x, (B2, T, input_size), jnp.float32)
    lengths2 = ((jnp.arange(B2, dtype=jnp.int32) % T) + 1)
    noise2 = jax.random.normal(k_noise, (B2, T, bn_size), jnp.float32)
    fwd2 = jax.jit(functools.partial(nnet_vae_forward, time_block=4, core_shards=2))
    out2 = fwd2(params, x2, lengths2, noise2)
    jax.block_until_ready(out2)
    assert out2[0][0].shape == (B2, T, input_size)
    assert out2[1][2].shape == (B2, T, hidden_size)

    print("KERNEL_OK")
</pallas_src>

<mosaic_0001>
module attributes {stable_mosaic.version = 11 : i64} {
  func.func @_gru_fused_kernel(%arg0: i32, %arg1: i32, %arg2: memref<8x1xi32, #tpu.memory_space<vmem>>, %arg3: memref<4x8x16xf32, #tpu.memory_space<vmem>>, %arg4: memref<3x16x32xf32, #tpu.memory_space<vmem>>, %arg5: memref<3x32x32xf32, #tpu.memory_space<vmem>>, %arg6: memref<3x1x32xf32, #tpu.memory_space<vmem>>, %arg7: memref<3x1x32xf32, #tpu.memory_space<vmem>>, %arg8: memref<4x8x32xf32, #tpu.memory_space<vmem>>, %arg9: memref<4x8x32xf32, #tpu.memory_space<vmem>>, %arg10: memref<4x8x32xf32, #tpu.memory_space<vmem>>, %arg11: memref<4x8x32xf32, #tpu.memory_space<vmem>>, %arg12: memref<8x32xf32, #tpu.memory_space<vmem>>) attributes {dimension_semantics = [#tpu.dimension_semantics<parallel>, #tpu.dimension_semantics<arbitrary>], iteration_bounds = array<i64: 1, 2>, scalar_prefetch = 0 : i64, scratch_operands = 4 : i64, tpu.core_type = #tpu.core_type<tc>, window_params = [{transform_indices = @transform_0, window_bounds = array<i64: 8, 1>}, {transform_indices = @transform_1, window_bounds = array<i64: 4, 8, 16>}, {pipeline_mode = #tpu.pipeline_mode<synchronous>, transform_indices = @transform_2, window_bounds = array<i64: 3, 16, 32>}, {pipeline_mode = #tpu.pipeline_mode<synchronous>, transform_indices = @transform_3, window_bounds = array<i64: 3, 32, 32>}, {pipeline_mode = #tpu.pipeline_mode<synchronous>, transform_indices = @transform_4, window_bounds = array<i64: 3, 1, 32>}, {pipeline_mode = #tpu.pipeline_mode<synchronous>, transform_indices = @transform_5, window_bounds = array<i64: 3, 1, 32>}, {transform_indices = @transform_6, window_bounds = array<i64: 4, 8, 32>}]} {
    %c0_i32 = arith.constant 0 : i32
    %0 = arith.cmpi eq, %arg1, %c0_i32 : i32
    %1 = arith.extui %0 : i1 to i32
    %c0_i32_0 = arith.constant 0 : i32
    %2 = arith.cmpi ne, %1, %c0_i32_0 : i32
    scf.if %2 {
      %cst_112 = arith.constant 0.000000e+00 : f32
      %244 = vector.broadcast %cst_112 : f32 to vector<8x32xf32>
      %c0_113 = arith.constant 0 : index
      %c0_114 = arith.constant 0 : index
      %245 = vector.load %arg12[%c0_113, %c0_114] : memref<8x32xf32, #tpu.memory_space<vmem>>, vector<8x32xf32>
      tpu.vector_store %arg12[%c0_113, %c0_114], %244 {strides = array<i32>} : memref<8x32xf32, #tpu.memory_space<vmem>>, vector<8x32xf32>,
    } else {
    }
    %c0 = arith.constant 0 : index
    %c0_1 = arith.constant 0 : index
    %c0_2 = arith.constant 0 : index
    %3 = vector.load %arg3[%c0, %c0_1, %c0_2] : memref<4x8x16xf32, #tpu.memory_space<vmem>>, vector<4x8x16xf32>
    %4 = vector.shape_cast %3 : vector<4x8x16xf32> to vector<32x16xf32>
    %c0_3 = arith.constant 0 : index
    %c0_4 = arith.constant 0 : index
    %c0_5 = arith.constant 0 : index
    %5 = vector.load %arg4[%c0_3, %c0_4, %c0_5] : memref<3x16x32xf32, #tpu.memory_space<vmem>>, vector<1x16x32xf32>
    %6 = vector.shape_cast %5 : vector<1x16x32xf32> to vector<16x32xf32>
    %cst = arith.constant dense<0.000000e+00> : vector<32x32xf32>
    %7 = tpu.matmul %4, %6, %cst {dimension_numbers = #tpu.dot_dimension_numbers<[1], [0], [0], [1], [0, 0, 1, 1], [], []>} : vector<32x16xf32>, vector<16x32xf32>, vector<32x32xf32> -> vector<32x32xf32>
    %c0_6 = arith.constant 0 : index
    %c0_7 = arith.constant 0 : index
    %c0_8 = arith.constant 0 : index
    %8 = vector.load %arg6[%c0_6, %c0_7, %c0_8] : memref<3x1x32xf32, #tpu.memory_space<vmem>>, vector<1x1x32xf32>
    %9 = vector.shape_cast %8 : vector<1x1x32xf32> to vector<1x32xf32>
    %10 = vector.broadcast %9 : vector<1x32xf32> to vector<32x32xf32>
    %11 = arith.addf %7, %10 : vector<32x32xf32>
    %12 = vector.shape_cast %11 : vector<32x32xf32> to vector<4x8x32xf32>
    %c0_9 = arith.constant 0 : index
    %c0_10 = arith.constant 0 : index
    %c0_11 = arith.constant 0 : index
    %13 = vector.load %arg9[%c0_9, %c0_10, %c0_11] : memref<4x8x32xf32, #tpu.memory_space<vmem>>, vector<4x8x32xf32>
    tpu.vector_store %arg9[%c0_9, %c0_10, %c0_11], %12 {strides = array<i32>} : memref<4x8x32xf32, #tpu.memory_space<vmem>>, vector<4x8x32xf32>,
    %c1 = arith.constant 1 : index
    %c0_12 = arith.constant 0 : index
    %c0_13 = arith.constant 0 : index
    %14 = vector.load %arg4[%c1, %c0_12, %c0_13] : memref<3x16x32xf32, #tpu.memory_space<vmem>>, vector<1x16x32xf32>
    %15 = vector.shape_cast %14 : vector<1x16x32xf32> to vector<16x32xf32>
    %cst_14 = arith.constant dense<0.000000e+00> : vector<32x32xf32>
    %16 = tpu.matmul %4, %15, %cst_14 {dimension_numbers = #tpu.dot_dimension_numbers<[1], [0], [0], [1], [0, 0, 1, 1], [], []>} : vector<32x16xf32>, vector<16x32xf32>, vector<32x32xf32> -> vector<32x32xf32>
    %c1_15 = arith.constant 1 : index
    %c0_16 = arith.constant 0 : index
    %c0_17 = arith.constant 0 : index
    %17 = vector.load %arg6[%c1_15, %c0_16, %c0_17] : memref<3x1x32xf32, #tpu.memory_space<vmem>>, vector<1x1x32xf32>
    %18 = vector.shape_cast %17 : vector<1x1x32xf32> to vector<1x32xf32>
    %19 = vector.broadcast %18 : vector<1x32xf32> to vector<32x32xf32>
    %20 = arith.addf %16, %19 : vector<32x32xf32>
    %21 = vector.shape_cast %20 : vector<32x32xf32> to vector<4x8x32xf32>
    %c0_18 = arith.constant 0 : index
    %c0_19 = arith.constant 0 : index
    %c0_20 = arith.constant 0 : index
    %22 = vector.load %arg10[%c0_18, %c0_19, %c0_20] : memref<4x8x32xf32, #tpu.memory_space<vmem>>, vector<4x8x32xf32>
    tpu.vector_store %arg10[%c0_18, %c0_19, %c0_20], %21 {strides = array<i32>} : memref<4x8x32xf32, #tpu.memory_space<vmem>>, vector<4x8x32xf32>,
    %c2 = arith.constant 2 : index
    %c0_21 = arith.constant 0 : index
    %c0_22 = arith.constant 0 : index
    %23 = vector.load %arg4[%c2, %c0_21, %c0_22] : memref<3x16x32xf32, #tpu.memory_space<vmem>>, vector<1x16x32xf32>
    %24 = vector.shape_cast %23 : vector<1x16x32xf32> to vector<16x32xf32>
    %cst_23 = arith.constant dense<0.000000e+00> : vector<32x32xf32>
    %25 = tpu.matmul %4, %24, %cst_23 {dimension_numbers = #tpu.dot_dimension_numbers<[1], [0], [0], [1], [0, 0, 1, 1], [], []>} : vector<32x16xf32>, vector<16x32xf32>, vector<32x32xf32> -> vector<32x32xf32>
    %c2_24 = arith.constant 2 : index
    %c0_25 = arith.constant 0 : index
    %c0_26 = arith.constant 0 : index
    %26 = vector.load %arg6[%c2_24, %c0_25, %c0_26] : memref<3x1x32xf32, #tpu.memory_space<vmem>>, vector<1x1x32xf32>
    %27 = vector.shape_cast %26 : vector<1x1x32xf32> to vector<1x32xf32>
    %28 = vector.broadcast %27 : vector<1x32xf32> to vector<32x32xf32>
    %29 = arith.addf %25, %28 : vector<32x32xf32>
    %30 = vector.shape_cast %29 : vector<32x32xf32> to vector<4x8x32xf32>
    %c0_27 = arith.constant 0 : index
    %c0_28 = arith.constant 0 : index
    %c0_29 = arith.constant 0 : index
    %31 = vector.load %arg11[%c0_27, %c0_28, %c0_29] : memref<4x8x32xf32, #tpu.memory_space<vmem>>, vector<4x8x32xf32>
    tpu.vector_store %arg11[%c0_27, %c0_28, %c0_29], %30 {strides = array<i32>} : memref<4x8x32xf32, #tpu.memory_space<vmem>>, vector<4x8x32xf32>,
    %c0_30 = arith.constant 0 : index
    %c0_31 = arith.constant 0 : index
    %32 = vector.load %arg2[%c0_30, %c0_31] : memref<8x1xi32, #tpu.memory_space<vmem>>, vector<8x1xi32>
    %c4_i32 = arith.constant 4 : i32
    %33 = arith.muli %arg1, %c4_i32 : i32
    %c0_32 = arith.constant 0 : index
    %c0_33 = arith.constant 0 : index
    %c0_34 = arith.constant 0 : index
    %34 = vector.load %arg5[%c0_32, %c0_33, %c0_34] : memref<3x32x32xf32, #tpu.memory_space<vmem>>, vector<1x32x32xf32>
    %35 = vector.shape_cast %34 : vector<1x32x32xf32> to vector<32x32xf32>
    %c1_35 = arith.constant 1 : index
    %c0_36 = arith.constant 0 : index
    %c0_37 = arith.constant 0 : index
    %36 = vector.load %arg5[%c1_35, %c0_36, %c0_37] : memref<3x32x32xf32, #tpu.memory_space<vmem>>, vector<1x32x32xf32>
    %37 = vector.shape_cast %36 : vector<1x32x32xf32> to vector<32x32xf32>
    %c2_38 = arith.constant 2 : index
    %c0_39 = arith.constant 0 : index
    %c0_40 = arith.constant 0 : index
    %38 = vector.load %arg5[%c2_38, %c0_39, %c0_40] : memref<3x32x32xf32, #tpu.memory_space<vmem>>, vector<1x32x32xf32>
    %39 = vector.shape_cast %38 : vector<1x32x32xf32> to vector<32x32xf32>
    %c0_41 = arith.constant 0 : index
    %c0_42 = arith.constant 0 : index
    %c0_43 = arith.constant 0 : index
    %40 = vector.load %arg7[%c0_41, %c0_42, %c0_43] : memref<3x1x32xf32, #tpu.memory_space<vmem>>, vector<1x1x32xf32>
    %41 = vector.shape_cast %40 : vector<1x1x32xf32> to vector<1x32xf32>
    %c1_44 = arith.constant 1 : index
    %c0_45 = arith.constant 0 : index
    %c0_46 = arith.constant 0 : index
    %42 = vector.load %arg7[%c1_44, %c0_45, %c0_46] : memref<3x1x32xf32, #tpu.memory_space<vmem>>, vector<1x1x32xf32>
    %43 = vector.shape_cast %42 : vector<1x1x32xf32> to vector<1x32xf32>
    %c2_47 = arith.constant 2 : index
    %c0_48 = arith.constant 0 : index
    %c0_49 = arith.constant 0 : index
    %44 = vector.load %arg7[%c2_47, %c0_48, %c0_49] : memref<3x1x32xf32, #tpu.memory_space<vmem>>, vector<1x1x32xf32>
    %45 = vector.shape_cast %44 : vector<1x1x32xf32> to vector<1x32xf32>
    %c0_50 = arith.constant 0 : index
    %c0_51 = arith.constant 0 : index
    %46 = vector.load %arg12[%c0_50, %c0_51] : memref<8x32xf32, #tpu.memory_space<vmem>>, vector<8x32xf32>
    %c0_i32_52 = arith.constant 0 : i32
    %cst_53 = arith.constant dense<0.000000e+00> : vector<8x32xf32>
    %47 = tpu.matmul %46, %35, %cst_53 {dimension_numbers = #tpu.dot_dimension_numbers<[1], [0], [0], [1], [0, 0, 1, 1], [], []>} : vector<8x32xf32>, vector<32x32xf32>, vector<8x32xf32> -> vector<8x32xf32>
    %48 = vector.broadcast %41 : vector<1x32xf32> to vector<8x32xf32>
    %49 = arith.addf %47, %48 : vector<8x32xf32>
    %cst_54 = arith.constant dense<0.000000e+00> : vector<8x32xf32>
    %50 = tpu.matmul %46, %37, %cst_54 {dimension_numbers = #tpu.dot_dimension_numbers<[1], [0], [0], [1], [0, 0, 1, 1], [], []>} : vector<8x32xf32>, vector<32x32xf32>, vector<8x32xf32> -> vector<8x32xf32>
    %51 = vector.broadcast %43 : vector<1x32xf32> to vector<8x32xf32>
    %52 = arith.addf %50, %51 : vector<8x32xf32>
    %cst_55 = arith.constant dense<0.000000e+00> : vector<8x32xf32>
    %53 = tpu.matmul %46, %39, %cst_55 {dimension_numbers = #tpu.dot_dimension_numbers<[1], [0], [0], [1], [0, 0, 1, 1], [], []>} : vector<8x32xf32>, vector<32x32xf32>, vector<8x32xf32> -> vector<8x32xf32>
    %54 = vector.broadcast %45 : vector<1x32xf32> to vector<8x32xf32>
    %55 = arith.addf %53, %54 : vector<8x32xf32>
    %56 = arith.index_cast %c0_i32_52 : i32 to index
    %c0_56 = arith.constant 0 : index
    %c0_57 = arith.constant 0 : index
    %57 = vector.load %arg9[%56, %c0_56, %c0_57] : memref<4x8x32xf32, #tpu.memory_space<vmem>>, vector<1x8x32xf32>
    %58 = vector.shape_cast %57 : vector<1x8x32xf32> to vector<8x32xf32>
    %59 = arith.addf %58, %49 : vector<8x32xf32>
    %60 = arith.negf %59 : vector<8x32xf32>
    %61 = math.exp %60 : vector<8x32xf32>
    %cst_58 = arith.constant 1.000000e+00 : f32
    %62 = vector.broadcast %cst_58 : f32 to vector<8x32xf32>
    %63 = arith.addf %62, %61 : vector<8x32xf32>
    %64 = arith.divf %62, %63 : vector<8x32xf32>
    %65 = arith.index_cast %c0_i32_52 : i32 to index
    %c0_59 = arith.constant 0 : index
    %c0_60 = arith.constant 0 : index
    %66 = vector.load %arg10[%65, %c0_59, %c0_60] : memref<4x8x32xf32, #tpu.memory_space<vmem>>, vector<1x8x32xf32>
    %67 = vector.shape_cast %66 : vector<1x8x32xf32> to vector<8x32xf32>
    %68 = arith.addf %67, %52 : vector<8x32xf32>
    %69 = arith.negf %68 : vector<8x32xf32>
    %70 = math.exp %69 : vector<8x32xf32>
    %cst_61 = arith.constant 1.000000e+00 : f32
    %71 = vector.broadcast %cst_61 : f32 to vector<8x32xf32>
    %72 = arith.addf %71, %70 : vector<8x32xf32>
    %73 = arith.divf %71, %72 : vector<8x32xf32>
    %74 = arith.index_cast %c0_i32_52 : i32 to index
    %c0_62 = arith.constant 0 : index
    %c0_63 = arith.constant 0 : index
    %75 = vector.load %arg11[%74, %c0_62, %c0_63] : memref<4x8x32xf32, #tpu.memory_space<vmem>>, vector<1x8x32xf32>
    %76 = vector.shape_cast %75 : vector<1x8x32xf32> to vector<8x32xf32>
    %77 = arith.mulf %64, %55 : vector<8x32xf32>
    %78 = arith.addf %76, %77 : vector<8x32xf32>
    %79 = math.tanh %78 : vector<8x32xf32>
    %cst_64 = arith.constant 1.000000e+00 : f32
    %80 = vector.broadcast %cst_64 : f32 to vector<8x32xf32>
    %81 = arith.subf %80, %73 : vector<8x32xf32>
    %82 = arith.mulf %81, %79 : vector<8x32xf32>
    %83 = arith.mulf %73, %46 : vector<8x32xf32>
    %84 = arith.addf %82, %83 : vector<8x32xf32>
    %85 = arith.addi %33, %c0_i32_52 : i32
    %86 = vector.broadcast %85 : i32 to vector<8x1xi32>
    %87 = arith.cmpi slt, %86, %32 : vector<8x1xi32>
    %88 = arith.extui %87 : vector<8x1xi1> to vector<8x1xi32>
    %89 = arith.sitofp %88 : vector<8x1xi32> to vector<8x1xf32>
    %90 = vector.broadcast %89 : vector<8x1xf32> to vector<8x32xf32>
    %91 = arith.mulf %84, %90 : vector<8x32xf32>
    %92 = arith.index_cast %c0_i32_52 : i32 to index
    %c0_65 = arith.constant 0 : index
    %c0_66 = arith.constant 0 : index
    %93 = vector.load %arg8[%92, %c0_65, %c0_66] : memref<4x8x32xf32, #tpu.memory_space<vmem>>, vector<1x8x32xf32>
    %94 = vector.shape_cast %93 : vector<1x8x32xf32> to vector<8x32xf32>
    %95 = vector.shape_cast %91 : vector<8x32xf32> to vector<1x8x32xf32>
    tpu.vector_store %arg8[%92, %c0_65, %c0_66], %95 {strides = array<i32>} : memref<4x8x32xf32, #tpu.memory_space<vmem>>, vector<1x8x32xf32>,
    %c1_i32 = arith.constant 1 : i32
    %cst_67 = arith.constant dense<0.000000e+00> : vector<8x32xf32>
    %96 = tpu.matmul %84, %35, %cst_67 {dimension_numbers = #tpu.dot_dimension_numbers<[1], [0], [0], [1], [0, 0, 1, 1], [], []>} : vector<8x32xf32>, vector<32x32xf32>, vector<8x32xf32> -> vector<8x32xf32>
    %97 = vector.broadcast %41 : vector<1x32xf32> to vector<8x32xf32>
    %98 = arith.addf %96, %97 : vector<8x32xf32>
    %cst_68 = arith.constant dense<0.000000e+00> : vector<8x32xf32>
    %99 = tpu.matmul %84, %37, %cst_68 {dimension_numbers = #tpu.dot_dimension_numbers<[1], [0], [0], [1], [0, 0, 1, 1], [], []>} : vector<8x32xf32>, vector<32x32xf32>, vector<8x32xf32> -> vector<8x32xf32>
    %100 = vector.broadcast %43 : vector<1x32xf32> to vector<8x32xf32>
    %101 = arith.addf %99, %100 : vector<8x32xf32>
    %cst_69 = arith.constant dense<0.000000e+00> : vector<8x32xf32>
    %102 = tpu.matmul %84, %39, %cst_69 {dimension_numbers = #tpu.dot_dimension_numbers<[1], [0], [0], [1], [0, 0, 1, 1], [], []>} : vector<8x32xf32>, vector<32x32xf32>, vector<8x32xf32> -> vector<8x32xf32>
    %103 = vector.broadcast %45 : vector<1x32xf32> to vector<8x32xf32>
    %104 = arith.addf %102, %103 : vector<8x32xf32>
    %105 = arith.index_cast %c1_i32 : i32 to index
    %c0_70 = arith.constant 0 : index
    %c0_71 = arith.constant 0 : index
    %106 = vector.load %arg9[%105, %c0_70, %c0_71] : memref<4x8x32xf32, #tpu.memory_space<vmem>>, vector<1x8x32xf32>
    %107 = vector.shape_cast %106 : vector<1x8x32xf32> to vector<8x32xf32>
    %108 = arith.addf %107, %98 : vector<8x32xf32>
    %109 = arith.negf %108 : vector<8x32xf32>
    %110 = math.exp %109 : vector<8x32xf32>
    %cst_72 = arith.constant 1.000000e+00 : f32
    %111 = vector.broadcast %cst_72 : f32 to vector<8x32xf32>
    %112 = arith.addf %111, %110 : vector<8x32xf32>
    %113 = arith.divf %111, %112 : vector<8x32xf32>
    %114 = arith.index_cast %c1_i32 : i32 to index
    %c0_73 = arith.constant 0 : index
    %c0_74 = arith.constant 0 : index
    %115 = vector.load %arg10[%114, %c0_73, %c0_74] : memref<4x8x32xf32, #tpu.memory_space<vmem>>, vector<1x8x32xf32>
    %116 = vector.shape_cast %115 : vector<1x8x32xf32> to vector<8x32xf32>
    %117 = arith.addf %116, %101 : vector<8x32xf32>
    %118 = arith.negf %117 : vector<8x32xf32>
    %119 = math.exp %118 : vector<8x32xf32>
    %cst_75 = arith.constant 1.000000e+00 : f32
    %120 = vector.broadcast %cst_75 : f32 to vector<8x32xf32>
    %121 = arith.addf %120, %119 : vector<8x32xf32>
    %122 = arith.divf %120, %121 : vector<8x32xf32>
    %123 = arith.index_cast %c1_i32 : i32 to index
    %c0_76 = arith.constant 0 : index
    %c0_77 = arith.constant 0 : index
    %124 = vector.load %arg11[%123, %c0_76, %c0_77] : memref<4x8x32xf32, #tpu.memory_space<vmem>>, vector<1x8x32xf32>
    %125 = vector.shape_cast %124 : vector<1x8x32xf32> to vector<8x32xf32>
    %126 = arith.mulf %113, %104 : vector<8x32xf32>
    %127 = arith.addf %125, %126 : vector<8x32xf32>
    %128 = math.tanh %127 : vector<8x32xf32>
    %cst_78 = arith.constant 1.000000e+00 : f32
    %129 = vector.broadcast %cst_78 : f32 to vector<8x32xf32>
    %130 = arith.subf %129, %122 : vector<8x32xf32>
    %131 = arith.mulf %130, %128 : vector<8x32xf32>
    %132 = arith.mulf %122, %84 : vector<8x32xf32>
    %133 = arith.addf %131, %132 : vector<8x32xf32>
    %134 = arith.addi %33, %c1_i32 : i32
    %135 = vector.broadcast %134 : i32 to vector<8x1xi32>
    %136 = arith.cmpi slt, %135, %32 : vector<8x1xi32>
    %137 = arith.extui %136 : vector<8x1xi1> to vector<8x1xi32>
    %138 = arith.sitofp %137 : vector<8x1xi32> to vector<8x1xf32>
    %139 = vector.broadcast %138 : vector<8x1xf32> to vector<8x32xf32>
    %140 = arith.mulf %133, %139 : vector<8x32xf32>
    %141 = arith.index_cast %c1_i32 : i32 to index
    %c0_79 = arith.constant 0 : index
    %c0_80 = arith.constant 0 : index
    %142 = vector.load %arg8[%141, %c0_79, %c0_80] : memref<4x8x32xf32, #tpu.memory_space<vmem>>, vector<1x8x32xf32>
    %143 = vector.shape_cast %142 : vector<1x8x32xf32> to vector<8x32xf32>
    %144 = vector.shape_cast %140 : vector<8x32xf32> to vector<1x8x32xf32>
    tpu.vector_store %arg8[%141, %c0_79, %c0_80], %144 {strides = array<i32>} : memref<4x8x32xf32, #tpu.memory_space<vmem>>, vector<1x8x32xf32>,
    %c2_i32 = arith.constant 2 : i32
    %cst_81 = arith.constant dense<0.000000e+00> : vector<8x32xf32>
    %145 = tpu.matmul %133, %35, %cst_81 {dimension_numbers = #tpu.dot_dimension_numbers<[1], [0], [0], [1], [0, 0, 1, 1], [], []>} : vector<8x32xf32>, vector<32x32xf32>, vector<8x32xf32> -> vector<8x32xf32>
    %146 = vector.broadcast %41 : vector<1x32xf32> to vector<8x32xf32>
    %147 = arith.addf %145, %146 : vector<8x32xf32>
    %cst_82 = arith.constant dense<0.000000e+00> : vector<8x32xf32>
    %148 = tpu.matmul %133, %37, %cst_82 {dimension_numbers = #tpu.dot_dimension_numbers<[1], [0], [0], [1], [0, 0, 1, 1], [], []>} : vector<8x32xf32>, vector<32x32xf32>, vector<8x32xf32> -> vector<8x32xf32>
    %149 = vector.broadcast %43 : vector<1x32xf32> to vector<8x32xf32>
    %150 = arith.addf %148, %149 : vector<8x32xf32>
    %cst_83 = arith.constant dense<0.000000e+00> : vector<8x32xf32>
    %151 = tpu.matmul %133, %39, %cst_83 {dimension_numbers = #tpu.dot_dimension_numbers<[1], [0], [0], [1], [0, 0, 1, 1], [], []>} : vector<8x32xf32>, vector<32x32xf32>, vector<8x32xf32> -> vector<8x32xf32>
    %152 = vector.broadcast %45 : vector<1x32xf32> to vector<8x32xf32>
    %153 = arith.addf %151, %152 : vector<8x32xf32>
    %154 = arith.index_cast %c2_i32 : i32 to index
    %c0_84 = arith.constant 0 : index
    %c0_85 = arith.constant 0 : index
    %155 = vector.load %arg9[%154, %c0_84, %c0_85] : memref<4x8x32xf32, #tpu.memory_space<vmem>>, vector<1x8x32xf32>
    %156 = vector.shape_cast %155 : vector<1x8x32xf32> to vector<8x32xf32>
    %157 = arith.addf %156, %147 : vector<8x32xf32>
    %158 = arith.negf %157 : vector<8x32xf32>
    %159 = math.exp %158 : vector<8x32xf32>
    %cst_86 = arith.constant 1.000000e+00 : f32
    %160 = vector.broadcast %cst_86 : f32 to vector<8x32xf32>
    %161 = arith.addf %160, %159 : vector<8x32xf32>
    %162 = arith.divf %160, %161 : vector<8x32xf32>
    %163 = arith.index_cast %c2_i32 : i32 to index
    %c0_87 = arith.constant 0 : index
    %c0_88 = arith.constant 0 : index
    %164 = vector.load %arg10[%163, %c0_87, %c0_88] : memref<4x8x32xf32, #tpu.memory_space<vmem>>, vector<1x8x32xf32>
    %165 = vector.shape_cast %164 : vector<1x8x32xf32> to vector<8x32xf32>
    %166 = arith.addf %165, %150 : vector<8x32xf32>
    %167 = arith.negf %166 : vector<8x32xf32>
    %168 = math.exp %167 : vector<8x32xf32>
    %cst_89 = arith.constant 1.000000e+00 : f32
    %169 = vector.broadcast %cst_89 : f32 to vector<8x32xf32>
    %170 = arith.addf %169, %168 : vector<8x32xf32>
    %171 = arith.divf %169, %170 : vector<8x32xf32>
    %172 = arith.index_cast %c2_i32 : i32 to index
    %c0_90 = arith.constant 0 : index
    %c0_91 = arith.constant 0 : index
    %173 = vector.load %arg11[%172, %c0_90, %c0_91] : memref<4x8x32xf32, #tpu.memory_space<vmem>>, vector<1x8x32xf32>
    %174 = vector.shape_cast %173 : vector<1x8x32xf32> to vector<8x32xf32>
    %175 = arith.mulf %162, %153 : vector<8x32xf32>
    %176 = arith.addf %174, %175 : vector<8x32xf32>
    %177 = math.tanh %176 : vector<8x32xf32>
    %cst_92 = arith.constant 1.000000e+00 : f32
    %178 = vector.broadcast %cst_92 : f32 to vector<8x32xf32>
    %179 = arith.subf %178, %171 : vector<8x32xf32>
    %180 = arith.mulf %179, %177 : vector<8x32xf32>
    %181 = arith.mulf %171, %133 : vector<8x32xf32>
    %182 = arith.addf %180, %181 : vector<8x32xf32>
    %183 = arith.addi %33, %c2_i32 : i32
    %184 = vector.broadcast %183 : i32 to vector<8x1xi32>
    %185 = arith.cmpi slt, %184, %32 : vector<8x1xi32>
    %186 = arith.extui %185 : vector<8x1xi1> to vector<8x1xi32>
    %187 = arith.sitofp %186 : vector<8x1xi32> to vector<8x1xf32>
    %188 = vector.broadcast %187 : vector<8x1xf32> to vector<8x32xf32>
    %189 = arith.mulf %182, %188 : vector<8x32xf32>
    %190 = arith.index_cast %c2_i32 : i32 to index
    %c0_93 = arith.constant 0 : index
    %c0_94 = arith.constant 0 : index
    %191 = vector.load %arg8[%190, %c0_93, %c0_94] : memref<4x8x32xf32, #tpu.memory_space<vmem>>, vector<1x8x32xf32>
    %192 = vector.shape_cast %191 : vector<1x8x32xf32> to vector<8x32xf32>
    %193 = vector.shape_cast %189 : vector<8x32xf32> to vector<1x8x32xf32>
    tpu.vector_store %arg8[%190, %c0_93, %c0_94], %193 {strides = array<i32>} : memref<4x8x32xf32, #tpu.memory_space<vmem>>, vector<1x8x32xf32>,
    %c3_i32 = arith.constant 3 : i32
    %cst_95 = arith.constant dense<0.000000e+00> : vector<8x32xf32>
    %194 = tpu.matmul %182, %35, %cst_95 {dimension_numbers = #tpu.dot_dimension_numbers<[1], [0], [0], [1], [0, 0, 1, 1], [], []>} : vector<8x32xf32>, vector<32x32xf32>, vector<8x32xf32> -> vector<8x32xf32>
    %195 = vector.broadcast %41 : vector<1x32xf32> to vector<8x32xf32>
    %196 = arith.addf %194, %195 : vector<8x32xf32>
    %cst_96 = arith.constant dense<0.000000e+00> : vector<8x32xf32>
    %197 = tpu.matmul %182, %37, %cst_96 {dimension_numbers = #tpu.dot_dimension_numbers<[1], [0], [0], [1], [0, 0, 1, 1], [], []>} : vector<8x32xf32>, vector<32x32xf32>, vector<8x32xf32> -> vector<8x32xf32>
    %198 = vector.broadcast %43 : vector<1x32xf32> to vector<8x32xf32>
    %199 = arith.addf %197, %198 : vector<8x32xf32>
    %cst_97 = arith.constant dense<0.000000e+00> : vector<8x32xf32>
    %200 = tpu.matmul %182, %39, %cst_97 {dimension_numbers = #tpu.dot_dimension_numbers<[1], [0], [0], [1], [0, 0, 1, 1], [], []>} : vector<8x32xf32>, vector<32x32xf32>, vector<8x32xf32> -> vector<8x32xf32>
    %201 = vector.broadcast %45 : vector<1x32xf32> to vector<8x32xf32>
    %202 = arith.addf %200, %201 : vector<8x32xf32>
    %203 = arith.index_cast %c3_i32 : i32 to index
    %c0_98 = arith.constant 0 : index
    %c0_99 = arith.constant 0 : index
    %204 = vector.load %arg9[%203, %c0_98, %c0_99] : memref<4x8x32xf32, #tpu.memory_space<vmem>>, vector<1x8x32xf32>
    %205 = vector.shape_cast %204 : vector<1x8x32xf32> to vector<8x32xf32>
    %206 = arith.addf %205, %196 : vector<8x32xf32>
    %207 = arith.negf %206 : vector<8x32xf32>
    %208 = math.exp %207 : vector<8x32xf32>
    %cst_100 = arith.constant 1.000000e+00 : f32
    %209 = vector.broadcast %cst_100 : f32 to vector<8x32xf32>
    %210 = arith.addf %209, %208 : vector<8x32xf32>
    %211 = arith.divf %209, %210 : vector<8x32xf32>
    %212 = arith.index_cast %c3_i32 : i32 to index
    %c0_101 = arith.constant 0 : index
    %c0_102 = arith.constant 0 : index
    %213 = vector.load %arg10[%212, %c0_101, %c0_102] : memref<4x8x32xf32, #tpu.memory_space<vmem>>, vector<1x8x32xf32>
    %214 = vector.shape_cast %213 : vector<1x8x32xf32> to vector<8x32xf32>
    %215 = arith.addf %214, %199 : vector<8x32xf32>
    %216 = arith.negf %215 : vector<8x32xf32>
    %217 = math.exp %216 : vector<8x32xf32>
    %cst_103 = arith.constant 1.000000e+00 : f32
    %218 = vector.broadcast %cst_103 : f32 to vector<8x32xf32>
    %219 = arith.addf %218, %217 : vector<8x32xf32>
    %220 = arith.divf %218, %219 : vector<8x32xf32>
    %221 = arith.index_cast %c3_i32 : i32 to index
    %c0_104 = arith.constant 0 : index
    %c0_105 = arith.constant 0 : index
    %222 = vector.load %arg11[%221, %c0_104, %c0_105] : memref<4x8x32xf32, #tpu.memory_space<vmem>>, vector<1x8x32xf32>
    %223 = vector.shape_cast %222 : vector<1x8x32xf32> to vector<8x32xf32>
    %224 = arith.mulf %211, %202 : vector<8x32xf32>
    %225 = arith.addf %223, %224 : vector<8x32xf32>
    %226 = math.tanh %225 : vector<8x32xf32>
    %cst_106 = arith.constant 1.000000e+00 : f32
    %227 = vector.broadcast %cst_106 : f32 to vector<8x32xf32>
    %228 = arith.subf %227, %220 : vector<8x32xf32>
    %229 = arith.mulf %228, %226 : vector<8x32xf32>
    %230 = arith.mulf %220, %182 : vector<8x32xf32>
    %231 = arith.addf %229, %230 : vector<8x32xf32>
    %232 = arith.addi %33, %c3_i32 : i32
    %233 = vector.broadcast %232 : i32 to vector<8x1xi32>
    %234 = arith.cmpi slt, %233, %32 : vector<8x1xi32>
    %235 = arith.extui %234 : vector<8x1xi1> to vector<8x1xi32>
    %236 = arith.sitofp %235 : vector<8x1xi32> to vector<8x1xf32>
    %237 = vector.broadcast %236 : vector<8x1xf32> to vector<8x32xf32>
    %238 = arith.mulf %231, %237 : vector<8x32xf32>
    %239 = arith.index_cast %c3_i32 : i32 to index
    %c0_107 = arith.constant 0 : index
    %c0_108 = arith.constant 0 : index
    %240 = vector.load %arg8[%239, %c0_107, %c0_108] : memref<4x8x32xf32, #tpu.memory_space<vmem>>, vector<1x8x32xf32>
    %241 = vector.shape_cast %240 : vector<1x8x32xf32> to vector<8x32xf32>
    %242 = vector.shape_cast %238 : vector<8x32xf32> to vector<1x8x32xf32>
    tpu.vector_store %arg8[%239, %c0_107, %c0_108], %242 {strides = array<i32>} : memref<4x8x32xf32, #tpu.memory_space<vmem>>, vector<1x8x32xf32>,
    %c4_i32_109 = arith.constant 4 : i32
    %c0_110 = arith.constant 0 : index
    %c0_111 = arith.constant 0 : index
    %243 = vector.load %arg12[%c0_110, %c0_111] : memref<8x32xf32, #tpu.memory_space<vmem>>, vector<8x32xf32>
    tpu.vector_store %arg12[%c0_110, %c0_111], %231 {strides = array<i32>} : memref<8x32xf32, #tpu.memory_space<vmem>>, vector<8x32xf32>,
    return
  }
  func.func @transform_0(%arg0: i32, %arg1: i32) -> (i32, i32) {
    %c0_i32 = arith.constant 0 : i32
    %c0_i32_0 = arith.constant 0 : i32
    return %arg0, %c0_i32 : i32, i32
  }
  func.func @transform_1(%arg0: i32, %arg1: i32) -> (i32, i32, i32) {
    %c0_i32 = arith.constant 0 : i32
    %c0_i32_0 = arith.constant 0 : i32
    return %arg1, %arg0, %c0_i32 : i32, i32, i32
  }
  func.func @transform_2(%arg0: i32, %arg1: i32) -> (i32, i32, i32) {
    %c0_i32 = arith.constant 0 : i32
    %c0_i32_0 = arith.constant 0 : i32
    %c0_i32_1 = arith.constant 0 : i32
    %c0_i32_2 = arith.constant 0 : i32
    return %c0_i32, %c0_i32_0, %c0_i32_1 : i32, i32, i32
  }
  func.func @transform_3(%arg0: i32, %arg1: i32) -> (i32, i32, i32) {
    %c0_i32 = arith.constant 0 : i32
    %c0_i32_0 = arith.constant 0 : i32
    %c0_i32_1 = arith.constant 0 : i32
    %c0_i32_2 = arith.constant 0 : i32
    return %c0_i32, %c0_i32_0, %c0_i32_1 : i32, i32, i32
  }
  func.func @transform_4(%arg0: i32, %arg1: i32) -> (i32, i32, i32) {
    %c0_i32 = arith.constant 0 : i32
    %c0_i32_0 = arith.constant 0 : i32
    %c0_i32_1 = arith.constant 0 : i32
    %c0_i32_2 = arith.constant 0 : i32
    return %c0_i32, %c0_i32_0, %c0_i32_1 : i32, i32, i32
  }
  func.func @transform_5(%arg0: i32, %arg1: i32) -> (i32, i32, i32) {
    %c0_i32 = arith.constant 0 : i32
    %c0_i32_0 = arith.constant 0 : i32
    %c0_i32_1 = arith.constant 0 : i32
    %c0_i32_2 = arith.constant 0 : i32
    return %c0_i32, %c0_i32_0, %c0_i32_1 : i32, i32, i32
  }
  func.func @transform_6(%arg0: i32, %arg1: i32) -> (i32, i32, i32) {
    %c0_i32 = arith.constant 0 : i32
    %c0_i32_0 = arith.constant 0 : i32
    return %arg1, %arg0, %c0_i32 : i32, i32, i32
  }
}

module attributes {stable_mosaic.version = 11 : i64} {
  func.func @_enc_head_kernel(%arg0: i32, %arg1: memref<64x32xf32, #tpu.memory_space<vmem>>, %arg2: memref<32x8xf32, #tpu.memory_space<vmem>>, %arg3: memref<32x8xf32, #tpu.memory_space<vmem>>, %arg4: memref<1x8xf32, #tpu.memory_space<vmem>>, %arg5: memref<1x8xf32, #tpu.memory_space<vmem>>, %arg6: memref<64x8xf32, #tpu.memory_space<vmem>>, %arg7: memref<3x64x8xf32, #tpu.memory_space<vmem>>) attributes {dimension_semantics = [#tpu.dimension_semantics<parallel>], iteration_bounds = array<i64: 1>, scalar_prefetch = 0 : i64, scratch_operands = 0 : i64, tpu.core_type = #tpu.core_type<tc>, window_params = [{transform_indices = @transform_0, window_bounds = array<i64: 64, 32>}, {pipeline_mode = #tpu.pipeline_mode<synchronous>, transform_indices = @transform_1, window_bounds = array<i64: 32, 8>}, {pipeline_mode = #tpu.pipeline_mode<synchronous>, transform_indices = @transform_2, window_bounds = array<i64: 32, 8>}, {pipeline_mode = #tpu.pipeline_mode<synchronous>, transform_indices = @transform_3, window_bounds = array<i64: 1, 8>}, {pipeline_mode = #tpu.pipeline_mode<synchronous>, transform_indices = @transform_4, window_bounds = array<i64: 1, 8>}, {transform_indices = @transform_5, window_bounds = array<i64: 64, 8>}, {transform_indices = @transform_6, window_bounds = array<i64: 3, 64, 8>}]} {
    %c0 = arith.constant 0 : index
    %c0_0 = arith.constant 0 : index
    %0 = vector.load %arg1[%c0, %c0_0] : memref<64x32xf32, #tpu.memory_space<vmem>>, vector<64x32xf32>
    %c0_1 = arith.constant 0 : index
    %c0_2 = arith.constant 0 : index
    %1 = vector.load %arg2[%c0_1, %c0_2] : memref<32x8xf32, #tpu.memory_space<vmem>>, vector<32x8xf32>
    %cst = arith.constant dense<0.000000e+00> : vector<64x8xf32>
    %2 = tpu.matmul %0, %1, %cst {dimension_numbers = #tpu.dot_dimension_numbers<[1], [0], [0], [1], [0, 0, 1, 1], [], []>} : vector<64x32xf32>, vector<32x8xf32>, vector<64x8xf32> -> vector<64x8xf32>
    %c0_3 = arith.constant 0 : index
    %c0_4 = arith.constant 0 : index
    %3 = vector.load %arg4[%c0_3, %c0_4] : memref<1x8xf32, #tpu.memory_space<vmem>>, vector<1x8xf32>
    %4 = vector.broadcast %3 : vector<1x8xf32> to vector<64x8xf32>
    %5 = arith.addf %2, %4 : vector<64x8xf32>
    %c0_5 = arith.constant 0 : index
    %c0_6 = arith.constant 0 : index
    %6 = vector.load %arg3[%c0_5, %c0_6] : memref<32x8xf32, #tpu.memory_space<vmem>>, vector<32x8xf32>
    %cst_7 = arith.constant dense<0.000000e+00> : vector<64x8xf32>
    %7 = tpu.matmul %0, %6, %cst_7 {dimension_numbers = #tpu.dot_dimension_numbers<[1], [0], [0], [1], [0, 0, 1, 1], [], []>} : vector<64x32xf32>, vector<32x8xf32>, vector<64x8xf32> -> vector<64x8xf32>
    %c0_8 = arith.constant 0 : index
    %c0_9 = arith.constant 0 : index
    %8 = vector.load %arg5[%c0_8, %c0_9] : memref<1x8xf32, #tpu.memory_space<vmem>>, vector<1x8xf32>
    %9 = vector.broadcast %8 : vector<1x8xf32> to vector<64x8xf32>
    %10 = arith.addf %7, %9 : vector<64x8xf32>
    %11 = math.exp %10 : vector<64x8xf32>
    %c0_10 = arith.constant 0 : index
    %c0_11 = arith.constant 0 : index
    %12 = vector.load %arg6[%c0_10, %c0_11] : memref<64x8xf32, #tpu.memory_space<vmem>>, vector<64x8xf32>
    %13 = arith.mulf %11, %12 : vector<64x8xf32>
    %14 = arith.addf %5, %13 : vector<64x8xf32>
    %c0_12 = arith.constant 0 : index
    %c0_13 = arith.constant 0 : index
    %c0_14 = arith.constant 0 : index
    %15 = vector.load %arg7[%c0_12, %c0_13, %c0_14] : memref<3x64x8xf32, #tpu.memory_space<vmem>>, vector<1x64x8xf32>
    %16 = vector.shape_cast %15 : vector<1x64x8xf32> to vector<64x8xf32>
    %17 = vector.shape_cast %5 : vector<64x8xf32> to vector<1x64x8xf32>
    tpu.vector_store %arg7[%c0_12, %c0_13, %c0_14], %17 {strides = array<i32>} : memref<3x64x8xf32, #tpu.memory_space<vmem>>, vector<1x64x8xf32>,
    %c1 = arith.constant 1 : index
    %c0_15 = arith.constant 0 : index
    %c0_16 = arith.constant 0 : index
    %18 = vector.load %arg7[%c1, %c0_15, %c0_16] : memref<3x64x8xf32, #tpu.memory_space<vmem>>, vector<1x64x8xf32>
    %19 = vector.shape_cast %18 : vector<1x64x8xf32> to vector<64x8xf32>
    %20 = vector.shape_cast %10 : vector<64x8xf32> to vector<1x64x8xf32>
    tpu.vector_store %arg7[%c1, %c0_15, %c0_16], %20 {strides = array<i32>} : memref<3x64x8xf32, #tpu.memory_space<vmem>>, vector<1x64x8xf32>,
    %c2 = arith.constant 2 : index
    %c0_17 = arith.constant 0 : index
    %c0_18 = arith.constant 0 : index
    %21 = vector.load %arg7[%c2, %c0_17, %c0_18] : memref<3x64x8xf32, #tpu.memory_space<vmem>>, vector<1x64x8xf32>
    %22 = vector.shape_cast %21 : vector<1x64x8xf32> to vector<64x8xf32>
    %23 = vector.shape_cast %14 : vector<64x8xf32> to vector<1x64x8xf32>
    tpu.vector_store %arg7[%c2, %c0_17, %c0_18], %23 {strides = array<i32>} : memref<3x64x8xf32, #tpu.memory_space<vmem>>, vector<1x64x8xf32>,
    return
  }
  func.func @transform_0(%arg0: i32) -> (i32, i32) {
    %c0_i32 = arith.constant 0 : i32
    %c0_i32_0 = arith.constant 0 : i32
    return %arg0, %c0_i32 : i32, i32
  }
  func.func @transform_1(%arg0: i32) -> (i32, i32) {
    %c0_i32 = arith.constant 0 : i32
    %c0_i32_0 = arith.constant 0 : i32
    %c0_i32_1 = arith.constant 0 : i32
    return %c0_i32, %c0_i32_0 : i32, i32
  }
  func.func @transform_2(%arg0: i32) -> (i32, i32) {
    %c0_i32 = arith.constant 0 : i32
    %c0_i32_0 = arith.constant 0 : i32
    %c0_i32_1 = arith.constant 0 : i32
    return %c0_i32, %c0_i32_0 : i32, i32
  }
  func.func @transform_3(%arg0: i32) -> (i32, i32) {
    %c0_i32 = arith.constant 0 : i32
    %c0_i32_0 = arith.constant 0 : i32
    %c0_i32_1 = arith.constant 0 : i32
    return %c0_i32, %c0_i32_0 : i32, i32
  }
  func.func @transform_4(%arg0: i32) -> (i32, i32) {
    %c0_i32 = arith.constant 0 : i32
    %c0_i32_0 = arith.constant 0 : i32
    %c0_i32_1 = arith.constant 0 : i32
    return %c0_i32, %c0_i32_0 : i32, i32
  }
  func.func @transform_5(%arg0: i32) -> (i32, i32) {
    %c0_i32 = arith.constant 0 : i32
    %c0_i32_0 = arith.constant 0 : i32
    return %arg0, %c0_i32 : i32, i32
  }
  func.func @transform_6(%arg0: i32) -> (i32, i32, i32) {
    %c0_i32 = arith.constant 0 : i32
    %c0_i32_0 = arith.constant 0 : i32
    %c0_i32_1 = arith.constant 0 : i32
    return %c0_i32, %arg0, %c0_i32_0 : i32, i32, i32
  }
}

module attributes {stable_mosaic.version = 11 : i64} {
  func.func @_gru_fused_kernel(%arg0: i32, %arg1: i32, %arg2: memref<8x1xi32, #tpu.memory_space<vmem>>, %arg3: memref<4x8x32xf32, #tpu.memory_space<vmem>>, %arg4: memref<3x32x32xf32, #tpu.memory_space<vmem>>, %arg5: memref<3x32x32xf32, #tpu.memory_space<vmem>>, %arg6: memref<3x1x32xf32, #tpu.memory_space<vmem>>, %arg7: memref<3x1x32xf32, #tpu.memory_space<vmem>>, %arg8: memref<4x8x32xf32, #tpu.memory_space<vmem>>, %arg9: memref<4x8x32xf32, #tpu.memory_space<vmem>>, %arg10: memref<4x8x32xf32, #tpu.memory_space<vmem>>, %arg11: memref<4x8x32xf32, #tpu.memory_space<vmem>>, %arg12: memref<8x32xf32, #tpu.memory_space<vmem>>) attributes {dimension_semantics = [#tpu.dimension_semantics<parallel>, #tpu.dimension_semantics<arbitrary>], iteration_bounds = array<i64: 1, 2>, scalar_prefetch = 0 : i64, scratch_operands = 4 : i64, tpu.core_type = #tpu.core_type<tc>, window_params = [{transform_indices = @transform_0, window_bounds = array<i64: 8, 1>}, {transform_indices = @transform_1, window_bounds = array<i64: 4, 8, 32>}, {pipeline_mode = #tpu.pipeline_mode<synchronous>, transform_indices = @transform_2, window_bounds = array<i64: 3, 32, 32>}, {pipeline_mode = #tpu.pipeline_mode<synchronous>, transform_indices = @transform_3, window_bounds = array<i64: 3, 32, 32>}, {pipeline_mode = #tpu.pipeline_mode<synchronous>, transform_indices = @transform_4, window_bounds = array<i64: 3, 1, 32>}, {pipeline_mode = #tpu.pipeline_mode<synchronous>, transform_indices = @transform_5, window_bounds = array<i64: 3, 1, 32>}, {transform_indices = @transform_6, window_bounds = array<i64: 4, 8, 32>}]} {
    %c0_i32 = arith.constant 0 : i32
    %0 = arith.cmpi eq, %arg1, %c0_i32 : i32
    %1 = arith.extui %0 : i1 to i32
    %c0_i32_0 = arith.constant 0 : i32
    %2 = arith.cmpi ne, %1, %c0_i32_0 : i32
    scf.if %2 {
      %cst_112 = arith.constant 0.000000e+00 : f32
      %244 = vector.broadcast %cst_112 : f32 to vector<8x32xf32>
      %c0_113 = arith.constant 0 : index
      %c0_114 = arith.constant 0 : index
      %245 = vector.load %arg12[%c0_113, %c0_114] : memref<8x32xf32, #tpu.memory_space<vmem>>, vector<8x32xf32>
      tpu.vector_store %arg12[%c0_113, %c0_114], %244 {strides = array<i32>} : memref<8x32xf32, #tpu.memory_space<vmem>>, vector<8x32xf32>,
    } else {
    }
    %c0 = arith.constant 0 : index
    %c0_1 = arith.constant 0 : index
    %c0_2 = arith.constant 0 : index
    %3 = vector.load %arg3[%c0, %c0_1, %c0_2] : memref<4x8x32xf32, #tpu.memory_space<vmem>>, vector<4x8x32xf32>
    %4 = vector.shape_cast %3 : vector<4x8x32xf32> to vector<32x32xf32>
    %c0_3 = arith.constant 0 : index
    %c0_4 = arith.constant 0 : index
    %c0_5 = arith.constant 0 : index
    %5 = vector.load %arg4[%c0_3, %c0_4, %c0_5] : memref<3x32x32xf32, #tpu.memory_space<vmem>>, vector<1x32x32xf32>
    %6 = vector.shape_cast %5 : vector<1x32x32xf32> to vector<32x32xf32>
    %cst = arith.constant dense<0.000000e+00> : vector<32x32xf32>
    %7 = tpu.matmul %4, %6, %cst {dimension_numbers = #tpu.dot_dimension_numbers<[1], [0], [0], [1], [0, 0, 1, 1], [], []>} : vector<32x32xf32>, vector<32x32xf32>, vector<32x32xf32> -> vector<32x32xf32>
    %c0_6 = arith.constant 0 : index
    %c0_7 = arith.constant 0 : index
    %c0_8 = arith.constant 0 : index
    %8 = vector.load %arg6[%c0_6, %c0_7, %c0_8] : memref<3x1x32xf32, #tpu.memory_space<vmem>>, vector<1x1x32xf32>
    %9 = vector.shape_cast %8 : vector<1x1x32xf32> to vector<1x32xf32>
    %10 = vector.broadcast %9 : vector<1x32xf32> to vector<32x32xf32>
    %11 = arith.addf %7, %10 : vector<32x32xf32>
    %12 = vector.shape_cast %11 : vector<32x32xf32> to vector<4x8x32xf32>
    %c0_9 = arith.constant 0 : index
    %c0_10 = arith.constant 0 : index
    %c0_11 = arith.constant 0 : index
    %13 = vector.load %arg9[%c0_9, %c0_10, %c0_11] : memref<4x8x32xf32, #tpu.memory_space<vmem>>, vector<4x8x32xf32>
    tpu.vector_store %arg9[%c0_9, %c0_10, %c0_11], %12 {strides = array<i32>} : memref<4x8x32xf32, #tpu.memory_space<vmem>>, vector<4x8x32xf32>,
    %c1 = arith.constant 1 : index
    %c0_12 = arith.constant 0 : index
    %c0_13 = arith.constant 0 : index
    %14 = vector.load %arg4[%c1, %c0_12, %c0_13] : memref<3x32x32xf32, #tpu.memory_space<vmem>>, vector<1x32x32xf32>
    %15 = vector.shape_cast %14 : vector<1x32x32xf32> to vector<32x32xf32>
    %cst_14 = arith.constant dense<0.000000e+00> : vector<32x32xf32>
    %16 = tpu.matmul %4, %15, %cst_14 {dimension_numbers = #tpu.dot_dimension_numbers<[1], [0], [0], [1], [0, 0, 1, 1], [], []>} : vector<32x32xf32>, vector<32x32xf32>, vector<32x32xf32> -> vector<32x32xf32>
    %c1_15 = arith.constant 1 : index
    %c0_16 = arith.constant 0 : index
    %c0_17 = arith.constant 0 : index
    %17 = vector.load %arg6[%c1_15, %c0_16, %c0_17] : memref<3x1x32xf32, #tpu.memory_space<vmem>>, vector<1x1x32xf32>
    %18 = vector.shape_cast %17 : vector<1x1x32xf32> to vector<1x32xf32>
    %19 = vector.broadcast %18 : vector<1x32xf32> to vector<32x32xf32>
    %20 = arith.addf %16, %19 : vector<32x32xf32>
    %21 = vector.shape_cast %20 : vector<32x32xf32> to vector<4x8x32xf32>
    %c0_18 = arith.constant 0 : index
    %c0_19 = arith.constant 0 : index
    %c0_20 = arith.constant 0 : index
    %22 = vector.load %arg10[%c0_18, %c0_19, %c0_20] : memref<4x8x32xf32, #tpu.memory_space<vmem>>, vector<4x8x32xf32>
    tpu.vector_store %arg10[%c0_18, %c0_19, %c0_20], %21 {strides = array<i32>} : memref<4x8x32xf32, #tpu.memory_space<vmem>>, vector<4x8x32xf32>,
    %c2 = arith.constant 2 : index
    %c0_21 = arith.constant 0 : index
    %c0_22 = arith.constant 0 : index
    %23 = vector.load %arg4[%c2, %c0_21, %c0_22] : memref<3x32x32xf32, #tpu.memory_space<vmem>>, vector<1x32x32xf32>
    %24 = vector.shape_cast %23 : vector<1x32x32xf32> to vector<32x32xf32>
    %cst_23 = arith.constant dense<0.000000e+00> : vector<32x32xf32>
    %25 = tpu.matmul %4, %24, %cst_23 {dimension_numbers = #tpu.dot_dimension_numbers<[1], [0], [0], [1], [0, 0, 1, 1], [], []>} : vector<32x32xf32>, vector<32x32xf32>, vector<32x32xf32> -> vector<32x32xf32>
    %c2_24 = arith.constant 2 : index
    %c0_25 = arith.constant 0 : index
    %c0_26 = arith.constant 0 : index
    %26 = vector.load %arg6[%c2_24, %c0_25, %c0_26] : memref<3x1x32xf32, #tpu.memory_space<vmem>>, vector<1x1x32xf32>
    %27 = vector.shape_cast %26 : vector<1x1x32xf32> to vector<1x32xf32>
    %28 = vector.broadcast %27 : vector<1x32xf32> to vector<32x32xf32>
    %29 = arith.addf %25, %28 : vector<32x32xf32>
    %30 = vector.shape_cast %29 : vector<32x32xf32> to vector<4x8x32xf32>
    %c0_27 = arith.constant 0 : index
    %c0_28 = arith.constant 0 : index
    %c0_29 = arith.constant 0 : index
    %31 = vector.load %arg11[%c0_27, %c0_28, %c0_29] : memref<4x8x32xf32, #tpu.memory_space<vmem>>, vector<4x8x32xf32>
    tpu.vector_store %arg11[%c0_27, %c0_28, %c0_29], %30 {strides = array<i32>} : memref<4x8x32xf32, #tpu.memory_space<vmem>>, vector<4x8x32xf32>,
    %c0_30 = arith.constant 0 : index
    %c0_31 = arith.constant 0 : index
    %32 = vector.load %arg2[%c0_30, %c0_31] : memref<8x1xi32, #tpu.memory_space<vmem>>, vector<8x1xi32>
    %c4_i32 = arith.constant 4 : i32
    %33 = arith.muli %arg1, %c4_i32 : i32
    %c0_32 = arith.constant 0 : index
    %c0_33 = arith.constant 0 : index
    %c0_34 = arith.constant 0 : index
    %34 = vector.load %arg5[%c0_32, %c0_33, %c0_34] : memref<3x32x32xf32, #tpu.memory_space<vmem>>, vector<1x32x32xf32>
    %35 = vector.shape_cast %34 : vector<1x32x32xf32> to vector<32x32xf32>
    %c1_35 = arith.constant 1 : index
    %c0_36 = arith.constant 0 : index
    %c0_37 = arith.constant 0 : index
    %36 = vector.load %arg5[%c1_35, %c0_36, %c0_37] : memref<3x32x32xf32, #tpu.memory_space<vmem>>, vector<1x32x32xf32>
    %37 = vector.shape_cast %36 : vector<1x32x32xf32> to vector<32x32xf32>
    %c2_38 = arith.constant 2 : index
    %c0_39 = arith.constant 0 : index
    %c0_40 = arith.constant 0 : index
    %38 = vector.load %arg5[%c2_38, %c0_39, %c0_40] : memref<3x32x32xf32, #tpu.memory_space<vmem>>, vector<1x32x32xf32>
    %39 = vector.shape_cast %38 : vector<1x32x32xf32> to vector<32x32xf32>
    %c0_41 = arith.constant 0 : index
    %c0_42 = arith.constant 0 : index
    %c0_43 = arith.constant 0 : index
    %40 = vector.load %arg7[%c0_41, %c0_42, %c0_43] : memref<3x1x32xf32, #tpu.memory_space<vmem>>, vector<1x1x32xf32>
    %41 = vector.shape_cast %40 : vector<1x1x32xf32> to vector<1x32xf32>
    %c1_44 = arith.constant 1 : index
    %c0_45 = arith.constant 0 : index
    %c0_46 = arith.constant 0 : index
    %42 = vector.load %arg7[%c1_44, %c0_45, %c0_46] : memref<3x1x32xf32, #tpu.memory_space<vmem>>, vector<1x1x32xf32>
    %43 = vector.shape_cast %42 : vector<1x1x32xf32> to vector<1x32xf32>
    %c2_47 = arith.constant 2 : index
    %c0_48 = arith.constant 0 : index
    %c0_49 = arith.constant 0 : index
    %44 = vector.load %arg7[%c2_47, %c0_48, %c0_49] : memref<3x1x32xf32, #tpu.memory_space<vmem>>, vector<1x1x32xf32>
    %45 = vector.shape_cast %44 : vector<1x1x32xf32> to vector<1x32xf32>
    %c0_50 = arith.constant 0 : index
    %c0_51 = arith.constant 0 : index
    %46 = vector.load %arg12[%c0_50, %c0_51] : memref<8x32xf32, #tpu.memory_space<vmem>>, vector<8x32xf32>
    %c0_i32_52 = arith.constant 0 : i32
    %cst_53 = arith.constant dense<0.000000e+00> : vector<8x32xf32>
    %47 = tpu.matmul %46, %35, %cst_53 {dimension_numbers = #tpu.dot_dimension_numbers<[1], [0], [0], [1], [0, 0, 1, 1], [], []>} : vector<8x32xf32>, vector<32x32xf32>, vector<8x32xf32> -> vector<8x32xf32>
    %48 = vector.broadcast %41 : vector<1x32xf32> to vector<8x32xf32>
    %49 = arith.addf %47, %48 : vector<8x32xf32>
    %cst_54 = arith.constant dense<0.000000e+00> : vector<8x32xf32>
    %50 = tpu.matmul %46, %37, %cst_54 {dimension_numbers = #tpu.dot_dimension_numbers<[1], [0], [0], [1], [0, 0, 1, 1], [], []>} : vector<8x32xf32>, vector<32x32xf32>, vector<8x32xf32> -> vector<8x32xf32>
    %51 = vector.broadcast %43 : vector<1x32xf32> to vector<8x32xf32>
    %52 = arith.addf %50, %51 : vector<8x32xf32>
    %cst_55 = arith.constant dense<0.000000e+00> : vector<8x32xf32>
    %53 = tpu.matmul %46, %39, %cst_55 {dimension_numbers = #tpu.dot_dimension_numbers<[1], [0], [0], [1], [0, 0, 1, 1], [], []>} : vector<8x32xf32>, vector<32x32xf32>, vector<8x32xf32> -> vector<8x32xf32>
    %54 = vector.broadcast %45 : vector<1x32xf32> to vector<8x32xf32>
    %55 = arith.addf %53, %54 : vector<8x32xf32>
    %56 = arith.index_cast %c0_i32_52 : i32 to index
    %c0_56 = arith.constant 0 : index
    %c0_57 = arith.constant 0 : index
    %57 = vector.load %arg9[%56, %c0_56, %c0_57] : memref<4x8x32xf32, #tpu.memory_space<vmem>>, vector<1x8x32xf32>
    %58 = vector.shape_cast %57 : vector<1x8x32xf32> to vector<8x32xf32>
    %59 = arith.addf %58, %49 : vector<8x32xf32>
    %60 = arith.negf %59 : vector<8x32xf32>
    %61 = math.exp %60 : vector<8x32xf32>
    %cst_58 = arith.constant 1.000000e+00 : f32
    %62 = vector.broadcast %cst_58 : f32 to vector<8x32xf32>
    %63 = arith.addf %62, %61 : vector<8x32xf32>
    %64 = arith.divf %62, %63 : vector<8x32xf32>
    %65 = arith.index_cast %c0_i32_52 : i32 to index
    %c0_59 = arith.constant 0 : index
    %c0_60 = arith.constant 0 : index
    %66 = vector.load %arg10[%65, %c0_59, %c0_60] : memref<4x8x32xf32, #tpu.memory_space<vmem>>, vector<1x8x32xf32>
    %67 = vector.shape_cast %66 : vector<1x8x32xf32> to vector<8x32xf32>
    %68 = arith.addf %67, %52 : vector<8x32xf32>
    %69 = arith.negf %68 : vector<8x32xf32>
    %70 = math.exp %69 : vector<8x32xf32>
    %cst_61 = arith.constant 1.000000e+00 : f32
    %71 = vector.broadcast %cst_61 : f32 to vector<8x32xf32>
    %72 = arith.addf %71, %70 : vector<8x32xf32>
    %73 = arith.divf %71, %72 : vector<8x32xf32>
    %74 = arith.index_cast %c0_i32_52 : i32 to index
    %c0_62 = arith.constant 0 : index
    %c0_63 = arith.constant 0 : index
    %75 = vector.load %arg11[%74, %c0_62, %c0_63] : memref<4x8x32xf32, #tpu.memory_space<vmem>>, vector<1x8x32xf32>
    %76 = vector.shape_cast %75 : vector<1x8x32xf32> to vector<8x32xf32>
    %77 = arith.mulf %64, %55 : vector<8x32xf32>
    %78 = arith.addf %76, %77 : vector<8x32xf32>
    %79 = math.tanh %78 : vector<8x32xf32>
    %cst_64 = arith.constant 1.000000e+00 : f32
    %80 = vector.broadcast %cst_64 : f32 to vector<8x32xf32>
    %81 = arith.subf %80, %73 : vector<8x32xf32>
    %82 = arith.mulf %81, %79 : vector<8x32xf32>
    %83 = arith.mulf %73, %46 : vector<8x32xf32>
    %84 = arith.addf %82, %83 : vector<8x32xf32>
    %85 = arith.addi %33, %c0_i32_52 : i32
    %86 = vector.broadcast %85 : i32 to vector<8x1xi32>
    %87 = arith.cmpi slt, %86, %32 : vector<8x1xi32>
    %88 = arith.extui %87 : vector<8x1xi1> to vector<8x1xi32>
    %89 = arith.sitofp %88 : vector<8x1xi32> to vector<8x1xf32>
    %90 = vector.broadcast %89 : vector<8x1xf32> to vector<8x32xf32>
    %91 = arith.mulf %84, %90 : vector<8x32xf32>
    %92 = arith.index_cast %c0_i32_52 : i32 to index
    %c0_65 = arith.constant 0 : index
    %c0_66 = arith.constant 0 : index
    %93 = vector.load %arg8[%92, %c0_65, %c0_66] : memref<4x8x32xf32, #tpu.memory_space<vmem>>, vector<1x8x32xf32>
    %94 = vector.shape_cast %93 : vector<1x8x32xf32> to vector<8x32xf32>
    %95 = vector.shape_cast %91 : vector<8x32xf32> to vector<1x8x32xf32>
    tpu.vector_store %arg8[%92, %c0_65, %c0_66], %95 {strides = array<i32>} : memref<4x8x32xf32, #tpu.memory_space<vmem>>, vector<1x8x32xf32>,
    %c1_i32 = arith.constant 1 : i32
    %cst_67 = arith.constant dense<0.000000e+00> : vector<8x32xf32>
    %96 = tpu.matmul %84, %35, %cst_67 {dimension_numbers = #tpu.dot_dimension_numbers<[1], [0], [0], [1], [0, 0, 1, 1], [], []>} : vector<8x32xf32>, vector<32x32xf32>, vector<8x32xf32> -> vector<8x32xf32>
    %97 = vector.broadcast %41 : vector<1x32xf32> to vector<8x32xf32>
    %98 = arith.addf %96, %97 : vector<8x32xf32>
    %cst_68 = arith.constant dense<0.000000e+00> : vector<8x32xf32>
    %99 = tpu.matmul %84, %37, %cst_68 {dimension_numbers = #tpu.dot_dimension_numbers<[1], [0], [0], [1], [0, 0, 1, 1], [], []>} : vector<8x32xf32>, vector<32x32xf32>, vector<8x32xf32> -> vector<8x32xf32>
    %100 = vector.broadcast %43 : vector<1x32xf32> to vector<8x32xf32>
    %101 = arith.addf %99, %100 : vector<8x32xf32>
    %cst_69 = arith.constant dense<0.000000e+00> : vector<8x32xf32>
    %102 = tpu.matmul %84, %39, %cst_69 {dimension_numbers = #tpu.dot_dimension_numbers<[1], [0], [0], [1], [0, 0, 1, 1], [], []>} : vector<8x32xf32>, vector<32x32xf32>, vector<8x32xf32> -> vector<8x32xf32>
    %103 = vector.broadcast %45 : vector<1x32xf32> to vector<8x32xf32>
    %104 = arith.addf %102, %103 : vector<8x32xf32>
    %105 = arith.index_cast %c1_i32 : i32 to index
    %c0_70 = arith.constant 0 : index
    %c0_71 = arith.constant 0 : index
    %106 = vector.load %arg9[%105, %c0_70, %c0_71] : memref<4x8x32xf32, #tpu.memory_space<vmem>>, vector<1x8x32xf32>
    %107 = vector.shape_cast %106 : vector<1x8x32xf32> to vector<8x32xf32>
    %108 = arith.addf %107, %98 : vector<8x32xf32>
    %109 = arith.negf %108 : vector<8x32xf32>
    %110 = math.exp %109 : vector<8x32xf32>
    %cst_72 = arith.constant 1.000000e+00 : f32
    %111 = vector.broadcast %cst_72 : f32 to vector<8x32xf32>
    %112 = arith.addf %111, %110 : vector<8x32xf32>
    %113 = arith.divf %111, %112 : vector<8x32xf32>
    %114 = arith.index_cast %c1_i32 : i32 to index
    %c0_73 = arith.constant 0 : index
    %c0_74 = arith.constant 0 : index
    %115 = vector.load %arg10[%114, %c0_73, %c0_74] : memref<4x8x32xf32, #tpu.memory_space<vmem>>, vector<1x8x32xf32>
    %116 = vector.shape_cast %115 : vector<1x8x32xf32> to vector<8x32xf32>
    %117 = arith.addf %116, %101 : vector<8x32xf32>
    %118 = arith.negf %117 : vector<8x32xf32>
    %119 = math.exp %118 : vector<8x32xf32>
    %cst_75 = arith.constant 1.000000e+00 : f32
    %120 = vector.broadcast %cst_75 : f32 to vector<8x32xf32>
    %121 = arith.addf %120, %119 : vector<8x32xf32>
    %122 = arith.divf %120, %121 : vector<8x32xf32>
    %123 = arith.index_cast %c1_i32 : i32 to index
    %c0_76 = arith.constant 0 : index
    %c0_77 = arith.constant 0 : index
    %124 = vector.load %arg11[%123, %c0_76, %c0_77] : memref<4x8x32xf32, #tpu.memory_space<vmem>>, vector<1x8x32xf32>
    %125 = vector.shape_cast %124 : vector<1x8x32xf32> to vector<8x32xf32>
    %126 = arith.mulf %113, %104 : vector<8x32xf32>
    %127 = arith.addf %125, %126 : vector<8x32xf32>
    %128 = math.tanh %127 : vector<8x32xf32>
    %cst_78 = arith.constant 1.000000e+00 : f32
    %129 = vector.broadcast %cst_78 : f32 to vector<8x32xf32>
    %130 = arith.subf %129, %122 : vector<8x32xf32>
    %131 = arith.mulf %130, %128 : vector<8x32xf32>
    %132 = arith.mulf %122, %84 : vector<8x32xf32>
    %133 = arith.addf %131, %132 : vector<8x32xf32>
    %134 = arith.addi %33, %c1_i32 : i32
    %135 = vector.broadcast %134 : i32 to vector<8x1xi32>
    %136 = arith.cmpi slt, %135, %32 : vector<8x1xi32>
    %137 = arith.extui %136 : vector<8x1xi1> to vector<8x1xi32>
    %138 = arith.sitofp %137 : vector<8x1xi32> to vector<8x1xf32>
    %139 = vector.broadcast %138 : vector<8x1xf32> to vector<8x32xf32>
    %140 = arith.mulf %133, %139 : vector<8x32xf32>
    %141 = arith.index_cast %c1_i32 : i32 to index
    %c0_79 = arith.constant 0 : index
    %c0_80 = arith.constant 0 : index
    %142 = vector.load %arg8[%141, %c0_79, %c0_80] : memref<4x8x32xf32, #tpu.memory_space<vmem>>, vector<1x8x32xf32>
    %143 = vector.shape_cast %142 : vector<1x8x32xf32> to vector<8x32xf32>
    %144 = vector.shape_cast %140 : vector<8x32xf32> to vector<1x8x32xf32>
    tpu.vector_store %arg8[%141, %c0_79, %c0_80], %144 {strides = array<i32>} : memref<4x8x32xf32, #tpu.memory_space<vmem>>, vector<1x8x32xf32>,
    %c2_i32 = arith.constant 2 : i32
    %cst_81 = arith.constant dense<0.000000e+00> : vector<8x32xf32>
    %145 = tpu.matmul %133, %35, %cst_81 {dimension_numbers = #tpu.dot_dimension_numbers<[1], [0], [0], [1], [0, 0, 1, 1], [], []>} : vector<8x32xf32>, vector<32x32xf32>, vector<8x32xf32> -> vector<8x32xf32>
    %146 = vector.broadcast %41 : vector<1x32xf32> to vector<8x32xf32>
    %147 = arith.addf %145, %146 : vector<8x32xf32>
    %cst_82 = arith.constant dense<0.000000e+00> : vector<8x32xf32>
    %148 = tpu.matmul %133, %37, %cst_82 {dimension_numbers = #tpu.dot_dimension_numbers<[1], [0], [0], [1], [0, 0, 1, 1], [], []>} : vector<8x32xf32>, vector<32x32xf32>, vector<8x32xf32> -> vector<8x32xf32>
    %149 = vector.broadcast %43 : vector<1x32xf32> to vector<8x32xf32>
    %150 = arith.addf %148, %149 : vector<8x32xf32>
    %cst_83 = arith.constant dense<0.000000e+00> : vector<8x32xf32>
    %151 = tpu.matmul %133, %39, %cst_83 {dimension_numbers = #tpu.dot_dimension_numbers<[1], [0], [0], [1], [0, 0, 1, 1], [], []>} : vector<8x32xf32>, vector<32x32xf32>, vector<8x32xf32> -> vector<8x32xf32>
    %152 = vector.broadcast %45 : vector<1x32xf32> to vector<8x32xf32>
    %153 = arith.addf %151, %152 : vector<8x32xf32>
    %154 = arith.index_cast %c2_i32 : i32 to index
    %c0_84 = arith.constant 0 : index
    %c0_85 = arith.constant 0 : index
    %155 = vector.load %arg9[%154, %c0_84, %c0_85] : memref<4x8x32xf32, #tpu.memory_space<vmem>>, vector<1x8x32xf32>
    %156 = vector.shape_cast %155 : vector<1x8x32xf32> to vector<8x32xf32>
    %157 = arith.addf %156, %147 : vector<8x32xf32>
    %158 = arith.negf %157 : vector<8x32xf32>
    %159 = math.exp %158 : vector<8x32xf32>
    %cst_86 = arith.constant 1.000000e+00 : f32
    %160 = vector.broadcast %cst_86 : f32 to vector<8x32xf32>
    %161 = arith.addf %160, %159 : vector<8x32xf32>
    %162 = arith.divf %160, %161 : vector<8x32xf32>
    %163 = arith.index_cast %c2_i32 : i32 to index
    %c0_87 = arith.constant 0 : index
    %c0_88 = arith.constant 0 : index
    %164 = vector.load %arg10[%163, %c0_87, %c0_88] : memref<4x8x32xf32, #tpu.memory_space<vmem>>, vector<1x8x32xf32>
    %165 = vector.shape_cast %164 : vector<1x8x32xf32> to vector<8x32xf32>
    %166 = arith.addf %165, %150 : vector<8x32xf32>
    %167 = arith.negf %166 : vector<8x32xf32>
    %168 = math.exp %167 : vector<8x32xf32>
    %cst_89 = arith.constant 1.000000e+00 : f32
    %169 = vector.broadcast %cst_89 : f32 to vector<8x32xf32>
    %170 = arith.addf %169, %168 : vector<8x32xf32>
    %171 = arith.divf %169, %170 : vector<8x32xf32>
    %172 = arith.index_cast %c2_i32 : i32 to index
    %c0_90 = arith.constant 0 : index
    %c0_91 = arith.constant 0 : index
    %173 = vector.load %arg11[%172, %c0_90, %c0_91] : memref<4x8x32xf32, #tpu.memory_space<vmem>>, vector<1x8x32xf32>
    %174 = vector.shape_cast %173 : vector<1x8x32xf32> to vector<8x32xf32>
    %175 = arith.mulf %162, %153 : vector<8x32xf32>
    %176 = arith.addf %174, %175 : vector<8x32xf32>
    %177 = math.tanh %176 : vector<8x32xf32>
    %cst_92 = arith.constant 1.000000e+00 : f32
    %178 = vector.broadcast %cst_92 : f32 to vector<8x32xf32>
    %179 = arith.subf %178, %171 : vector<8x32xf32>
    %180 = arith.mulf %179, %177 : vector<8x32xf32>
    %181 = arith.mulf %171, %133 : vector<8x32xf32>
    %182 = arith.addf %180, %181 : vector<8x32xf32>
    %183 = arith.addi %33, %c2_i32 : i32
    %184 = vector.broadcast %183 : i32 to vector<8x1xi32>
    %185 = arith.cmpi slt, %184, %32 : vector<8x1xi32>
    %186 = arith.extui %185 : vector<8x1xi1> to vector<8x1xi32>
    %187 = arith.sitofp %186 : vector<8x1xi32> to vector<8x1xf32>
    %188 = vector.broadcast %187 : vector<8x1xf32> to vector<8x32xf32>
    %189 = arith.mulf %182, %188 : vector<8x32xf32>
    %190 = arith.index_cast %c2_i32 : i32 to index
    %c0_93 = arith.constant 0 : index
    %c0_94 = arith.constant 0 : index
    %191 = vector.load %arg8[%190, %c0_93, %c0_94] : memref<4x8x32xf32, #tpu.memory_space<vmem>>, vector<1x8x32xf32>
    %192 = vector.shape_cast %191 : vector<1x8x32xf32> to vector<8x32xf32>
    %193 = vector.shape_cast %189 : vector<8x32xf32> to vector<1x8x32xf32>
    tpu.vector_store %arg8[%190, %c0_93, %c0_94], %193 {strides = array<i32>} : memref<4x8x32xf32, #tpu.memory_space<vmem>>, vector<1x8x32xf32>,
    %c3_i32 = arith.constant 3 : i32
    %cst_95 = arith.constant dense<0.000000e+00> : vector<8x32xf32>
    %194 = tpu.matmul %182, %35, %cst_95 {dimension_numbers = #tpu.dot_dimension_numbers<[1], [0], [0], [1], [0, 0, 1, 1], [], []>} : vector<8x32xf32>, vector<32x32xf32>, vector<8x32xf32> -> vector<8x32xf32>
    %195 = vector.broadcast %41 : vector<1x32xf32> to vector<8x32xf32>
    %196 = arith.addf %194, %195 : vector<8x32xf32>
    %cst_96 = arith.constant dense<0.000000e+00> : vector<8x32xf32>
    %197 = tpu.matmul %182, %37, %cst_96 {dimension_numbers = #tpu.dot_dimension_numbers<[1], [0], [0], [1], [0, 0, 1, 1], [], []>} : vector<8x32xf32>, vector<32x32xf32>, vector<8x32xf32> -> vector<8x32xf32>
    %198 = vector.broadcast %43 : vector<1x32xf32> to vector<8x32xf32>
    %199 = arith.addf %197, %198 : vector<8x32xf32>
    %cst_97 = arith.constant dense<0.000000e+00> : vector<8x32xf32>
    %200 = tpu.matmul %182, %39, %cst_97 {dimension_numbers = #tpu.dot_dimension_numbers<[1], [0], [0], [1], [0, 0, 1, 1], [], []>} : vector<8x32xf32>, vector<32x32xf32>, vector<8x32xf32> -> vector<8x32xf32>
    %201 = vector.broadcast %45 : vector<1x32xf32> to vector<8x32xf32>
    %202 = arith.addf %200, %201 : vector<8x32xf32>
    %203 = arith.index_cast %c3_i32 : i32 to index
    %c0_98 = arith.constant 0 : index
    %c0_99 = arith.constant 0 : index
    %204 = vector.load %arg9[%203, %c0_98, %c0_99] : memref<4x8x32xf32, #tpu.memory_space<vmem>>, vector<1x8x32xf32>
    %205 = vector.shape_cast %204 : vector<1x8x32xf32> to vector<8x32xf32>
    %206 = arith.addf %205, %196 : vector<8x32xf32>
    %207 = arith.negf %206 : vector<8x32xf32>
    %208 = math.exp %207 : vector<8x32xf32>
    %cst_100 = arith.constant 1.000000e+00 : f32
    %209 = vector.broadcast %cst_100 : f32 to vector<8x32xf32>
    %210 = arith.addf %209, %208 : vector<8x32xf32>
    %211 = arith.divf %209, %210 : vector<8x32xf32>
    %212 = arith.index_cast %c3_i32 : i32 to index
    %c0_101 = arith.constant 0 : index
    %c0_102 = arith.constant 0 : index
    %213 = vector.load %arg10[%212, %c0_101, %c0_102] : memref<4x8x32xf32, #tpu.memory_space<vmem>>, vector<1x8x32xf32>
    %214 = vector.shape_cast %213 : vector<1x8x32xf32> to vector<8x32xf32>
    %215 = arith.addf %214, %199 : vector<8x32xf32>
    %216 = arith.negf %215 : vector<8x32xf32>
    %217 = math.exp %216 : vector<8x32xf32>
    %cst_103 = arith.constant 1.000000e+00 : f32
    %218 = vector.broadcast %cst_103 : f32 to vector<8x32xf32>
    %219 = arith.addf %218, %217 : vector<8x32xf32>
    %220 = arith.divf %218, %219 : vector<8x32xf32>
    %221 = arith.index_cast %c3_i32 : i32 to index
    %c0_104 = arith.constant 0 : index
    %c0_105 = arith.constant 0 : index
    %222 = vector.load %arg11[%221, %c0_104, %c0_105] : memref<4x8x32xf32, #tpu.memory_space<vmem>>, vector<1x8x32xf32>
    %223 = vector.shape_cast %222 : vector<1x8x32xf32> to vector<8x32xf32>
    %224 = arith.mulf %211, %202 : vector<8x32xf32>
    %225 = arith.addf %223, %224 : vector<8x32xf32>
    %226 = math.tanh %225 : vector<8x32xf32>
    %cst_106 = arith.constant 1.000000e+00 : f32
    %227 = vector.broadcast %cst_106 : f32 to vector<8x32xf32>
    %228 = arith.subf %227, %220 : vector<8x32xf32>
    %229 = arith.mulf %228, %226 : vector<8x32xf32>
    %230 = arith.mulf %220, %182 : vector<8x32xf32>
    %231 = arith.addf %229, %230 : vector<8x32xf32>
    %232 = arith.addi %33, %c3_i32 : i32
    %233 = vector.broadcast %232 : i32 to vector<8x1xi32>
    %234 = arith.cmpi slt, %233, %32 : vector<8x1xi32>
    %235 = arith.extui %234 : vector<8x1xi1> to vector<8x1xi32>
    %236 = arith.sitofp %235 : vector<8x1xi32> to vector<8x1xf32>
    %237 = vector.broadcast %236 : vector<8x1xf32> to vector<8x32xf32>
    %238 = arith.mulf %231, %237 : vector<8x32xf32>
    %239 = arith.index_cast %c3_i32 : i32 to index
    %c0_107 = arith.constant 0 : index
    %c0_108 = arith.constant 0 : index
    %240 = vector.load %arg8[%239, %c0_107, %c0_108] : memref<4x8x32xf32, #tpu.memory_space<vmem>>, vector<1x8x32xf32>
    %241 = vector.shape_cast %240 : vector<1x8x32xf32> to vector<8x32xf32>
    %242 = vector.shape_cast %238 : vector<8x32xf32> to vector<1x8x32xf32>
    tpu.vector_store %arg8[%239, %c0_107, %c0_108], %242 {strides = array<i32>} : memref<4x8x32xf32, #tpu.memory_space<vmem>>, vector<1x8x32xf32>,
    %c4_i32_109 = arith.constant 4 : i32
    %c0_110 = arith.constant 0 : index
    %c0_111 = arith.constant 0 : index
    %243 = vector.load %arg12[%c0_110, %c0_111] : memref<8x32xf32, #tpu.memory_space<vmem>>, vector<8x32xf32>
    tpu.vector_store %arg12[%c0_110, %c0_111], %231 {strides = array<i32>} : memref<8x32xf32, #tpu.memory_space<vmem>>, vector<8x32xf32>,
    return
  }
  func.func @transform_0(%arg0: i32, %arg1: i32) -> (i32, i32) {
    %c0_i32 = arith.constant 0 : i32
    %c0_i32_0 = arith.constant 0 : i32
    return %arg0, %c0_i32 : i32, i32
  }
  func.func @transform_1(%arg0: i32, %arg1: i32) -> (i32, i32, i32) {
    %c0_i32 = arith.constant 0 : i32
    %c0_i32_0 = arith.constant 0 : i32
    return %arg1, %arg0, %c0_i32 : i32, i32, i32
  }
  func.func @transform_2(%arg0: i32, %arg1: i32) -> (i32, i32, i32) {
    %c0_i32 = arith.constant 0 : i32
    %c0_i32_0 = arith.constant 0 : i32
    %c0_i32_1 = arith.constant 0 : i32
    %c0_i32_2 = arith.constant 0 : i32
    return %c0_i32, %c0_i32_0, %c0_i32_1 : i32, i32, i32
  }
  func.func @transform_3(%arg0: i32, %arg1: i32) -> (i32, i32, i32) {
    %c0_i32 = arith.constant 0 : i32
    %c0_i32_0 = arith.constant 0 : i32
    %c0_i32_1 = arith.constant 0 : i32
    %c0_i32_2 = arith.constant 0 : i32
    return %c0_i32, %c0_i32_0, %c0_i32_1 : i32, i32, i32
  }
  func.func @transform_4(%arg0: i32, %arg1: i32) -> (i32, i32, i32) {
    %c0_i32 = arith.constant 0 : i32
    %c0_i32_0 = arith.constant 0 : i32
    %c0_i32_1 = arith.constant 0 : i32
    %c0_i32_2 = arith.constant 0 : i32
    return %c0_i32, %c0_i32_0, %c0_i32_1 : i32, i32, i32
  }
  func.func @transform_5(%arg0: i32, %arg1: i32) -> (i32, i32, i32) {
    %c0_i32 = arith.constant 0 : i32
    %c0_i32_0 = arith.constant 0 : i32
    %c0_i32_1 = arith.constant 0 : i32
    %c0_i32_2 = arith.constant 0 : i32
    return %c0_i32, %c0_i32_0, %c0_i32_1 : i32, i32, i32
  }
  func.func @transform_6(%arg0: i32, %arg1: i32) -> (i32, i32, i32) {
    %c0_i32 = arith.constant 0 : i32
    %c0_i32_0 = arith.constant 0 : i32
    return %arg1, %arg0, %c0_i32 : i32, i32, i32
  }
}

module attributes {stable_mosaic.version = 11 : i64} {
  func.func @_gru_fused_kernel(%arg0: i32, %arg1: i32, %arg2: memref<8x1xi32, #tpu.memory_space<vmem>>, %arg3: memref<4x8x8xf32, #tpu.memory_space<vmem>>, %arg4: memref<3x8x32xf32, #tpu.memory_space<vmem>>, %arg5: memref<3x32x32xf32, #tpu.memory_space<vmem>>, %arg6: memref<3x1x32xf32, #tpu.memory_space<vmem>>, %arg7: memref<3x1x32xf32, #tpu.memory_space<vmem>>, %arg8: memref<4x8x32xf32, #tpu.memory_space<vmem>>, %arg9: memref<4x8x32xf32, #tpu.memory_space<vmem>>, %arg10: memref<4x8x32xf32, #tpu.memory_space<vmem>>, %arg11: memref<4x8x32xf32, #tpu.memory_space<vmem>>, %arg12: memref<8x32xf32, #tpu.memory_space<vmem>>) attributes {dimension_semantics = [#tpu.dimension_semantics<parallel>, #tpu.dimension_semantics<arbitrary>], iteration_bounds = array<i64: 1, 2>, scalar_prefetch = 0 : i64, scratch_operands = 4 : i64, tpu.core_type = #tpu.core_type<tc>, window_params = [{transform_indices = @transform_0, window_bounds = array<i64: 8, 1>}, {transform_indices = @transform_1, window_bounds = array<i64: 4, 8, 8>}, {pipeline_mode = #tpu.pipeline_mode<synchronous>, transform_indices = @transform_2, window_bounds = array<i64: 3, 8, 32>}, {pipeline_mode = #tpu.pipeline_mode<synchronous>, transform_indices = @transform_3, window_bounds = array<i64: 3, 32, 32>}, {pipeline_mode = #tpu.pipeline_mode<synchronous>, transform_indices = @transform_4, window_bounds = array<i64: 3, 1, 32>}, {pipeline_mode = #tpu.pipeline_mode<synchronous>, transform_indices = @transform_5, window_bounds = array<i64: 3, 1, 32>}, {transform_indices = @transform_6, window_bounds = array<i64: 4, 8, 32>}]} {
    %c0_i32 = arith.constant 0 : i32
    %0 = arith.cmpi eq, %arg1, %c0_i32 : i32
    %1 = arith.extui %0 : i1 to i32
    %c0_i32_0 = arith.constant 0 : i32
    %2 = arith.cmpi ne, %1, %c0_i32_0 : i32
    scf.if %2 {
      %cst_112 = arith.constant 0.000000e+00 : f32
      %244 = vector.broadcast %cst_112 : f32 to vector<8x32xf32>
      %c0_113 = arith.constant 0 : index
      %c0_114 = arith.constant 0 : index
      %245 = vector.load %arg12[%c0_113, %c0_114] : memref<8x32xf32, #tpu.memory_space<vmem>>, vector<8x32xf32>
      tpu.vector_store %arg12[%c0_113, %c0_114], %244 {strides = array<i32>} : memref<8x32xf32, #tpu.memory_space<vmem>>, vector<8x32xf32>,
    } else {
    }
    %c0 = arith.constant 0 : index
    %c0_1 = arith.constant 0 : index
    %c0_2 = arith.constant 0 : index
    %3 = vector.load %arg3[%c0, %c0_1, %c0_2] : memref<4x8x8xf32, #tpu.memory_space<vmem>>, vector<4x8x8xf32>
    %4 = vector.shape_cast %3 : vector<4x8x8xf32> to vector<32x8xf32>
    %c0_3 = arith.constant 0 : index
    %c0_4 = arith.constant 0 : index
    %c0_5 = arith.constant 0 : index
    %5 = vector.load %arg4[%c0_3, %c0_4, %c0_5] : memref<3x8x32xf32, #tpu.memory_space<vmem>>, vector<1x8x32xf32>
    %6 = vector.shape_cast %5 : vector<1x8x32xf32> to vector<8x32xf32>
    %cst = arith.constant dense<0.000000e+00> : vector<32x32xf32>
    %7 = tpu.matmul %4, %6, %cst {dimension_numbers = #tpu.dot_dimension_numbers<[1], [0], [0], [1], [0, 0, 1, 1], [], []>} : vector<32x8xf32>, vector<8x32xf32>, vector<32x32xf32> -> vector<32x32xf32>
    %c0_6 = arith.constant 0 : index
    %c0_7 = arith.constant 0 : index
    %c0_8 = arith.constant 0 : index
    %8 = vector.load %arg6[%c0_6, %c0_7, %c0_8] : memref<3x1x32xf32, #tpu.memory_space<vmem>>, vector<1x1x32xf32>
    %9 = vector.shape_cast %8 : vector<1x1x32xf32> to vector<1x32xf32>
    %10 = vector.broadcast %9 : vector<1x32xf32> to vector<32x32xf32>
    %11 = arith.addf %7, %10 : vector<32x32xf32>
    %12 = vector.shape_cast %11 : vector<32x32xf32> to vector<4x8x32xf32>
    %c0_9 = arith.constant 0 : index
    %c0_10 = arith.constant 0 : index
    %c0_11 = arith.constant 0 : index
    %13 = vector.load %arg9[%c0_9, %c0_10, %c0_11] : memref<4x8x32xf32, #tpu.memory_space<vmem>>, vector<4x8x32xf32>
    tpu.vector_store %arg9[%c0_9, %c0_10, %c0_11], %12 {strides = array<i32>} : memref<4x8x32xf32, #tpu.memory_space<vmem>>, vector<4x8x32xf32>,
    %c1 = arith.constant 1 : index
    %c0_12 = arith.constant 0 : index
    %c0_13 = arith.constant 0 : index
    %14 = vector.load %arg4[%c1, %c0_12, %c0_13] : memref<3x8x32xf32, #tpu.memory_space<vmem>>, vector<1x8x32xf32>
    %15 = vector.shape_cast %14 : vector<1x8x32xf32> to vector<8x32xf32>
    %cst_14 = arith.constant dense<0.000000e+00> : vector<32x32xf32>
    %16 = tpu.matmul %4, %15, %cst_14 {dimension_numbers = #tpu.dot_dimension_numbers<[1], [0], [0], [1], [0, 0, 1, 1], [], []>} : vector<32x8xf32>, vector<8x32xf32>, vector<32x32xf32> -> vector<32x32xf32>
    %c1_15 = arith.constant 1 : index
    %c0_16 = arith.constant 0 : index
    %c0_17 = arith.constant 0 : index
    %17 = vector.load %arg6[%c1_15, %c0_16, %c0_17] : memref<3x1x32xf32, #tpu.memory_space<vmem>>, vector<1x1x32xf32>
    %18 = vector.shape_cast %17 : vector<1x1x32xf32> to vector<1x32xf32>
    %19 = vector.broadcast %18 : vector<1x32xf32> to vector<32x32xf32>
    %20 = arith.addf %16, %19 : vector<32x32xf32>
    %21 = vector.shape_cast %20 : vector<32x32xf32> to vector<4x8x32xf32>
    %c0_18 = arith.constant 0 : index
    %c0_19 = arith.constant 0 : index
    %c0_20 = arith.constant 0 : index
    %22 = vector.load %arg10[%c0_18, %c0_19, %c0_20] : memref<4x8x32xf32, #tpu.memory_space<vmem>>, vector<4x8x32xf32>
    tpu.vector_store %arg10[%c0_18, %c0_19, %c0_20], %21 {strides = array<i32>} : memref<4x8x32xf32, #tpu.memory_space<vmem>>, vector<4x8x32xf32>,
    %c2 = arith.constant 2 : index
    %c0_21 = arith.constant 0 : index
    %c0_22 = arith.constant 0 : index
    %23 = vector.load %arg4[%c2, %c0_21, %c0_22] : memref<3x8x32xf32, #tpu.memory_space<vmem>>, vector<1x8x32xf32>
    %24 = vector.shape_cast %23 : vector<1x8x32xf32> to vector<8x32xf32>
    %cst_23 = arith.constant dense<0.000000e+00> : vector<32x32xf32>
    %25 = tpu.matmul %4, %24, %cst_23 {dimension_numbers = #tpu.dot_dimension_numbers<[1], [0], [0], [1], [0, 0, 1, 1], [], []>} : vector<32x8xf32>, vector<8x32xf32>, vector<32x32xf32> -> vector<32x32xf32>
    %c2_24 = arith.constant 2 : index
    %c0_25 = arith.constant 0 : index
    %c0_26 = arith.constant 0 : index
    %26 = vector.load %arg6[%c2_24, %c0_25, %c0_26] : memref<3x1x32xf32, #tpu.memory_space<vmem>>, vector<1x1x32xf32>
    %27 = vector.shape_cast %26 : vector<1x1x32xf32> to vector<1x32xf32>
    %28 = vector.broadcast %27 : vector<1x32xf32> to vector<32x32xf32>
    %29 = arith.addf %25, %28 : vector<32x32xf32>
    %30 = vector.shape_cast %29 : vector<32x32xf32> to vector<4x8x32xf32>
    %c0_27 = arith.constant 0 : index
    %c0_28 = arith.constant 0 : index
    %c0_29 = arith.constant 0 : index
    %31 = vector.load %arg11[%c0_27, %c0_28, %c0_29] : memref<4x8x32xf32, #tpu.memory_space<vmem>>, vector<4x8x32xf32>
    tpu.vector_store %arg11[%c0_27, %c0_28, %c0_29], %30 {strides = array<i32>} : memref<4x8x32xf32, #tpu.memory_space<vmem>>, vector<4x8x32xf32>,
    %c0_30 = arith.constant 0 : index
    %c0_31 = arith.constant 0 : index
    %32 = vector.load %arg2[%c0_30, %c0_31] : memref<8x1xi32, #tpu.memory_space<vmem>>, vector<8x1xi32>
    %c4_i32 = arith.constant 4 : i32
    %33 = arith.muli %arg1, %c4_i32 : i32
    %c0_32 = arith.constant 0 : index
    %c0_33 = arith.constant 0 : index
    %c0_34 = arith.constant 0 : index
    %34 = vector.load %arg5[%c0_32, %c0_33, %c0_34] : memref<3x32x32xf32, #tpu.memory_space<vmem>>, vector<1x32x32xf32>
    %35 = vector.shape_cast %34 : vector<1x32x32xf32> to vector<32x32xf32>
    %c1_35 = arith.constant 1 : index
    %c0_36 = arith.constant 0 : index
    %c0_37 = arith.constant 0 : index
    %36 = vector.load %arg5[%c1_35, %c0_36, %c0_37] : memref<3x32x32xf32, #tpu.memory_space<vmem>>, vector<1x32x32xf32>
    %37 = vector.shape_cast %36 : vector<1x32x32xf32> to vector<32x32xf32>
    %c2_38 = arith.constant 2 : index
    %c0_39 = arith.constant 0 : index
    %c0_40 = arith.constant 0 : index
    %38 = vector.load %arg5[%c2_38, %c0_39, %c0_40] : memref<3x32x32xf32, #tpu.memory_space<vmem>>, vector<1x32x32xf32>
    %39 = vector.shape_cast %38 : vector<1x32x32xf32> to vector<32x32xf32>
    %c0_41 = arith.constant 0 : index
    %c0_42 = arith.constant 0 : index
    %c0_43 = arith.constant 0 : index
    %40 = vector.load %arg7[%c0_41, %c0_42, %c0_43] : memref<3x1x32xf32, #tpu.memory_space<vmem>>, vector<1x1x32xf32>
    %41 = vector.shape_cast %40 : vector<1x1x32xf32> to vector<1x32xf32>
    %c1_44 = arith.constant 1 : index
    %c0_45 = arith.constant 0 : index
    %c0_46 = arith.constant 0 : index
    %42 = vector.load %arg7[%c1_44, %c0_45, %c0_46] : memref<3x1x32xf32, #tpu.memory_space<vmem>>, vector<1x1x32xf32>
    %43 = vector.shape_cast %42 : vector<1x1x32xf32> to vector<1x32xf32>
    %c2_47 = arith.constant 2 : index
    %c0_48 = arith.constant 0 : index
    %c0_49 = arith.constant 0 : index
    %44 = vector.load %arg7[%c2_47, %c0_48, %c0_49] : memref<3x1x32xf32, #tpu.memory_space<vmem>>, vector<1x1x32xf32>
    %45 = vector.shape_cast %44 : vector<1x1x32xf32> to vector<1x32xf32>
    %c0_50 = arith.constant 0 : index
    %c0_51 = arith.constant 0 : index
    %46 = vector.load %arg12[%c0_50, %c0_51] : memref<8x32xf32, #tpu.memory_space<vmem>>, vector<8x32xf32>
    %c0_i32_52 = arith.constant 0 : i32
    %cst_53 = arith.constant dense<0.000000e+00> : vector<8x32xf32>
    %47 = tpu.matmul %46, %35, %cst_53 {dimension_numbers = #tpu.dot_dimension_numbers<[1], [0], [0], [1], [0, 0, 1, 1], [], []>} : vector<8x32xf32>, vector<32x32xf32>, vector<8x32xf32> -> vector<8x32xf32>
    %48 = vector.broadcast %41 : vector<1x32xf32> to vector<8x32xf32>
    %49 = arith.addf %47, %48 : vector<8x32xf32>
    %cst_54 = arith.constant dense<0.000000e+00> : vector<8x32xf32>
    %50 = tpu.matmul %46, %37, %cst_54 {dimension_numbers = #tpu.dot_dimension_numbers<[1], [0], [0], [1], [0, 0, 1, 1], [], []>} : vector<8x32xf32>, vector<32x32xf32>, vector<8x32xf32> -> vector<8x32xf32>
    %51 = vector.broadcast %43 : vector<1x32xf32> to vector<8x32xf32>
    %52 = arith.addf %50, %51 : vector<8x32xf32>
    %cst_55 = arith.constant dense<0.000000e+00> : vector<8x32xf32>
    %53 = tpu.matmul %46, %39, %cst_55 {dimension_numbers = #tpu.dot_dimension_numbers<[1], [0], [0], [1], [0, 0, 1, 1], [], []>} : vector<8x32xf32>, vector<32x32xf32>, vector<8x32xf32> -> vector<8x32xf32>
    %54 = vector.broadcast %45 : vector<1x32xf32> to vector<8x32xf32>
    %55 = arith.addf %53, %54 : vector<8x32xf32>
    %56 = arith.index_cast %c0_i32_52 : i32 to index
    %c0_56 = arith.constant 0 : index
    %c0_57 = arith.constant 0 : index
    %57 = vector.load %arg9[%56, %c0_56, %c0_57] : memref<4x8x32xf32, #tpu.memory_space<vmem>>, vector<1x8x32xf32>
    %58 = vector.shape_cast %57 : vector<1x8x32xf32> to vector<8x32xf32>
    %59 = arith.addf %58, %49 : vector<8x32xf32>
    %60 = arith.negf %59 : vector<8x32xf32>
    %61 = math.exp %60 : vector<8x32xf32>
    %cst_58 = arith.constant 1.000000e+00 : f32
    %62 = vector.broadcast %cst_58 : f32 to vector<8x32xf32>
    %63 = arith.addf %62, %61 : vector<8x32xf32>
    %64 = arith.divf %62, %63 : vector<8x32xf32>
    %65 = arith.index_cast %c0_i32_52 : i32 to index
    %c0_59 = arith.constant 0 : index
    %c0_60 = arith.constant 0 : index
    %66 = vector.load %arg10[%65, %c0_59, %c0_60] : memref<4x8x32xf32, #tpu.memory_space<vmem>>, vector<1x8x32xf32>
    %67 = vector.shape_cast %66 : vector<1x8x32xf32> to vector<8x32xf32>
    %68 = arith.addf %67, %52 : vector<8x32xf32>
    %69 = arith.negf %68 : vector<8x32xf32>
    %70 = math.exp %69 : vector<8x32xf32>
    %cst_61 = arith.constant 1.000000e+00 : f32
    %71 = vector.broadcast %cst_61 : f32 to vector<8x32xf32>
    %72 = arith.addf %71, %70 : vector<8x32xf32>
    %73 = arith.divf %71, %72 : vector<8x32xf32>
    %74 = arith.index_cast %c0_i32_52 : i32 to index
    %c0_62 = arith.constant 0 : index
    %c0_63 = arith.constant 0 : index
    %75 = vector.load %arg11[%74, %c0_62, %c0_63] : memref<4x8x32xf32, #tpu.memory_space<vmem>>, vector<1x8x32xf32>
    %76 = vector.shape_cast %75 : vector<1x8x32xf32> to vector<8x32xf32>
    %77 = arith.mulf %64, %55 : vector<8x32xf32>
    %78 = arith.addf %76, %77 : vector<8x32xf32>
    %79 = math.tanh %78 : vector<8x32xf32>
    %cst_64 = arith.constant 1.000000e+00 : f32
    %80 = vector.broadcast %cst_64 : f32 to vector<8x32xf32>
    %81 = arith.subf %80, %73 : vector<8x32xf32>
    %82 = arith.mulf %81, %79 : vector<8x32xf32>
    %83 = arith.mulf %73, %46 : vector<8x32xf32>
    %84 = arith.addf %82, %83 : vector<8x32xf32>
    %85 = arith.addi %33, %c0_i32_52 : i32
    %86 = vector.broadcast %85 : i32 to vector<8x1xi32>
    %87 = arith.cmpi slt, %86, %32 : vector<8x1xi32>
    %88 = arith.extui %87 : vector<8x1xi1> to vector<8x1xi32>
    %89 = arith.sitofp %88 : vector<8x1xi32> to vector<8x1xf32>
    %90 = vector.broadcast %89 : vector<8x1xf32> to vector<8x32xf32>
    %91 = arith.mulf %84, %90 : vector<8x32xf32>
    %92 = arith.index_cast %c0_i32_52 : i32 to index
    %c0_65 = arith.constant 0 : index
    %c0_66 = arith.constant 0 : index
    %93 = vector.load %arg8[%92, %c0_65, %c0_66] : memref<4x8x32xf32, #tpu.memory_space<vmem>>, vector<1x8x32xf32>
    %94 = vector.shape_cast %93 : vector<1x8x32xf32> to vector<8x32xf32>
    %95 = vector.shape_cast %91 : vector<8x32xf32> to vector<1x8x32xf32>
    tpu.vector_store %arg8[%92, %c0_65, %c0_66], %95 {strides = array<i32>} : memref<4x8x32xf32, #tpu.memory_space<vmem>>, vector<1x8x32xf32>,
    %c1_i32 = arith.constant 1 : i32
    %cst_67 = arith.constant dense<0.000000e+00> : vector<8x32xf32>
    %96 = tpu.matmul %84, %35, %cst_67 {dimension_numbers = #tpu.dot_dimension_numbers<[1], [0], [0], [1], [0, 0, 1, 1], [], []>} : vector<8x32xf32>, vector<32x32xf32>, vector<8x32xf32> -> vector<8x32xf32>
    %97 = vector.broadcast %41 : vector<1x32xf32> to vector<8x32xf32>
    %98 = arith.addf %96, %97 : vector<8x32xf32>
    %cst_68 = arith.constant dense<0.000000e+00> : vector<8x32xf32>
    %99 = tpu.matmul %84, %37, %cst_68 {dimension_numbers = #tpu.dot_dimension_numbers<[1], [0], [0], [1], [0, 0, 1, 1], [], []>} : vector<8x32xf32>, vector<32x32xf32>, vector<8x32xf32> -> vector<8x32xf32>
    %100 = vector.broadcast %43 : vector<1x32xf32> to vector<8x32xf32>
    %101 = arith.addf %99, %100 : vector<8x32xf32>
    %cst_69 = arith.constant dense<0.000000e+00> : vector<8x32xf32>
    %102 = tpu.matmul %84, %39, %cst_69 {dimension_numbers = #tpu.dot_dimension_numbers<[1], [0], [0], [1], [0, 0, 1, 1], [], []>} : vector<8x32xf32>, vector<32x32xf32>, vector<8x32xf32> -> vector<8x32xf32>
    %103 = vector.broadcast %45 : vector<1x32xf32> to vector<8x32xf32>
    %104 = arith.addf %102, %103 : vector<8x32xf32>
    %105 = arith.index_cast %c1_i32 : i32 to index
    %c0_70 = arith.constant 0 : index
    %c0_71 = arith.constant 0 : index
    %106 = vector.load %arg9[%105, %c0_70, %c0_71] : memref<4x8x32xf32, #tpu.memory_space<vmem>>, vector<1x8x32xf32>
    %107 = vector.shape_cast %106 : vector<1x8x32xf32> to vector<8x32xf32>
    %108 = arith.addf %107, %98 : vector<8x32xf32>
    %109 = arith.negf %108 : vector<8x32xf32>
    %110 = math.exp %109 : vector<8x32xf32>
    %cst_72 = arith.constant 1.000000e+00 : f32
    %111 = vector.broadcast %cst_72 : f32 to vector<8x32xf32>
    %112 = arith.addf %111, %110 : vector<8x32xf32>
    %113 = arith.divf %111, %112 : vector<8x32xf32>
    %114 = arith.index_cast %c1_i32 : i32 to index
    %c0_73 = arith.constant 0 : index
    %c0_74 = arith.constant 0 : index
    %115 = vector.load %arg10[%114, %c0_73, %c0_74] : memref<4x8x32xf32, #tpu.memory_space<vmem>>, vector<1x8x32xf32>
    %116 = vector.shape_cast %115 : vector<1x8x32xf32> to vector<8x32xf32>
    %117 = arith.addf %116, %101 : vector<8x32xf32>
    %118 = arith.negf %117 : vector<8x32xf32>
    %119 = math.exp %118 : vector<8x32xf32>
    %cst_75 = arith.constant 1.000000e+00 : f32
    %120 = vector.broadcast %cst_75 : f32 to vector<8x32xf32>
    %121 = arith.addf %120, %119 : vector<8x32xf32>
    %122 = arith.divf %120, %121 : vector<8x32xf32>
    %123 = arith.index_cast %c1_i32 : i32 to index
    %c0_76 = arith.constant 0 : index
    %c0_77 = arith.constant 0 : index
    %124 = vector.load %arg11[%123, %c0_76, %c0_77] : memref<4x8x32xf32, #tpu.memory_space<vmem>>, vector<1x8x32xf32>
    %125 = vector.shape_cast %124 : vector<1x8x32xf32> to vector<8x32xf32>
    %126 = arith.mulf %113, %104 : vector<8x32xf32>
    %127 = arith.addf %125, %126 : vector<8x32xf32>
    %128 = math.tanh %127 : vector<8x32xf32>
    %cst_78 = arith.constant 1.000000e+00 : f32
    %129 = vector.broadcast %cst_78 : f32 to vector<8x32xf32>
    %130 = arith.subf %129, %122 : vector<8x32xf32>
    %131 = arith.mulf %130, %128 : vector<8x32xf32>
    %132 = arith.mulf %122, %84 : vector<8x32xf32>
    %133 = arith.addf %131, %132 : vector<8x32xf32>
    %134 = arith.addi %33, %c1_i32 : i32
    %135 = vector.broadcast %134 : i32 to vector<8x1xi32>
    %136 = arith.cmpi slt, %135, %32 : vector<8x1xi32>
    %137 = arith.extui %136 : vector<8x1xi1> to vector<8x1xi32>
    %138 = arith.sitofp %137 : vector<8x1xi32> to vector<8x1xf32>
    %139 = vector.broadcast %138 : vector<8x1xf32> to vector<8x32xf32>
    %140 = arith.mulf %133, %139 : vector<8x32xf32>
    %141 = arith.index_cast %c1_i32 : i32 to index
    %c0_79 = arith.constant 0 : index
    %c0_80 = arith.constant 0 : index
    %142 = vector.load %arg8[%141, %c0_79, %c0_80] : memref<4x8x32xf32, #tpu.memory_space<vmem>>, vector<1x8x32xf32>
    %143 = vector.shape_cast %142 : vector<1x8x32xf32> to vector<8x32xf32>
    %144 = vector.shape_cast %140 : vector<8x32xf32> to vector<1x8x32xf32>
    tpu.vector_store %arg8[%141, %c0_79, %c0_80], %144 {strides = array<i32>} : memref<4x8x32xf32, #tpu.memory_space<vmem>>, vector<1x8x32xf32>,
    %c2_i32 = arith.constant 2 : i32
    %cst_81 = arith.constant dense<0.000000e+00> : vector<8x32xf32>
    %145 = tpu.matmul %133, %35, %cst_81 {dimension_numbers = #tpu.dot_dimension_numbers<[1], [0], [0], [1], [0, 0, 1, 1], [], []>} : vector<8x32xf32>, vector<32x32xf32>, vector<8x32xf32> -> vector<8x32xf32>
    %146 = vector.broadcast %41 : vector<1x32xf32> to vector<8x32xf32>
    %147 = arith.addf %145, %146 : vector<8x32xf32>
    %cst_82 = arith.constant dense<0.000000e+00> : vector<8x32xf32>
    %148 = tpu.matmul %133, %37, %cst_82 {dimension_numbers = #tpu.dot_dimension_numbers<[1], [0], [0], [1], [0, 0, 1, 1], [], []>} : vector<8x32xf32>, vector<32x32xf32>, vector<8x32xf32> -> vector<8x32xf32>
    %149 = vector.broadcast %43 : vector<1x32xf32> to vector<8x32xf32>
    %150 = arith.addf %148, %149 : vector<8x32xf32>
    %cst_83 = arith.constant dense<0.000000e+00> : vector<8x32xf32>
    %151 = tpu.matmul %133, %39, %cst_83 {dimension_numbers = #tpu.dot_dimension_numbers<[1], [0], [0], [1], [0, 0, 1, 1], [], []>} : vector<8x32xf32>, vector<32x32xf32>, vector<8x32xf32> -> vector<8x32xf32>
    %152 = vector.broadcast %45 : vector<1x32xf32> to vector<8x32xf32>
    %153 = arith.addf %151, %152 : vector<8x32xf32>
    %154 = arith.index_cast %c2_i32 : i32 to index
    %c0_84 = arith.constant 0 : index
    %c0_85 = arith.constant 0 : index
    %155 = vector.load %arg9[%154, %c0_84, %c0_85] : memref<4x8x32xf32, #tpu.memory_space<vmem>>, vector<1x8x32xf32>
    %156 = vector.shape_cast %155 : vector<1x8x32xf32> to vector<8x32xf32>
    %157 = arith.addf %156, %147 : vector<8x32xf32>
    %158 = arith.negf %157 : vector<8x32xf32>
    %159 = math.exp %158 : vector<8x32xf32>
    %cst_86 = arith.constant 1.000000e+00 : f32
    %160 = vector.broadcast %cst_86 : f32 to vector<8x32xf32>
    %161 = arith.addf %160, %159 : vector<8x32xf32>
    %162 = arith.divf %160, %161 : vector<8x32xf32>
    %163 = arith.index_cast %c2_i32 : i32 to index
    %c0_87 = arith.constant 0 : index
    %c0_88 = arith.constant 0 : index
    %164 = vector.load %arg10[%163, %c0_87, %c0_88] : memref<4x8x32xf32, #tpu.memory_space<vmem>>, vector<1x8x32xf32>
    %165 = vector.shape_cast %164 : vector<1x8x32xf32> to vector<8x32xf32>
    %166 = arith.addf %165, %150 : vector<8x32xf32>
    %167 = arith.negf %166 : vector<8x32xf32>
    %168 = math.exp %167 : vector<8x32xf32>
    %cst_89 = arith.constant 1.000000e+00 : f32
    %169 = vector.broadcast %cst_89 : f32 to vector<8x32xf32>
    %170 = arith.addf %169, %168 : vector<8x32xf32>
    %171 = arith.divf %169, %170 : vector<8x32xf32>
    %172 = arith.index_cast %c2_i32 : i32 to index
    %c0_90 = arith.constant 0 : index
    %c0_91 = arith.constant 0 : index
    %173 = vector.load %arg11[%172, %c0_90, %c0_91] : memref<4x8x32xf32, #tpu.memory_space<vmem>>, vector<1x8x32xf32>
    %174 = vector.shape_cast %173 : vector<1x8x32xf32> to vector<8x32xf32>
    %175 = arith.mulf %162, %153 : vector<8x32xf32>
    %176 = arith.addf %174, %175 : vector<8x32xf32>
    %177 = math.tanh %176 : vector<8x32xf32>
    %cst_92 = arith.constant 1.000000e+00 : f32
    %178 = vector.broadcast %cst_92 : f32 to vector<8x32xf32>
    %179 = arith.subf %178, %171 : vector<8x32xf32>
    %180 = arith.mulf %179, %177 : vector<8x32xf32>
    %181 = arith.mulf %171, %133 : vector<8x32xf32>
    %182 = arith.addf %180, %181 : vector<8x32xf32>
    %183 = arith.addi %33, %c2_i32 : i32
    %184 = vector.broadcast %183 : i32 to vector<8x1xi32>
    %185 = arith.cmpi slt, %184, %32 : vector<8x1xi32>
    %186 = arith.extui %185 : vector<8x1xi1> to vector<8x1xi32>
    %187 = arith.sitofp %186 : vector<8x1xi32> to vector<8x1xf32>
    %188 = vector.broadcast %187 : vector<8x1xf32> to vector<8x32xf32>
    %189 = arith.mulf %182, %188 : vector<8x32xf32>
    %190 = arith.index_cast %c2_i32 : i32 to index
    %c0_93 = arith.constant 0 : index
    %c0_94 = arith.constant 0 : index
    %191 = vector.load %arg8[%190, %c0_93, %c0_94] : memref<4x8x32xf32, #tpu.memory_space<vmem>>, vector<1x8x32xf32>
    %192 = vector.shape_cast %191 : vector<1x8x32xf32> to vector<8x32xf32>
    %193 = vector.shape_cast %189 : vector<8x32xf32> to vector<1x8x32xf32>
    tpu.vector_store %arg8[%190, %c0_93, %c0_94], %193 {strides = array<i32>} : memref<4x8x32xf32, #tpu.memory_space<vmem>>, vector<1x8x32xf32>,
    %c3_i32 = arith.constant 3 : i32
    %cst_95 = arith.constant dense<0.000000e+00> : vector<8x32xf32>
    %194 = tpu.matmul %182, %35, %cst_95 {dimension_numbers = #tpu.dot_dimension_numbers<[1], [0], [0], [1], [0, 0, 1, 1], [], []>} : vector<8x32xf32>, vector<32x32xf32>, vector<8x32xf32> -> vector<8x32xf32>
    %195 = vector.broadcast %41 : vector<1x32xf32> to vector<8x32xf32>
    %196 = arith.addf %194, %195 : vector<8x32xf32>
    %cst_96 = arith.constant dense<0.000000e+00> : vector<8x32xf32>
    %197 = tpu.matmul %182, %37, %cst_96 {dimension_numbers = #tpu.dot_dimension_numbers<[1], [0], [0], [1], [0, 0, 1, 1], [], []>} : vector<8x32xf32>, vector<32x32xf32>, vector<8x32xf32> -> vector<8x32xf32>
    %198 = vector.broadcast %43 : vector<1x32xf32> to vector<8x32xf32>
    %199 = arith.addf %197, %198 : vector<8x32xf32>
    %cst_97 = arith.constant dense<0.000000e+00> : vector<8x32xf32>
    %200 = tpu.matmul %182, %39, %cst_97 {dimension_numbers = #tpu.dot_dimension_numbers<[1], [0], [0], [1], [0, 0, 1, 1], [], []>} : vector<8x32xf32>, vector<32x32xf32>, vector<8x32xf32> -> vector<8x32xf32>
    %201 = vector.broadcast %45 : vector<1x32xf32> to vector<8x32xf32>
    %202 = arith.addf %200, %201 : vector<8x32xf32>
    %203 = arith.index_cast %c3_i32 : i32 to index
    %c0_98 = arith.constant 0 : index
    %c0_99 = arith.constant 0 : index
    %204 = vector.load %arg9[%203, %c0_98, %c0_99] : memref<4x8x32xf32, #tpu.memory_space<vmem>>, vector<1x8x32xf32>
    %205 = vector.shape_cast %204 : vector<1x8x32xf32> to vector<8x32xf32>
    %206 = arith.addf %205, %196 : vector<8x32xf32>
    %207 = arith.negf %206 : vector<8x32xf32>
    %208 = math.exp %207 : vector<8x32xf32>
    %cst_100 = arith.constant 1.000000e+00 : f32
    %209 = vector.broadcast %cst_100 : f32 to vector<8x32xf32>
    %210 = arith.addf %209, %208 : vector<8x32xf32>
    %211 = arith.divf %209, %210 : vector<8x32xf32>
    %212 = arith.index_cast %c3_i32 : i32 to index
    %c0_101 = arith.constant 0 : index
    %c0_102 = arith.constant 0 : index
    %213 = vector.load %arg10[%212, %c0_101, %c0_102] : memref<4x8x32xf32, #tpu.memory_space<vmem>>, vector<1x8x32xf32>
    %214 = vector.shape_cast %213 : vector<1x8x32xf32> to vector<8x32xf32>
    %215 = arith.addf %214, %199 : vector<8x32xf32>
    %216 = arith.negf %215 : vector<8x32xf32>
    %217 = math.exp %216 : vector<8x32xf32>
    %cst_103 = arith.constant 1.000000e+00 : f32
    %218 = vector.broadcast %cst_103 : f32 to vector<8x32xf32>
    %219 = arith.addf %218, %217 : vector<8x32xf32>
    %220 = arith.divf %218, %219 : vector<8x32xf32>
    %221 = arith.index_cast %c3_i32 : i32 to index
    %c0_104 = arith.constant 0 : index
    %c0_105 = arith.constant 0 : index
    %222 = vector.load %arg11[%221, %c0_104, %c0_105] : memref<4x8x32xf32, #tpu.memory_space<vmem>>, vector<1x8x32xf32>
    %223 = vector.shape_cast %222 : vector<1x8x32xf32> to vector<8x32xf32>
    %224 = arith.mulf %211, %202 : vector<8x32xf32>
    %225 = arith.addf %223, %224 : vector<8x32xf32>
    %226 = math.tanh %225 : vector<8x32xf32>
    %cst_106 = arith.constant 1.000000e+00 : f32
    %227 = vector.broadcast %cst_106 : f32 to vector<8x32xf32>
    %228 = arith.subf %227, %220 : vector<8x32xf32>
    %229 = arith.mulf %228, %226 : vector<8x32xf32>
    %230 = arith.mulf %220, %182 : vector<8x32xf32>
    %231 = arith.addf %229, %230 : vector<8x32xf32>
    %232 = arith.addi %33, %c3_i32 : i32
    %233 = vector.broadcast %232 : i32 to vector<8x1xi32>
    %234 = arith.cmpi slt, %233, %32 : vector<8x1xi32>
    %235 = arith.extui %234 : vector<8x1xi1> to vector<8x1xi32>
    %236 = arith.sitofp %235 : vector<8x1xi32> to vector<8x1xf32>
    %237 = vector.broadcast %236 : vector<8x1xf32> to vector<8x32xf32>
    %238 = arith.mulf %231, %237 : vector<8x32xf32>
    %239 = arith.index_cast %c3_i32 : i32 to index
    %c0_107 = arith.constant 0 : index
    %c0_108 = arith.constant 0 : index
    %240 = vector.load %arg8[%239, %c0_107, %c0_108] : memref<4x8x32xf32, #tpu.memory_space<vmem>>, vector<1x8x32xf32>
    %241 = vector.shape_cast %240 : vector<1x8x32xf32> to vector<8x32xf32>
    %242 = vector.shape_cast %238 : vector<8x32xf32> to vector<1x8x32xf32>
    tpu.vector_store %arg8[%239, %c0_107, %c0_108], %242 {strides = array<i32>} : memref<4x8x32xf32, #tpu.memory_space<vmem>>, vector<1x8x32xf32>,
    %c4_i32_109 = arith.constant 4 : i32
    %c0_110 = arith.constant 0 : index
    %c0_111 = arith.constant 0 : index
    %243 = vector.load %arg12[%c0_110, %c0_111] : memref<8x32xf32, #tpu.memory_space<vmem>>, vector<8x32xf32>
    tpu.vector_store %arg12[%c0_110, %c0_111], %231 {strides = array<i32>} : memref<8x32xf32, #tpu.memory_space<vmem>>, vector<8x32xf32>,
    return
  }
  func.func @transform_0(%arg0: i32, %arg1: i32) -> (i32, i32) {
    %c0_i32 = arith.constant 0 : i32
    %c0_i32_0 = arith.constant 0 : i32
    return %arg0, %c0_i32 : i32, i32
  }
  func.func @transform_1(%arg0: i32, %arg1: i32) -> (i32, i32, i32) {
    %c0_i32 = arith.constant 0 : i32
    %c0_i32_0 = arith.constant 0 : i32
    return %arg1, %arg0, %c0_i32 : i32, i32, i32
  }
  func.func @transform_2(%arg0: i32, %arg1: i32) -> (i32, i32, i32) {
    %c0_i32 = arith.constant 0 : i32
    %c0_i32_0 = arith.constant 0 : i32
    %c0_i32_1 = arith.constant 0 : i32
    %c0_i32_2 = arith.constant 0 : i32
    return %c0_i32, %c0_i32_0, %c0_i32_1 : i32, i32, i32
  }
  func.func @transform_3(%arg0: i32, %arg1: i32) -> (i32, i32, i32) {
    %c0_i32 = arith.constant 0 : i32
    %c0_i32_0 = arith.constant 0 : i32
    %c0_i32_1 = arith.constant 0 : i32
    %c0_i32_2 = arith.constant 0 : i32
    return %c0_i32, %c0_i32_0, %c0_i32_1 : i32, i32, i32
  }
  func.func @transform_4(%arg0: i32, %arg1: i32) -> (i32, i32, i32) {
    %c0_i32 = arith.constant 0 : i32
    %c0_i32_0 = arith.constant 0 : i32
    %c0_i32_1 = arith.constant 0 : i32
    %c0_i32_2 = arith.constant 0 : i32
    return %c0_i32, %c0_i32_0, %c0_i32_1 : i32, i32, i32
  }
  func.func @transform_5(%arg0: i32, %arg1: i32) -> (i32, i32, i32) {
    %c0_i32 = arith.constant 0 : i32
    %c0_i32_0 = arith.constant 0 : i32
    %c0_i32_1 = arith.constant 0 : i32
    %c0_i32_2 = arith.constant 0 : i32
    return %c0_i32, %c0_i32_0, %c0_i32_1 : i32, i32, i32
  }
  func.func @transform_6(%arg0: i32, %arg1: i32) -> (i32, i32, i32) {
    %c0_i32 = arith.constant 0 : i32
    %c0_i32_0 = arith.constant 0 : i32
    return %arg1, %arg0, %c0_i32 : i32, i32, i32
  }
}

module attributes {stable_mosaic.version = 11 : i64} {
  func.func @_gru_fused_kernel(%arg0: i32, %arg1: i32, %arg2: memref<8x1xi32, #tpu.memory_space<vmem>>, %arg3: memref<4x8x32xf32, #tpu.memory_space<vmem>>, %arg4: memref<3x32x32xf32, #tpu.memory_space<vmem>>, %arg5: memref<3x32x32xf32, #tpu.memory_space<vmem>>, %arg6: memref<3x1x32xf32, #tpu.memory_space<vmem>>, %arg7: memref<3x1x32xf32, #tpu.memory_space<vmem>>, %arg8: memref<4x8x32xf32, #tpu.memory_space<vmem>>, %arg9: memref<4x8x32xf32, #tpu.memory_space<vmem>>, %arg10: memref<4x8x32xf32, #tpu.memory_space<vmem>>, %arg11: memref<4x8x32xf32, #tpu.memory_space<vmem>>, %arg12: memref<8x32xf32, #tpu.memory_space<vmem>>) attributes {dimension_semantics = [#tpu.dimension_semantics<parallel>, #tpu.dimension_semantics<arbitrary>], iteration_bounds = array<i64: 1, 2>, scalar_prefetch = 0 : i64, scratch_operands = 4 : i64, tpu.core_type = #tpu.core_type<tc>, window_params = [{transform_indices = @transform_0, window_bounds = array<i64: 8, 1>}, {transform_indices = @transform_1, window_bounds = array<i64: 4, 8, 32>}, {pipeline_mode = #tpu.pipeline_mode<synchronous>, transform_indices = @transform_2, window_bounds = array<i64: 3, 32, 32>}, {pipeline_mode = #tpu.pipeline_mode<synchronous>, transform_indices = @transform_3, window_bounds = array<i64: 3, 32, 32>}, {pipeline_mode = #tpu.pipeline_mode<synchronous>, transform_indices = @transform_4, window_bounds = array<i64: 3, 1, 32>}, {pipeline_mode = #tpu.pipeline_mode<synchronous>, transform_indices = @transform_5, window_bounds = array<i64: 3, 1, 32>}, {transform_indices = @transform_6, window_bounds = array<i64: 4, 8, 32>}]} {
    %c0_i32 = arith.constant 0 : i32
    %0 = arith.cmpi eq, %arg1, %c0_i32 : i32
    %1 = arith.extui %0 : i1 to i32
    %c0_i32_0 = arith.constant 0 : i32
    %2 = arith.cmpi ne, %1, %c0_i32_0 : i32
    scf.if %2 {
      %cst_112 = arith.constant 0.000000e+00 : f32
      %244 = vector.broadcast %cst_112 : f32 to vector<8x32xf32>
      %c0_113 = arith.constant 0 : index
      %c0_114 = arith.constant 0 : index
      %245 = vector.load %arg12[%c0_113, %c0_114] : memref<8x32xf32, #tpu.memory_space<vmem>>, vector<8x32xf32>
      tpu.vector_store %arg12[%c0_113, %c0_114], %244 {strides = array<i32>} : memref<8x32xf32, #tpu.memory_space<vmem>>, vector<8x32xf32>,
    } else {
    }
    %c0 = arith.constant 0 : index
    %c0_1 = arith.constant 0 : index
    %c0_2 = arith.constant 0 : index
    %3 = vector.load %arg3[%c0, %c0_1, %c0_2] : memref<4x8x32xf32, #tpu.memory_space<vmem>>, vector<4x8x32xf32>
    %4 = vector.shape_cast %3 : vector<4x8x32xf32> to vector<32x32xf32>
    %c0_3 = arith.constant 0 : index
    %c0_4 = arith.constant 0 : index
    %c0_5 = arith.constant 0 : index
    %5 = vector.load %arg4[%c0_3, %c0_4, %c0_5] : memref<3x32x32xf32, #tpu.memory_space<vmem>>, vector<1x32x32xf32>
    %6 = vector.shape_cast %5 : vector<1x32x32xf32> to vector<32x32xf32>
    %cst = arith.constant dense<0.000000e+00> : vector<32x32xf32>
    %7 = tpu.matmul %4, %6, %cst {dimension_numbers = #tpu.dot_dimension_numbers<[1], [0], [0], [1], [0, 0, 1, 1], [], []>} : vector<32x32xf32>, vector<32x32xf32>, vector<32x32xf32> -> vector<32x32xf32>
    %c0_6 = arith.constant 0 : index
    %c0_7 = arith.constant 0 : index
    %c0_8 = arith.constant 0 : index
    %8 = vector.load %arg6[%c0_6, %c0_7, %c0_8] : memref<3x1x32xf32, #tpu.memory_space<vmem>>, vector<1x1x32xf32>
    %9 = vector.shape_cast %8 : vector<1x1x32xf32> to vector<1x32xf32>
    %10 = vector.broadcast %9 : vector<1x32xf32> to vector<32x32xf32>
    %11 = arith.addf %7, %10 : vector<32x32xf32>
    %12 = vector.shape_cast %11 : vector<32x32xf32> to vector<4x8x32xf32>
    %c0_9 = arith.constant 0 : index
    %c0_10 = arith.constant 0 : index
    %c0_11 = arith.constant 0 : index
    %13 = vector.load %arg9[%c0_9, %c0_10, %c0_11] : memref<4x8x32xf32, #tpu.memory_space<vmem>>, vector<4x8x32xf32>
    tpu.vector_store %arg9[%c0_9, %c0_10, %c0_11], %12 {strides = array<i32>} : memref<4x8x32xf32, #tpu.memory_space<vmem>>, vector<4x8x32xf32>,
    %c1 = arith.constant 1 : index
    %c0_12 = arith.constant 0 : index
    %c0_13 = arith.constant 0 : index
    %14 = vector.load %arg4[%c1, %c0_12, %c0_13] : memref<3x32x32xf32, #tpu.memory_space<vmem>>, vector<1x32x32xf32>
    %15 = vector.shape_cast %14 : vector<1x32x32xf32> to vector<32x32xf32>
    %cst_14 = arith.constant dense<0.000000e+00> : vector<32x32xf32>
    %16 = tpu.matmul %4, %15, %cst_14 {dimension_numbers = #tpu.dot_dimension_numbers<[1], [0], [0], [1], [0, 0, 1, 1], [], []>} : vector<32x32xf32>, vector<32x32xf32>, vector<32x32xf32> -> vector<32x32xf32>
    %c1_15 = arith.constant 1 : index
    %c0_16 = arith.constant 0 : index
    %c0_17 = arith.constant 0 : index
    %17 = vector.load %arg6[%c1_15, %c0_16, %c0_17] : memref<3x1x32xf32, #tpu.memory_space<vmem>>, vector<1x1x32xf32>
    %18 = vector.shape_cast %17 : vector<1x1x32xf32> to vector<1x32xf32>
    %19 = vector.broadcast %18 : vector<1x32xf32> to vector<32x32xf32>
    %20 = arith.addf %16, %19 : vector<32x32xf32>
    %21 = vector.shape_cast %20 : vector<32x32xf32> to vector<4x8x32xf32>
    %c0_18 = arith.constant 0 : index
    %c0_19 = arith.constant 0 : index
    %c0_20 = arith.constant 0 : index
    %22 = vector.load %arg10[%c0_18, %c0_19, %c0_20] : memref<4x8x32xf32, #tpu.memory_space<vmem>>, vector<4x8x32xf32>
    tpu.vector_store %arg10[%c0_18, %c0_19, %c0_20], %21 {strides = array<i32>} : memref<4x8x32xf32, #tpu.memory_space<vmem>>, vector<4x8x32xf32>,
    %c2 = arith.constant 2 : index
    %c0_21 = arith.constant 0 : index
    %c0_22 = arith.constant 0 : index
    %23 = vector.load %arg4[%c2, %c0_21, %c0_22] : memref<3x32x32xf32, #tpu.memory_space<vmem>>, vector<1x32x32xf32>
    %24 = vector.shape_cast %23 : vector<1x32x32xf32> to vector<32x32xf32>
    %cst_23 = arith.constant dense<0.000000e+00> : vector<32x32xf32>
    %25 = tpu.matmul %4, %24, %cst_23 {dimension_numbers = #tpu.dot_dimension_numbers<[1], [0], [0], [1], [0, 0, 1, 1], [], []>} : vector<32x32xf32>, vector<32x32xf32>, vector<32x32xf32> -> vector<32x32xf32>
    %c2_24 = arith.constant 2 : index
    %c0_25 = arith.constant 0 : index
    %c0_26 = arith.constant 0 : index
    %26 = vector.load %arg6[%c2_24, %c0_25, %c0_26] : memref<3x1x32xf32, #tpu.memory_space<vmem>>, vector<1x1x32xf32>
    %27 = vector.shape_cast %26 : vector<1x1x32xf32> to vector<1x32xf32>
    %28 = vector.broadcast %27 : vector<1x32xf32> to vector<32x32xf32>
    %29 = arith.addf %25, %28 : vector<32x32xf32>
    %30 = vector.shape_cast %29 : vector<32x32xf32> to vector<4x8x32xf32>
    %c0_27 = arith.constant 0 : index
    %c0_28 = arith.constant 0 : index
    %c0_29 = arith.constant 0 : index
    %31 = vector.load %arg11[%c0_27, %c0_28, %c0_29] : memref<4x8x32xf32, #tpu.memory_space<vmem>>, vector<4x8x32xf32>
    tpu.vector_store %arg11[%c0_27, %c0_28, %c0_29], %30 {strides = array<i32>} : memref<4x8x32xf32, #tpu.memory_space<vmem>>, vector<4x8x32xf32>,
    %c0_30 = arith.constant 0 : index
    %c0_31 = arith.constant 0 : index
    %32 = vector.load %arg2[%c0_30, %c0_31] : memref<8x1xi32, #tpu.memory_space<vmem>>, vector<8x1xi32>
    %c4_i32 = arith.constant 4 : i32
    %33 = arith.muli %arg1, %c4_i32 : i32
    %c0_32 = arith.constant 0 : index
    %c0_33 = arith.constant 0 : index
    %c0_34 = arith.constant 0 : index
    %34 = vector.load %arg5[%c0_32, %c0_33, %c0_34] : memref<3x32x32xf32, #tpu.memory_space<vmem>>, vector<1x32x32xf32>
    %35 = vector.shape_cast %34 : vector<1x32x32xf32> to vector<32x32xf32>
    %c1_35 = arith.constant 1 : index
    %c0_36 = arith.constant 0 : index
    %c0_37 = arith.constant 0 : index
    %36 = vector.load %arg5[%c1_35, %c0_36, %c0_37] : memref<3x32x32xf32, #tpu.memory_space<vmem>>, vector<1x32x32xf32>
    %37 = vector.shape_cast %36 : vector<1x32x32xf32> to vector<32x32xf32>
    %c2_38 = arith.constant 2 : index
    %c0_39 = arith.constant 0 : index
    %c0_40 = arith.constant 0 : index
    %38 = vector.load %arg5[%c2_38, %c0_39, %c0_40] : memref<3x32x32xf32, #tpu.memory_space<vmem>>, vector<1x32x32xf32>
    %39 = vector.shape_cast %38 : vector<1x32x32xf32> to vector<32x32xf32>
    %c0_41 = arith.constant 0 : index
    %c0_42 = arith.constant 0 : index
    %c0_43 = arith.constant 0 : index
    %40 = vector.load %arg7[%c0_41, %c0_42, %c0_43] : memref<3x1x32xf32, #tpu.memory_space<vmem>>, vector<1x1x32xf32>
    %41 = vector.shape_cast %40 : vector<1x1x32xf32> to vector<1x32xf32>
    %c1_44 = arith.constant 1 : index
    %c0_45 = arith.constant 0 : index
    %c0_46 = arith.constant 0 : index
    %42 = vector.load %arg7[%c1_44, %c0_45, %c0_46] : memref<3x1x32xf32, #tpu.memory_space<vmem>>, vector<1x1x32xf32>
    %43 = vector.shape_cast %42 : vector<1x1x32xf32> to vector<1x32xf32>
    %c2_47 = arith.constant 2 : index
    %c0_48 = arith.constant 0 : index
    %c0_49 = arith.constant 0 : index
    %44 = vector.load %arg7[%c2_47, %c0_48, %c0_49] : memref<3x1x32xf32, #tpu.memory_space<vmem>>, vector<1x1x32xf32>
    %45 = vector.shape_cast %44 : vector<1x1x32xf32> to vector<1x32xf32>
    %c0_50 = arith.constant 0 : index
    %c0_51 = arith.constant 0 : index
    %46 = vector.load %arg12[%c0_50, %c0_51] : memref<8x32xf32, #tpu.memory_space<vmem>>, vector<8x32xf32>
    %c0_i32_52 = arith.constant 0 : i32
    %cst_53 = arith.constant dense<0.000000e+00> : vector<8x32xf32>
    %47 = tpu.matmul %46, %35, %cst_53 {dimension_numbers = #tpu.dot_dimension_numbers<[1], [0], [0], [1], [0, 0, 1, 1], [], []>} : vector<8x32xf32>, vector<32x32xf32>, vector<8x32xf32> -> vector<8x32xf32>
    %48 = vector.broadcast %41 : vector<1x32xf32> to vector<8x32xf32>
    %49 = arith.addf %47, %48 : vector<8x32xf32>
    %cst_54 = arith.constant dense<0.000000e+00> : vector<8x32xf32>
    %50 = tpu.matmul %46, %37, %cst_54 {dimension_numbers = #tpu.dot_dimension_numbers<[1], [0], [0], [1], [0, 0, 1, 1], [], []>} : vector<8x32xf32>, vector<32x32xf32>, vector<8x32xf32> -> vector<8x32xf32>
    %51 = vector.broadcast %43 : vector<1x32xf32> to vector<8x32xf32>
    %52 = arith.addf %50, %51 : vector<8x32xf32>
    %cst_55 = arith.constant dense<0.000000e+00> : vector<8x32xf32>
    %53 = tpu.matmul %46, %39, %cst_55 {dimension_numbers = #tpu.dot_dimension_numbers<[1], [0], [0], [1], [0, 0, 1, 1], [], []>} : vector<8x32xf32>, vector<32x32xf32>, vector<8x32xf32> -> vector<8x32xf32>
    %54 = vector.broadcast %45 : vector<1x32xf32> to vector<8x32xf32>
    %55 = arith.addf %53, %54 : vector<8x32xf32>
    %56 = arith.index_cast %c0_i32_52 : i32 to index
    %c0_56 = arith.constant 0 : index
    %c0_57 = arith.constant 0 : index
    %57 = vector.load %arg9[%56, %c0_56, %c0_57] : memref<4x8x32xf32, #tpu.memory_space<vmem>>, vector<1x8x32xf32>
    %58 = vector.shape_cast %57 : vector<1x8x32xf32> to vector<8x32xf32>
    %59 = arith.addf %58, %49 : vector<8x32xf32>
    %60 = arith.negf %59 : vector<8x32xf32>
    %61 = math.exp %60 : vector<8x32xf32>
    %cst_58 = arith.constant 1.000000e+00 : f32
    %62 = vector.broadcast %cst_58 : f32 to vector<8x32xf32>
    %63 = arith.addf %62, %61 : vector<8x32xf32>
    %64 = arith.divf %62, %63 : vector<8x32xf32>
    %65 = arith.index_cast %c0_i32_52 : i32 to index
    %c0_59 = arith.constant 0 : index
    %c0_60 = arith.constant 0 : index
    %66 = vector.load %arg10[%65, %c0_59, %c0_60] : memref<4x8x32xf32, #tpu.memory_space<vmem>>, vector<1x8x32xf32>
    %67 = vector.shape_cast %66 : vector<1x8x32xf32> to vector<8x32xf32>
    %68 = arith.addf %67, %52 : vector<8x32xf32>
    %69 = arith.negf %68 : vector<8x32xf32>
    %70 = math.exp %69 : vector<8x32xf32>
    %cst_61 = arith.constant 1.000000e+00 : f32
    %71 = vector.broadcast %cst_61 : f32 to vector<8x32xf32>
    %72 = arith.addf %71, %70 : vector<8x32xf32>
    %73 = arith.divf %71, %72 : vector<8x32xf32>
    %74 = arith.index_cast %c0_i32_52 : i32 to index
    %c0_62 = arith.constant 0 : index
    %c0_63 = arith.constant 0 : index
    %75 = vector.load %arg11[%74, %c0_62, %c0_63] : memref<4x8x32xf32, #tpu.memory_space<vmem>>, vector<1x8x32xf32>
    %76 = vector.shape_cast %75 : vector<1x8x32xf32> to vector<8x32xf32>
    %77 = arith.mulf %64, %55 : vector<8x32xf32>
    %78 = arith.addf %76, %77 : vector<8x32xf32>
    %79 = math.tanh %78 : vector<8x32xf32>
    %cst_64 = arith.constant 1.000000e+00 : f32
    %80 = vector.broadcast %cst_64 : f32 to vector<8x32xf32>
    %81 = arith.subf %80, %73 : vector<8x32xf32>
    %82 = arith.mulf %81, %79 : vector<8x32xf32>
    %83 = arith.mulf %73, %46 : vector<8x32xf32>
    %84 = arith.addf %82, %83 : vector<8x32xf32>
    %85 = arith.addi %33, %c0_i32_52 : i32
    %86 = vector.broadcast %85 : i32 to vector<8x1xi32>
    %87 = arith.cmpi slt, %86, %32 : vector<8x1xi32>
    %88 = arith.extui %87 : vector<8x1xi1> to vector<8x1xi32>
    %89 = arith.sitofp %88 : vector<8x1xi32> to vector<8x1xf32>
    %90 = vector.broadcast %89 : vector<8x1xf32> to vector<8x32xf32>
    %91 = arith.mulf %84, %90 : vector<8x32xf32>
    %92 = arith.index_cast %c0_i32_52 : i32 to index
    %c0_65 = arith.constant 0 : index
    %c0_66 = arith.constant 0 : index
    %93 = vector.load %arg8[%92, %c0_65, %c0_66] : memref<4x8x32xf32, #tpu.memory_space<vmem>>, vector<1x8x32xf32>
    %94 = vector.shape_cast %93 : vector<1x8x32xf32> to vector<8x32xf32>
    %95 = vector.shape_cast %91 : vector<8x32xf32> to vector<1x8x32xf32>
    tpu.vector_store %arg8[%92, %c0_65, %c0_66], %95 {strides = array<i32>} : memref<4x8x32xf32, #tpu.memory_space<vmem>>, vector<1x8x32xf32>,
    %c1_i32 = arith.constant 1 : i32
    %cst_67 = arith.constant dense<0.000000e+00> : vector<8x32xf32>
    %96 = tpu.matmul %84, %35, %cst_67 {dimension_numbers = #tpu.dot_dimension_numbers<[1], [0], [0], [1], [0, 0, 1, 1], [], []>} : vector<8x32xf32>, vector<32x32xf32>, vector<8x32xf32> -> vector<8x32xf32>
    %97 = vector.broadcast %41 : vector<1x32xf32> to vector<8x32xf32>
    %98 = arith.addf %96, %97 : vector<8x32xf32>
    %cst_68 = arith.constant dense<0.000000e+00> : vector<8x32xf32>
    %99 = tpu.matmul %84, %37, %cst_68 {dimension_numbers = #tpu.dot_dimension_numbers<[1], [0], [0], [1], [0, 0, 1, 1], [], []>} : vector<8x32xf32>, vector<32x32xf32>, vector<8x32xf32> -> vector<8x32xf32>
    %100 = vector.broadcast %43 : vector<1x32xf32> to vector<8x32xf32>
    %101 = arith.addf %99, %100 : vector<8x32xf32>
    %cst_69 = arith.constant dense<0.000000e+00> : vector<8x32xf32>
    %102 = tpu.matmul %84, %39, %cst_69 {dimension_numbers = #tpu.dot_dimension_numbers<[1], [0], [0], [1], [0, 0, 1, 1], [], []>} : vector<8x32xf32>, vector<32x32xf32>, vector<8x32xf32> -> vector<8x32xf32>
    %103 = vector.broadcast %45 : vector<1x32xf32> to vector<8x32xf32>
    %104 = arith.addf %102, %103 : vector<8x32xf32>
    %105 = arith.index_cast %c1_i32 : i32 to index
    %c0_70 = arith.constant 0 : index
    %c0_71 = arith.constant 0 : index
    %106 = vector.load %arg9[%105, %c0_70, %c0_71] : memref<4x8x32xf32, #tpu.memory_space<vmem>>, vector<1x8x32xf32>
    %107 = vector.shape_cast %106 : vector<1x8x32xf32> to vector<8x32xf32>
    %108 = arith.addf %107, %98 : vector<8x32xf32>
    %109 = arith.negf %108 : vector<8x32xf32>
    %110 = math.exp %109 : vector<8x32xf32>
    %cst_72 = arith.constant 1.000000e+00 : f32
    %111 = vector.broadcast %cst_72 : f32 to vector<8x32xf32>
    %112 = arith.addf %111, %110 : vector<8x32xf32>
    %113 = arith.divf %111, %112 : vector<8x32xf32>
    %114 = arith.index_cast %c1_i32 : i32 to index
    %c0_73 = arith.constant 0 : index
    %c0_74 = arith.constant 0 : index
    %115 = vector.load %arg10[%114, %c0_73, %c0_74] : memref<4x8x32xf32, #tpu.memory_space<vmem>>, vector<1x8x32xf32>
    %116 = vector.shape_cast %115 : vector<1x8x32xf32> to vector<8x32xf32>
    %117 = arith.addf %116, %101 : vector<8x32xf32>
    %118 = arith.negf %117 : vector<8x32xf32>
    %119 = math.exp %118 : vector<8x32xf32>
    %cst_75 = arith.constant 1.000000e+00 : f32
    %120 = vector.broadcast %cst_75 : f32 to vector<8x32xf32>
    %121 = arith.addf %120, %119 : vector<8x32xf32>
    %122 = arith.divf %120, %121 : vector<8x32xf32>
    %123 = arith.index_cast %c1_i32 : i32 to index
    %c0_76 = arith.constant 0 : index
    %c0_77 = arith.constant 0 : index
    %124 = vector.load %arg11[%123, %c0_76, %c0_77] : memref<4x8x32xf32, #tpu.memory_space<vmem>>, vector<1x8x32xf32>
    %125 = vector.shape_cast %124 : vector<1x8x32xf32> to vector<8x32xf32>
    %126 = arith.mulf %113, %104 : vector<8x32xf32>
    %127 = arith.addf %125, %126 : vector<8x32xf32>
    %128 = math.tanh %127 : vector<8x32xf32>
    %cst_78 = arith.constant 1.000000e+00 : f32
    %129 = vector.broadcast %cst_78 : f32 to vector<8x32xf32>
    %130 = arith.subf %129, %122 : vector<8x32xf32>
    %131 = arith.mulf %130, %128 : vector<8x32xf32>
    %132 = arith.mulf %122, %84 : vector<8x32xf32>
    %133 = arith.addf %131, %132 : vector<8x32xf32>
    %134 = arith.addi %33, %c1_i32 : i32
    %135 = vector.broadcast %134 : i32 to vector<8x1xi32>
    %136 = arith.cmpi slt, %135, %32 : vector<8x1xi32>
    %137 = arith.extui %136 : vector<8x1xi1> to vector<8x1xi32>
    %138 = arith.sitofp %137 : vector<8x1xi32> to vector<8x1xf32>
    %139 = vector.broadcast %138 : vector<8x1xf32> to vector<8x32xf32>
    %140 = arith.mulf %133, %139 : vector<8x32xf32>
    %141 = arith.index_cast %c1_i32 : i32 to index
    %c0_79 = arith.constant 0 : index
    %c0_80 = arith.constant 0 : index
    %142 = vector.load %arg8[%141, %c0_79, %c0_80] : memref<4x8x32xf32, #tpu.memory_space<vmem>>, vector<1x8x32xf32>
    %143 = vector.shape_cast %142 : vector<1x8x32xf32> to vector<8x32xf32>
    %144 = vector.shape_cast %140 : vector<8x32xf32> to vector<1x8x32xf32>
    tpu.vector_store %arg8[%141, %c0_79, %c0_80], %144 {strides = array<i32>} : memref<4x8x32xf32, #tpu.memory_space<vmem>>, vector<1x8x32xf32>,
    %c2_i32 = arith.constant 2 : i32
    %cst_81 = arith.constant dense<0.000000e+00> : vector<8x32xf32>
    %145 = tpu.matmul %133, %35, %cst_81 {dimension_numbers = #tpu.dot_dimension_numbers<[1], [0], [0], [1], [0, 0, 1, 1], [], []>} : vector<8x32xf32>, vector<32x32xf32>, vector<8x32xf32> -> vector<8x32xf32>
    %146 = vector.broadcast %41 : vector<1x32xf32> to vector<8x32xf32>
    %147 = arith.addf %145, %146 : vector<8x32xf32>
    %cst_82 = arith.constant dense<0.000000e+00> : vector<8x32xf32>
    %148 = tpu.matmul %133, %37, %cst_82 {dimension_numbers = #tpu.dot_dimension_numbers<[1], [0], [0], [1], [0, 0, 1, 1], [], []>} : vector<8x32xf32>, vector<32x32xf32>, vector<8x32xf32> -> vector<8x32xf32>
    %149 = vector.broadcast %43 : vector<1x32xf32> to vector<8x32xf32>
    %150 = arith.addf %148, %149 : vector<8x32xf32>
    %cst_83 = arith.constant dense<0.000000e+00> : vector<8x32xf32>
    %151 = tpu.matmul %133, %39, %cst_83 {dimension_numbers = #tpu.dot_dimension_numbers<[1], [0], [0], [1], [0, 0, 1, 1], [], []>} : vector<8x32xf32>, vector<32x32xf32>, vector<8x32xf32> -> vector<8x32xf32>
    %152 = vector.broadcast %45 : vector<1x32xf32> to vector<8x32xf32>
    %153 = arith.addf %151, %152 : vector<8x32xf32>
    %154 = arith.index_cast %c2_i32 : i32 to index
    %c0_84 = arith.constant 0 : index
    %c0_85 = arith.constant 0 : index
    %155 = vector.load %arg9[%154, %c0_84, %c0_85] : memref<4x8x32xf32, #tpu.memory_space<vmem>>, vector<1x8x32xf32>
    %156 = vector.shape_cast %155 : vector<1x8x32xf32> to vector<8x32xf32>
    %157 = arith.addf %156, %147 : vector<8x32xf32>
    %158 = arith.negf %157 : vector<8x32xf32>
    %159 = math.exp %158 : vector<8x32xf32>
    %cst_86 = arith.constant 1.000000e+00 : f32
    %160 = vector.broadcast %cst_86 : f32 to vector<8x32xf32>
    %161 = arith.addf %160, %159 : vector<8x32xf32>
    %162 = arith.divf %160, %161 : vector<8x32xf32>
    %163 = arith.index_cast %c2_i32 : i32 to index
    %c0_87 = arith.constant 0 : index
    %c0_88 = arith.constant 0 : index
    %164 = vector.load %arg10[%163, %c0_87, %c0_88] : memref<4x8x32xf32, #tpu.memory_space<vmem>>, vector<1x8x32xf32>
    %165 = vector.shape_cast %164 : vector<1x8x32xf32> to vector<8x32xf32>
    %166 = arith.addf %165, %150 : vector<8x32xf32>
    %167 = arith.negf %166 : vector<8x32xf32>
    %168 = math.exp %167 : vector<8x32xf32>
    %cst_89 = arith.constant 1.000000e+00 : f32
    %169 = vector.broadcast %cst_89 : f32 to vector<8x32xf32>
    %170 = arith.addf %169, %168 : vector<8x32xf32>
    %171 = arith.divf %169, %170 : vector<8x32xf32>
    %172 = arith.index_cast %c2_i32 : i32 to index
    %c0_90 = arith.constant 0 : index
    %c0_91 = arith.constant 0 : index
    %173 = vector.load %arg11[%172, %c0_90, %c0_91] : memref<4x8x32xf32, #tpu.memory_space<vmem>>, vector<1x8x32xf32>
    %174 = vector.shape_cast %173 : vector<1x8x32xf32> to vector<8x32xf32>
    %175 = arith.mulf %162, %153 : vector<8x32xf32>
    %176 = arith.addf %174, %175 : vector<8x32xf32>
    %177 = math.tanh %176 : vector<8x32xf32>
    %cst_92 = arith.constant 1.000000e+00 : f32
    %178 = vector.broadcast %cst_92 : f32 to vector<8x32xf32>
    %179 = arith.subf %178, %171 : vector<8x32xf32>
    %180 = arith.mulf %179, %177 : vector<8x32xf32>
    %181 = arith.mulf %171, %133 : vector<8x32xf32>
    %182 = arith.addf %180, %181 : vector<8x32xf32>
    %183 = arith.addi %33, %c2_i32 : i32
    %184 = vector.broadcast %183 : i32 to vector<8x1xi32>
    %185 = arith.cmpi slt, %184, %32 : vector<8x1xi32>
    %186 = arith.extui %185 : vector<8x1xi1> to vector<8x1xi32>
    %187 = arith.sitofp %186 : vector<8x1xi32> to vector<8x1xf32>
    %188 = vector.broadcast %187 : vector<8x1xf32> to vector<8x32xf32>
    %189 = arith.mulf %182, %188 : vector<8x32xf32>
    %190 = arith.index_cast %c2_i32 : i32 to index
    %c0_93 = arith.constant 0 : index
    %c0_94 = arith.constant 0 : index
    %191 = vector.load %arg8[%190, %c0_93, %c0_94] : memref<4x8x32xf32, #tpu.memory_space<vmem>>, vector<1x8x32xf32>
    %192 = vector.shape_cast %191 : vector<1x8x32xf32> to vector<8x32xf32>
    %193 = vector.shape_cast %189 : vector<8x32xf32> to vector<1x8x32xf32>
    tpu.vector_store %arg8[%190, %c0_93, %c0_94], %193 {strides = array<i32>} : memref<4x8x32xf32, #tpu.memory_space<vmem>>, vector<1x8x32xf32>,
    %c3_i32 = arith.constant 3 : i32
    %cst_95 = arith.constant dense<0.000000e+00> : vector<8x32xf32>
    %194 = tpu.matmul %182, %35, %cst_95 {dimension_numbers = #tpu.dot_dimension_numbers<[1], [0], [0], [1], [0, 0, 1, 1], [], []>} : vector<8x32xf32>, vector<32x32xf32>, vector<8x32xf32> -> vector<8x32xf32>
    %195 = vector.broadcast %41 : vector<1x32xf32> to vector<8x32xf32>
    %196 = arith.addf %194, %195 : vector<8x32xf32>
    %cst_96 = arith.constant dense<0.000000e+00> : vector<8x32xf32>
    %197 = tpu.matmul %182, %37, %cst_96 {dimension_numbers = #tpu.dot_dimension_numbers<[1], [0], [0], [1], [0, 0, 1, 1], [], []>} : vector<8x32xf32>, vector<32x32xf32>, vector<8x32xf32> -> vector<8x32xf32>
    %198 = vector.broadcast %43 : vector<1x32xf32> to vector<8x32xf32>
    %199 = arith.addf %197, %198 : vector<8x32xf32>
    %cst_97 = arith.constant dense<0.000000e+00> : vector<8x32xf32>
    %200 = tpu.matmul %182, %39, %cst_97 {dimension_numbers = #tpu.dot_dimension_numbers<[1], [0], [0], [1], [0, 0, 1, 1], [], []>} : vector<8x32xf32>, vector<32x32xf32>, vector<8x32xf32> -> vector<8x32xf32>
    %201 = vector.broadcast %45 : vector<1x32xf32> to vector<8x32xf32>
    %202 = arith.addf %200, %201 : vector<8x32xf32>
    %203 = arith.index_cast %c3_i32 : i32 to index
    %c0_98 = arith.constant 0 : index
    %c0_99 = arith.constant 0 : index
    %204 = vector.load %arg9[%203, %c0_98, %c0_99] : memref<4x8x32xf32, #tpu.memory_space<vmem>>, vector<1x8x32xf32>
    %205 = vector.shape_cast %204 : vector<1x8x32xf32> to vector<8x32xf32>
    %206 = arith.addf %205, %196 : vector<8x32xf32>
    %207 = arith.negf %206 : vector<8x32xf32>
    %208 = math.exp %207 : vector<8x32xf32>
    %cst_100 = arith.constant 1.000000e+00 : f32
    %209 = vector.broadcast %cst_100 : f32 to vector<8x32xf32>
    %210 = arith.addf %209, %208 : vector<8x32xf32>
    %211 = arith.divf %209, %210 : vector<8x32xf32>
    %212 = arith.index_cast %c3_i32 : i32 to index
    %c0_101 = arith.constant 0 : index
    %c0_102 = arith.constant 0 : index
    %213 = vector.load %arg10[%212, %c0_101, %c0_102] : memref<4x8x32xf32, #tpu.memory_space<vmem>>, vector<1x8x32xf32>
    %214 = vector.shape_cast %213 : vector<1x8x32xf32> to vector<8x32xf32>
    %215 = arith.addf %214, %199 : vector<8x32xf32>
    %216 = arith.negf %215 : vector<8x32xf32>
    %217 = math.exp %216 : vector<8x32xf32>
    %cst_103 = arith.constant 1.000000e+00 : f32
    %218 = vector.broadcast %cst_103 : f32 to vector<8x32xf32>
    %219 = arith.addf %218, %217 : vector<8x32xf32>
    %220 = arith.divf %218, %219 : vector<8x32xf32>
    %221 = arith.index_cast %c3_i32 : i32 to index
    %c0_104 = arith.constant 0 : index
    %c0_105 = arith.constant 0 : index
    %222 = vector.load %arg11[%221, %c0_104, %c0_105] : memref<4x8x32xf32, #tpu.memory_space<vmem>>, vector<1x8x32xf32>
    %223 = vector.shape_cast %222 : vector<1x8x32xf32> to vector<8x32xf32>
    %224 = arith.mulf %211, %202 : vector<8x32xf32>
    %225 = arith.addf %223, %224 : vector<8x32xf32>
    %226 = math.tanh %225 : vector<8x32xf32>
    %cst_106 = arith.constant 1.000000e+00 : f32
    %227 = vector.broadcast %cst_106 : f32 to vector<8x32xf32>
    %228 = arith.subf %227, %220 : vector<8x32xf32>
    %229 = arith.mulf %228, %226 : vector<8x32xf32>
    %230 = arith.mulf %220, %182 : vector<8x32xf32>
    %231 = arith.addf %229, %230 : vector<8x32xf32>
    %232 = arith.addi %33, %c3_i32 : i32
    %233 = vector.broadcast %232 : i32 to vector<8x1xi32>
    %234 = arith.cmpi slt, %233, %32 : vector<8x1xi32>
    %235 = arith.extui %234 : vector<8x1xi1> to vector<8x1xi32>
    %236 = arith.sitofp %235 : vector<8x1xi32> to vector<8x1xf32>
    %237 = vector.broadcast %236 : vector<8x1xf32> to vector<8x32xf32>
    %238 = arith.mulf %231, %237 : vector<8x32xf32>
    %239 = arith.index_cast %c3_i32 : i32 to index
    %c0_107 = arith.constant 0 : index
    %c0_108 = arith.constant 0 : index
    %240 = vector.load %arg8[%239, %c0_107, %c0_108] : memref<4x8x32xf32, #tpu.memory_space<vmem>>, vector<1x8x32xf32>
    %241 = vector.shape_cast %240 : vector<1x8x32xf32> to vector<8x32xf32>
    %242 = vector.shape_cast %238 : vector<8x32xf32> to vector<1x8x32xf32>
    tpu.vector_store %arg8[%239, %c0_107, %c0_108], %242 {strides = array<i32>} : memref<4x8x32xf32, #tpu.memory_space<vmem>>, vector<1x8x32xf32>,
    %c4_i32_109 = arith.constant 4 : i32
    %c0_110 = arith.constant 0 : index
    %c0_111 = arith.constant 0 : index
    %243 = vector.load %arg12[%c0_110, %c0_111] : memref<8x32xf32, #tpu.memory_space<vmem>>, vector<8x32xf32>
    tpu.vector_store %arg12[%c0_110, %c0_111], %231 {strides = array<i32>} : memref<8x32xf32, #tpu.memory_space<vmem>>, vector<8x32xf32>,
    return
  }
  func.func @transform_0(%arg0: i32, %arg1: i32) -> (i32, i32) {
    %c0_i32 = arith.constant 0 : i32
    %c0_i32_0 = arith.constant 0 : i32
    return %arg0, %c0_i32 : i32, i32
  }
  func.func @transform_1(%arg0: i32, %arg1: i32) -> (i32, i32, i32) {
    %c0_i32 = arith.constant 0 : i32
    %c0_i32_0 = arith.constant 0 : i32
    return %arg1, %arg0, %c0_i32 : i32, i32, i32
  }
  func.func @transform_2(%arg0: i32, %arg1: i32) -> (i32, i32, i32) {
    %c0_i32 = arith.constant 0 : i32
    %c0_i32_0 = arith.constant 0 : i32
    %c0_i32_1 = arith.constant 0 : i32
    %c0_i32_2 = arith.constant 0 : i32
    return %c0_i32, %c0_i32_0, %c0_i32_1 : i32, i32, i32
  }
  func.func @transform_3(%arg0: i32, %arg1: i32) -> (i32, i32, i32) {
    %c0_i32 = arith.constant 0 : i32
    %c0_i32_0 = arith.constant 0 : i32
    %c0_i32_1 = arith.constant 0 : i32
    %c0_i32_2 = arith.constant 0 : i32
    return %c0_i32, %c0_i32_0, %c0_i32_1 : i32, i32, i32
  }
  func.func @transform_4(%arg0: i32, %arg1: i32) -> (i32, i32, i32) {
    %c0_i32 = arith.constant 0 : i32
    %c0_i32_0 = arith.constant 0 : i32
    %c0_i32_1 = arith.constant 0 : i32
    %c0_i32_2 = arith.constant 0 : i32
    return %c0_i32, %c0_i32_0, %c0_i32_1 : i32, i32, i32
  }
  func.func @transform_5(%arg0: i32, %arg1: i32) -> (i32, i32, i32) {
    %c0_i32 = arith.constant 0 : i32
    %c0_i32_0 = arith.constant 0 : i32
    %c0_i32_1 = arith.constant 0 : i32
    %c0_i32_2 = arith.constant 0 : i32
    return %c0_i32, %c0_i32_0, %c0_i32_1 : i32, i32, i32
  }
  func.func @transform_6(%arg0: i32, %arg1: i32) -> (i32, i32, i32) {
    %c0_i32 = arith.constant 0 : i32
    %c0_i32_0 = arith.constant 0 : i32
    return %arg1, %arg0, %c0_i32 : i32, i32, i32
  }
}

module attributes {stable_mosaic.version = 11 : i64} {
  func.func @_linear_kernel(%arg0: i32, %arg1: i32, %arg2: memref<64x32xf32, #tpu.memory_space<vmem>>, %arg3: memref<32x16xf32, #tpu.memory_space<vmem>>, %arg4: memref<1x16xf32, #tpu.memory_space<vmem>>, %arg5: memref<64x16xf32, #tpu.memory_space<vmem>>) attributes {dimension_semantics = [#tpu.dimension_semantics<parallel>, #tpu.dimension_semantics<parallel>], iteration_bounds = array<i64: 1, 1>, scalar_prefetch = 0 : i64, scratch_operands = 0 : i64, tpu.core_type = #tpu.core_type<tc>, window_params = [{transform_indices = @transform_0, window_bounds = array<i64: 64, 32>}, {transform_indices = @transform_1, window_bounds = array<i64: 32, 16>}, {transform_indices = @transform_2, window_bounds = array<i64: 1, 16>}, {transform_indices = @transform_3, window_bounds = array<i64: 64, 16>}]} {
    %c0 = arith.constant 0 : index
    %c0_0 = arith.constant 0 : index
    %0 = vector.load %arg2[%c0, %c0_0] : memref<64x32xf32, #tpu.memory_space<vmem>>, vector<64x32xf32>
    %c0_1 = arith.constant 0 : index
    %c0_2 = arith.constant 0 : index
    %1 = vector.load %arg3[%c0_1, %c0_2] : memref<32x16xf32, #tpu.memory_space<vmem>>, vector<32x16xf32>
    %cst = arith.constant dense<0.000000e+00> : vector<64x16xf32>
    %2 = tpu.matmul %0, %1, %cst {dimension_numbers = #tpu.dot_dimension_numbers<[1], [0], [0], [1], [0, 0, 1, 1], [], []>} : vector<64x32xf32>, vector<32x16xf32>, vector<64x16xf32> -> vector<64x16xf32>
    %c0_3 = arith.constant 0 : index
    %c0_4 = arith.constant 0 : index
    %3 = vector.load %arg4[%c0_3, %c0_4] : memref<1x16xf32, #tpu.memory_space<vmem>>, vector<1x16xf32>
    %4 = vector.broadcast %3 : vector<1x16xf32> to vector<64x16xf32>
    %5 = arith.addf %2, %4 : vector<64x16xf32>
    %c0_5 = arith.constant 0 : index
    %c0_6 = arith.constant 0 : index
    %6 = vector.load %arg5[%c0_5, %c0_6] : memref<64x16xf32, #tpu.memory_space<vmem>>, vector<64x16xf32>
    tpu.vector_store %arg5[%c0_5, %c0_6], %5 {strides = array<i32>} : memref<64x16xf32, #tpu.memory_space<vmem>>, vector<64x16xf32>,
    return
  }
  func.func @transform_0(%arg0: i32, %arg1: i32) -> (i32, i32) {
    %c0_i32 = arith.constant 0 : i32
    %c0_i32_0 = arith.constant 0 : i32
    return %arg0, %c0_i32 : i32, i32
  }
  func.func @transform_1(%arg0: i32, %arg1: i32) -> (i32, i32) {
    %c0_i32 = arith.constant 0 : i32
    %c0_i32_0 = arith.constant 0 : i32
    return %c0_i32, %arg1 : i32, i32
  }
  func.func @transform_2(%arg0: i32, %arg1: i32) -> (i32, i32) {
    %c0_i32 = arith.constant 0 : i32
    %c0_i32_0 = arith.constant 0 : i32
    return %c0_i32, %arg1 : i32, i32
  }
  func.func @transform_3(%arg0: i32, %arg1: i32) -> (i32, i32) {
    %c0_i32 = arith.constant 0 : i32
    return %arg0, %arg1 : i32, i32
  }
}

</mosaic_0001>

<bundles_post_ra>
// kernel: nnet_vae_forward.8
= control target key start
LH: loop header
LB: loop body
LE: loop exit
PB: predicated region body
PF: predicated region fallthrough
CT: control target
= control target key end

     0   :  { %vm39_vm0 = vcmask 261120   ;;  %vm194_vm1 = vcmask 64512   ;;  %s528_s2 = inlined_call_operand.vmem [shape: f32[32,8], index: 2, kind: input, shape index: {}]   ;;  %s529_s1 = inlined_call_operand.vmem [shape: f32[32,8], index: 1, kind: input, shape index: {}]   ;;  %s530_s0 = inlined_call_operand.vmem [shape: f32[64,32], index: 0, kind: input, shape index: {}]   ;;  %s531_s4 = inlined_call_operand.vmem [shape: f32[1,8], index: 4, kind: input, shape index: {}]   ;;  %s532_s3 = inlined_call_operand.vmem [shape: f32[1,8], index: 3, kind: input, shape index: {}]   ;;  %s533_s6 = inlined_call_operand.vmem [shape: f32[3,64,8], index: 6, kind: output, shape index: {}]   ;;  %s534_s5 = inlined_call_operand.vmem [shape: f32[64,8], index: 5, kind: input, shape index: {}]  }
   0x1   :  { %v108_v0 = vld [vmem:[%s528_s2 + $0x18] sm:$0xff]  ;;  %v107_v1 = vld [vmem:[%s528_s2 + $0x10] sm:$0xff]  ;;  %v106_v3 = vld [vmem:[%s528_s2 + $0x8] sm:$0xff] }
   0x2   :  { %261 = vmatpush.msra.mxu3 %v108_v0  ;;  %125 = vmatpush.msra.mxu1 %v108_v0  ;;  %v34_v2 = vld [vmem:[%s529_s1 + $0x18] sm:$0xff]  ;;  %v33_v4 = vld [vmem:[%s529_s1 + $0x10] sm:$0xff]  ;;  %v32_v5 = vld [vmem:[%s529_s1 + $0x8] sm:$0xff] }
   0x3   :  { %257 = vmatpush.msra.mxu2 %v34_v2  ;;  %76 = vmatpush.msra.mxu0 %v34_v2  ;;  %v105_v6 = vld [vmem:[%s528_s2] sm:$0xff]  ;;  %v28_v10 = vld [vmem:[%s530_s0 + $0x28] sm:$0xff]  ;;  %v29_v12 = vld [vmem:[%s530_s0 + $0x30] sm:$0xff] }
   0x4   :  { %262 = vmatpush.msra.mxu3 %v107_v1  ;;  %126 = vmatpush.msra.mxu1 %v107_v1  ;;  %v27_v7 = vld [vmem:[%s530_s0 + $0x20] sm:$0xff]  ;;  %v24_v11 = vld [vmem:[%s530_s0 + $0x8] sm:$0xff]  ;;  %v25_v13 = vld [vmem:[%s530_s0 + $0x10] sm:$0xff] }
   0x5   :  { %258 = vmatpush.msra.mxu2 %v33_v4  ;;  %77 = vmatpush.msra.mxu0 %v33_v4  ;;  %v23_v8 = vld [vmem:[%s530_s0] sm:$0xff]  ;;  %v30_v14 = vld [vmem:[%s530_s0 + $0x38] sm:$0xff]  ;;  %v171_v45 = vld [vmem:[%s534_s5 + $0x8] sm:$0xff] }
   0x6   :  { %263 = vmatpush.msra.mxu3 %v106_v3  ;;  %127 = vmatpush.msra.mxu1 %v106_v3  ;;  %v31_v9 = vld [vmem:[%s529_s1] sm:$0xff]  ;;  %v26_v15 = vld [vmem:[%s530_s0 + $0x18] sm:$0xff]  ;;  %v175_v57 = vld [vmem:[%s534_s5 + $0x28] sm:$0xff] }
   0x7   :  { %259 = vmatpush.msra.mxu2 %v32_v5  ;;  %78 = vmatpush.msra.mxu0 %v32_v5  ;;  %v385_v16 = vld [vmem:[%s531_s4] ss:$0 sm:$0xff]  ;;  %v172_v63 = vld [vmem:[%s534_s5 + $0x10] sm:$0xff] }
   0x8   :  { %264 = vmatpush.msra.mxu3 %v105_v6  ;;  %128 = vmatpush.msra.mxu1 %v105_v6  ;;  %v390_v17 = vld [vmem:[%s532_s3] ss:$0 sm:$0xff] }
   0x9   :  { %237 = vmatmul.msk.f32.vlgmr.msra.gmra.mxu3 %vm39_vm0, %v27_v7  ;;  %233 = vmatmul.msk.f32.vlgmr.msra.gmra.mxu1 %vm39_vm0, %v23_v8  ;;  %v170_v29 = vld [vmem:[%s534_s5] sm:$0xff] }
   0xa   :  { %260 = vmatpush.msra.mxu2 %v31_v9  ;;  %79 = vmatpush.msra.mxu0 %v31_v9  ;;  %v174_v39 = vld [vmem:[%s534_s5 + $0x20] sm:$0xff] }
   0xb   :  { %229 = vmatmul.msk.f32.vlgmr.msra.gmra.mxu2 %vm39_vm0, %v27_v7  ;;  %225 = vmatmul.msk.f32.vlgmr.msra.gmra.mxu0 %vm39_vm0, %v23_v8 }
  0x11   :  { %238 = vmatmul.msk.f32.gmra.mxu3 %vm39_vm0, %v28_v10  ;;  %234 = vmatmul.msk.f32.gmra.mxu1 %vm39_vm0, %v24_v11 }
  0x13   :  { %230 = vmatmul.msk.f32.gmra.mxu2 %vm39_vm0, %v28_v10  ;;  %226 = vmatmul.msk.f32.gmra.mxu0 %vm39_vm0, %v24_v11  ;;  %v176_v11 = vld [vmem:[%s534_s5 + $0x30] sm:$0xff] }
  0x19   :  { %239 = vmatmul.msk.f32.gmra.mxu3 %vm39_vm0, %v29_v12  ;;  %235 = vmatmul.msk.f32.gmra.mxu1 %vm39_vm0, %v25_v13 }
  0x1b   :  { %231 = vmatmul.msk.f32.gmra.mxu2 %vm39_vm0, %v29_v12  ;;  %227 = vmatmul.msk.f32.gmra.mxu0 %vm39_vm0, %v25_v13 }
  0x21   :  { %240 = vmatmul.msk.f32.gmra.mxu3 %vm39_vm0, %v30_v14  ;;  %236 = vmatmul.msk.f32.gmra.mxu1 %vm39_vm0, %v26_v15 }
  0x23   :  { %232 = vmatmul.msk.f32.gmra.mxu2 %vm39_vm0, %v30_v14  ;;  %228 = vmatmul.msk.f32.gmra.mxu0 %vm39_vm0, %v26_v15  ;;  %v173_v15 = vld [vmem:[%s534_s5 + $0x18] sm:$0xff] }
  0x86   :  { %v130_v18 = vpop.f32.mrf.mxu1 }
  0x87   :  { %v131_v19 = vadd.f32 %v385_v16, %v130_v18 }
  0x88   :  { %v81_v20 = vpop.f32.mrf.mxu0 }
  0x89   :  { %v154_v21 = vmul.f32 1.442695, %v131_v19  ;;  %241 = vst.msk [vmem:[%s533_s6 + $0x40] sm:$0xff] %vm194_vm1, %v131_v19  ;;  %v82_v22 = vadd.f32 %v390_v17, %v81_v20 }
  0x8b   :  { %267 = vpow2.f32 %v154_v21  ;;  %195 = vst.msk [vmem:[%s533_s6] sm:$0xff] %vm194_vm1, %v82_v22 }
  0x8c   :  { %v142_v23 = vpop.f32.mrf.mxu3 }
  0x8d   :  { %v143_v24 = vadd.f32 %v385_v16, %v142_v23 }
  0x8e   :  { %v133_v25 = vpop.f32.mrf.mxu1  ;;  %v93_v26 = vpop.f32.mrf.mxu2 }
  0x8f   :  { %v162_v27 = vmul.f32 1.442695, %v143_v24  ;;  %245 = vst.msk [vmem:[%s533_s6 + $0x60] sm:$0xff] %vm194_vm1, %v143_v24  ;;  %v134_v28 = vadd.f32 %v385_v16, %v133_v25  ;;  %v94_v30 = vadd.f32 %v390_v17, %v93_v26 }
  0x90   :  { %v84_v31 = vpop.f32.mrf.mxu0 }
  0x91   :  { %v268_v32 = vpop.eup %267  ;;  %269 = vpow2.f32 %v162_v27  ;;  %v156_v33 = vmul.f32 1.442695, %v134_v28  ;;  %242 = vst.msk [vmem:[%s533_s6 + $0x48] sm:$0xff] %vm194_vm1, %v134_v28  ;;  %v85_v34 = vadd.f32 %v390_v17, %v84_v31 }
  0x92   :  { %v178_v35 = vmul.f32 %v268_v32, %v170_v29  ;;  %199 = vst.msk [vmem:[%s533_s6 + $0x20] sm:$0xff] %vm194_vm1, %v94_v30 }
  0x93   :  { %271 = vpow2.f32 %v156_v33  ;;  %196 = vst.msk [vmem:[%s533_s6 + $0x8] sm:$0xff] %vm194_vm1, %v85_v34 }
  0x94   :  { %v145_v36 = vpop.f32.mrf.mxu3  ;;  %v186_v37 = vadd.f32 %v178_v35, %v82_v22 }
  0x95   :  { %v146_v38 = vadd.f32 %v385_v16, %v145_v36 }
  0x96   :  { %249 = vst.msk [vmem:[%s533_s6 + $0x80] sm:$0xff] %vm194_vm1, %v186_v37  ;;  %v136_v40 = vpop.f32.mrf.mxu1  ;;  %v96_v41 = vpop.f32.mrf.mxu2 }
  0x97   :  { %v270_v42 = vpop.eup %269  ;;  %v164_v43 = vmul.f32 1.442695, %v146_v38  ;;  %246 = vst.msk [vmem:[%s533_s6 + $0x68] sm:$0xff] %vm194_vm1, %v146_v38  ;;  %v137_v44 = vadd.f32 %v385_v16, %v136_v40  ;;  %v97_v46 = vadd.f32 %v390_v17, %v96_v41 }
  0x98   :  { %v182_v47 = vmul.f32 %v270_v42, %v174_v39  ;;  %v87_v48 = vpop.f32.mrf.mxu0 }
  0x99   :  { %v272_v49 = vpop.eup %271  ;;  %273 = vpow2.f32 %v164_v43  ;;  %v158_v50 = vmul.f32 1.442695, %v137_v44  ;;  %243 = vst.msk [vmem:[%s533_s6 + $0x50] sm:$0xff] %vm194_vm1, %v137_v44  ;;  %v88_v51 = vadd.f32 %v390_v17, %v87_v48 }
  0x9a   :  { %v190_v52 = vadd.f32 %v182_v47, %v94_v30  ;;  %v179_v53 = vmul.f32 %v272_v49, %v171_v45  ;;  %200 = vst.msk [vmem:[%s533_s6 + $0x28] sm:$0xff] %vm194_vm1, %v97_v46 }
  0x9b   :  { %275 = vpow2.f32 %v158_v50  ;;  %197 = vst.msk [vmem:[%s533_s6 + $0x10] sm:$0xff] %vm194_vm1, %v88_v51 }
  0x9c   :  { %253 = vst.msk [vmem:[%s533_s6 + $0xa0] sm:$0xff] %vm194_vm1, %v190_v52  ;;  %v148_v54 = vpop.f32.mrf.mxu3  ;;  %v187_v55 = vadd.f32 %v179_v53, %v85_v34 }
  0x9d   :  { %v149_v56 = vadd.f32 %v385_v16, %v148_v54 }
  0x9e   :  { %250 = vst.msk [vmem:[%s533_s6 + $0x88] sm:$0xff] %vm194_vm1, %v187_v55  ;;  %v139_v58 = vpop.f32.mrf.mxu1  ;;  %v99_v59 = vpop.f32.mrf.mxu2 }
  0x9f   :  { %v274_v60 = vpop.eup %273  ;;  %v166_v61 = vmul.f32 1.442695, %v149_v56  ;;  %247 = vst.msk [vmem:[%s533_s6 + $0x70] sm:$0xff] %vm194_vm1, %v149_v56  ;;  %v140_v62 = vadd.f32 %v385_v16, %v139_v58  ;;  %v100_v0 = vadd.f32 %v390_v17, %v99_v59 }
  0xa0   :  { %v183_v1 = vmul.f32 %v274_v60, %v175_v57  ;;  %v90_v2 = vpop.f32.mrf.mxu0 }
  0xa1   :  { %v276_v3 = vpop.eup %275  ;;  %277 = vpow2.f32 %v166_v61  ;;  %v160_v4 = vmul.f32 1.442695, %v140_v62  ;;  %244 = vst.msk [vmem:[%s533_s6 + $0x58] sm:$0xff] %vm194_vm1, %v140_v62  ;;  %v91_v5 = vadd.f32 %v390_v17, %v90_v2 }
  0xa2   :  { %v191_v6 = vadd.f32 %v183_v1, %v97_v46  ;;  %v180_v7 = vmul.f32 %v276_v3, %v172_v63  ;;  %201 = vst.msk [vmem:[%s533_s6 + $0x30] sm:$0xff] %vm194_vm1, %v100_v0 }
  0xa3   :  { %279 = vpow2.f32 %v160_v4  ;;  %198 = vst.msk [vmem:[%s533_s6 + $0x18] sm:$0xff] %vm194_vm1, %v91_v5 }
  0xa4   :  { %254 = vst.msk [vmem:[%s533_s6 + $0xa8] sm:$0xff] %vm194_vm1, %v191_v6  ;;  %v151_v8 = vpop.f32.mrf.mxu3  ;;  %v188_v9 = vadd.f32 %v180_v7, %v88_v51 }
  0xa5   :  { %v152_v10 = vadd.f32 %v385_v16, %v151_v8 }
  0xa6   :  { %251 = vst.msk [vmem:[%s533_s6 + $0x90] sm:$0xff] %vm194_vm1, %v188_v9  ;;  %v102_v12 = vpop.f32.mrf.mxu2 }
  0xa7   :  { %v278_v13 = vpop.eup %277  ;;  %v168_v14 = vmul.f32 1.442695, %v152_v10  ;;  %248 = vst.msk [vmem:[%s533_s6 + $0x78] sm:$0xff] %vm194_vm1, %v152_v10  ;;  %v103_v16 = vadd.f32 %v390_v17, %v102_v12  ;;  %v177_v17 = vld [vmem:[%s534_s5 + $0x38] sm:$0xff] }
  0xa8   :  { %v184_v18 = vmul.f32 %v278_v13, %v176_v11 }
  0xa9   :  { %v280_v19 = vpop.eup %279  ;;  %281 = vpow2.f32 %v168_v14  ;;  %202 = vst.msk [vmem:[%s533_s6 + $0x38] sm:$0xff] %vm194_vm1, %v103_v16 }
  0xaa   :  { %v192_v20 = vadd.f32 %v184_v18, %v100_v0  ;;  %v181_v21 = vmul.f32 %v280_v19, %v173_v15 }
  0xac   :  { %255 = vst.msk [vmem:[%s533_s6 + $0xb0] sm:$0xff] %vm194_vm1, %v192_v20  ;;  %v189_v22 = vadd.f32 %v181_v21, %v91_v5 }
  0xae   :  { %252 = vst.msk [vmem:[%s533_s6 + $0x98] sm:$0xff] %vm194_vm1, %v189_v22 }
  0xaf   :  { %v282_v23 = vpop.eup %281 }
  0xb0   :  { %v185_v24 = vmul.f32 %v282_v23, %v177_v17 }
  0xb2   :  { %v193_v25 = vadd.f32 %v185_v24, %v103_v16 }
  0xb4   :  { %256 = vst.msk [vmem:[%s533_s6 + $0xb8] sm:$0xff] %vm194_vm1, %v193_v25 }

// kernel: nnet_vae_forward.6
= control target key start
LH: loop header
LB: loop body
LE: loop exit
PB: predicated region body
PF: predicated region fallthrough
CT: control target
= control target key end

     0   :  { %s1299_s21 = smov 0   ;;  %s1301_s22 = smov 0   ;;  %s1590_s0 = inlined_call_operand.vmem [shape: s32[8,1], index: 0, kind: input, shape index: {}]   ;;  %s1591_s1 = inlined_call_operand.vmem [shape: f32[8,8,16], index: 1, kind: input, shape index: {}]   ;;  %s1592_s2 = inlined_call_operand.vmem [shape: f32[3,16,32], index: 2, kind: input, shape index: {}]   ;;  %s1593_s3 = inlined_call_operand.vmem [shape: f32[3,32,32], index: 3, kind: input, shape index: {}]   ;;  %s1594_s4 = inlined_call_operand.vmem [shape: f32[3,1,32], index: 4, kind: input, shape index: {}]   ;;  %s1595_s5 = inlined_call_operand.vmem [shape: f32[3,1,32], index: 5, kind: input, shape index: {}]   ;;  %s1596_s6 = inlined_call_operand.vmem [shape: f32[8,8,32], index: 6, kind: output, shape index: {}]  }
   0x1   :  { %s1303_s23 = smov 0  }
   0x2 LB: > { %s25_s24 = sadd.s32 1, %s1255_s22  ;;  %p1089_p0 = scmp.ge.s32.totalorder %s1259_s23, 1  ;;  %s1259_s23 = sphi %s1303_s23, %s16_s23   ;;  %s1255_s22 = sphi %s1301_s22, %s1598_s22   ;;  %s1251_s21 = sphi %s1299_s21, %s1597_s21  }
   0x3   : > { %p26_p1 = scmp.ge.s32.totalorder %s25_s24, 2  ;;  %p241_p2 = scmp.lt.s32.totalorder %s1259_s23, 3 }
   0x5   : > { %s1600_s24 = smov (%p26_p1, %s25_s24), 0  ;;  %p242_p3 = pnand %p1089_p0, %p241_p2 }
   0x6   : > { %s1317_s25 = sshll.u32 (!%p242_p3), %s1251_s21, 2  ;;  %p1094_p5 = scmp.ne.s32.totalorder (!%p242_p3), %s1251_s21, 0 }
   0x7   : > { %245 = sbr.rel (%p242_p3) target bundleno = 741 (0x2e5), region = 44  ;;  %p286_p4 = scmp.lt.s32.totalorder (!%p242_p3), %s1317_s25, 7 }
   0xc   : > { %s287_s26 = scalar_select %p286_p4, %s1317_s25, 7 }
   0xd   : > { %306 = sbr.rel (%p1094_p5) target bundleno = 20 (0x14), region = 48 }
   0xe   : > { %s1091_s27 = sshll.u32 %s287_s26, 3 }
   0xf   : > { %s1324_s30 = scalar_lea.vmem %s1591_s1, %s1091_s27  ;;  %s1329_s9 = scalar_lea.vmem %s1596_s6, %s1091_s27 }
  0x12   : > { %vm307_vm0 = vcmask 261120   ;;  %v1261_v0 = vmov 0.0  }
  0x13   : > { %308 = vst.msk [vmem:[#allocation5] sm:$0xff] %vm307_vm0, %v1261_v0 }
  0x14 PF: > { %v1334_v1 = vld [vmem:[%s1593_s3 + $0x18] sm:$0xff]  ;;  %v314_v2 = vld [vmem:[%s1592_s2 + $0x8] sm:$0xff]  ;;  %v1342_v3 = vld [vmem:[%s1593_s3 + $0x10] sm:$0xff]  ;;  %vm319_vm1 = vcmask 130048   ;;  %s719_s18 = sadd.s32 1, %s1317_s25  ;;  %v1262_v7 = vmov 0   ;;  %v592_v12 = vstv %s1317_s25 }
  0x15   : > { %488 = vmatpush.msra.mxu3 %v1334_v1  ;;  %346 = vmatpush.msra.mxu0 %v314_v2  ;;  %v313_v4 = vld [vmem:[%s1592_s2] sm:$0xff]  ;;  %v1353_v6 = vld [vmem:[%s1593_s3 + $0x8] sm:$0xff]  ;;  %v1100_v8 = vld [vmem:[%s1592_s2 + $0x18] sm:$0xff]  ;;  %v720_v13 = vstv %s719_s18  ;;  %vm361_vm2 = vcmask 261120   ;;  %v1263_v19 = vmov 0.0   ;;  %s848_s28 = sadd.s32 2, %s1317_s25 }
  0x16   : > { %v309_v5 = vld [vmem:[%s1324_s30] sm:$0xff]  ;;  %1180 = vset.pattern.permute.xlu0 %v1262_v7  ;;  %v1099_v9 = vld [vmem:[%s1592_s2 + $0x10] sm:$0xff]  ;;  %388 = vmatpush.msra.mxu1 %v1100_v8  ;;  %v1107_v11 = vld [vmem:[%s1592_s2 + $0x28] sm:$0xff]  ;;  %s977_s29 = sadd.s32 3, %s1317_s25 }
  0x17   : > { %489 = vmatpush.msra.mxu3 %v1342_v3  ;;  %347 = vmatpush.msra.mxu0 %v313_v4  ;;  %v1366_v10 = vld [vmem:[%s1593_s3] sm:$0xff]  ;;  %v1117_v15 = vld [vmem:[%s1593_s3 + $0x38] sm:$0xff]  ;;  %v1116_v18 = vld [vmem:[%s1593_s3 + $0x30] sm:$0xff] }
  0x18   : > { %1095 = vmatmul.msk.f32.vlgmr.msra.gmra.mxu0 %vm319_vm1, %v309_v5  ;;  %429 = vmatpush.msra.mxu2 %v1107_v11  ;;  %v1106_v16 = vld [vmem:[%s1592_s2 + $0x20] sm:$0xff]  ;;  %v1400_v22 = vld [vmem:[%s1593_s3 + $0x58] sm:$0xff]  ;;  %v1115_v24 = vld [vmem:[%s1593_s3 + $0x28] sm:$0xff] }
  0x19   : > { %490 = vmatpush.msra.mxu3 %v1353_v6  ;;  %389 = vmatpush.msra.mxu1 %v1099_v9  ;;  %v1384_v17 = vld [vmem:[%s1590_s0] sm:$0xff]  ;;  %v1410_v25 = vld [vmem:[%s1593_s3 + $0x50] sm:$0xff]  ;;  %v1419_v27 = vld [vmem:[%s1593_s3 + $0x48] sm:$0xff] }
  0x1a   : > { %v1373_v14 = vld [vmem:[#allocation5] sm:$0xff]  ;;  %638 = vmatpush.msrb.mxu0 %v1117_v15  ;;  %1102 = vmatmul.msk.f32.vlgmr.msra.gmra.mxu1 %vm319_vm1, %v309_v5  ;;  %vm593_vm3 = vcmp.lt.s32.totalorder %v592_v12, %v1384_v17  ;;  %vm721_vm4 = vcmp.lt.s32.totalorder %v720_v13, %v1384_v17  ;;  %v310_v33 = vld [vmem:[%s1324_s30 + $0x8] sm:$0xff]  ;;  %v311_v38 = vld [vmem:[%s1324_s30 + $0x10] sm:$0xff] }
  0x1b   : > { %491 = vmatpush.msra.mxu3 %v1366_v10  ;;  %430 = vmatpush.msra.mxu2 %v1106_v16  ;;  %v1129_v20 = vsel %vm593_vm3, 1.0, %v1263_v19  ;;  %v1135_v21 = vsel %vm721_vm4, 1.0, %v1263_v19  ;;  %v1114_v26 = vld [vmem:[%s1593_s3 + $0x20] sm:$0xff]  ;;  %v312_v47 = vld [vmem:[%s1324_s30 + $0x18] sm:$0xff] }
  0x1c   : > { %1124 = vmatmul.msk.f32.vlgmr.msra.gmra.mxu3 %vm361_vm2, %v1373_v14  ;;  %1109 = vmatmul.msk.f32.vlgmr.msra.gmra.mxu2 %vm319_vm1, %v309_v5  ;;  %v1181_v23 = vpack.i.bf16 %v1135_v21, %v1129_v20  ;;  %v1426_v28 = vld [vmem:[%s1593_s3 + $0x40] sm:$0xff] }
  0x1d   : > { %511 = vmatpush.msrb.mxu3 %v1117_v15  ;;  %639 = vmatpush.msrb.mxu0 %v1116_v18  ;;  %v1455_v29 = vld [vmem:[%s1594_s4] ss:$0 sm:$0xff]  ;;  %v1460_v31 = vld [vmem:[%s1594_s4 + $0x1] ss:$0 sm:$0xff]  ;;  %v1478_v37 = vld [vmem:[%s1594_s4 + $0x2] ss:$0 sm:$0xff] }
  0x1e   : > { %658 = vmatpush.msrb.mxu1 %v1400_v22  ;;  %1182 = vperm.xlu0 %1180, %v1181_v23   ;;  %v1473_v36 = vld [vmem:[%s1595_s5] ss:$0 sm:$0xff]  ;;  %v1490_v46 = vld [vmem:[%s1595_s5 + $0x1] ss:$0 sm:$0xff]  ;;  %v1500_v59 = vld [vmem:[%s1595_s5 + $0x2] ss:$0 sm:$0xff] }
  0x1f   : > { %512 = vmatpush.msrb.mxu3 %v1116_v18  ;;  %640 = vmatpush.msrb.mxu0 %v1115_v24 }
  0x20   : > { %659 = vmatpush.msrb.mxu1 %v1410_v25  ;;  %747 = vmatpush.msrb.mxu2 %v1334_v1 }
  0x21   : > { %513 = vmatpush.msrb.mxu3 %v1115_v24  ;;  %641 = vmatpush.msrb.mxu0 %v1114_v26 }
  0x22   : > { %660 = vmatpush.msrb.mxu1 %v1419_v27  ;;  %748 = vmatpush.msrb.mxu2 %v1342_v3 }
  0x23   : > { %514 = vmatpush.msrb.mxu3 %v1114_v26  ;;  %787 = vmatpush.msra.mxu0 %v1400_v22 }
  0x24   : > { %1125 = vmatmul.msk.f32.vlgmr.msrb.gmra.mxu3 %vm361_vm2, %v1373_v14  ;;  %661 = vmatpush.msrb.mxu1 %v1426_v28 }
  0x25   : > { %534 = vmatpush.msra.mxu3 %v1400_v22  ;;  %749 = vmatpush.msrb.mxu2 %v1353_v6 }
  0x26   : > { %876 = vmatpush.msra.mxu1 %v1334_v1  ;;  %788 = vmatpush.msra.mxu0 %v1410_v25 }
  0x27   : > { %535 = vmatpush.msra.mxu3 %v1410_v25  ;;  %750 = vmatpush.msrb.mxu2 %v1366_v10 }
  0x28   : > { %877 = vmatpush.msra.mxu1 %v1342_v3  ;;  %789 = vmatpush.msra.mxu0 %v1419_v27 }
  0x29   : > { %896 = vmatpush.msra.mxu2 %v1117_v15  ;;  %536 = vmatpush.msra.mxu3 %v1419_v27 }
  0x2a   : > { %878 = vmatpush.msra.mxu1 %v1353_v6  ;;  %790 = vmatpush.msra.mxu0 %v1426_v28 }
  0x2b   : > { %897 = vmatpush.msra.mxu2 %v1116_v18  ;;  %537 = vmatpush.msra.mxu3 %v1426_v28 }
  0x2c   : > { %1126 = vmatmul.msk.f32.vlgmr.msra.gmra.mxu3 %vm361_vm2, %v1373_v14  ;;  %879 = vmatpush.msra.mxu1 %v1366_v10 }
  0x2d   : > { %618 = vmatpush.msrb.mxu3 %v1334_v1  ;;  %898 = vmatpush.msra.mxu2 %v1115_v24 }
  0x2e   : > { %1096 = vmatmul.msk.f32.gmra.mxu0 %vm319_vm1, %v310_v33  ;;  %1103 = vmatmul.msk.f32.gmra.mxu1 %vm319_vm1, %v310_v33 }
  0x2f   : > { %619 = vmatpush.msrb.mxu3 %v1342_v3  ;;  %899 = vmatpush.msra.mxu2 %v1114_v26 }
  0x30   : > { %1110 = vmatmul.msk.f32.gmra.mxu2 %vm319_vm1, %v310_v33 }
  0x31   : > { %620 = vmatpush.msrb.mxu3 %v1353_v6 }
  0x33   : > { %621 = vmatpush.msrb.mxu3 %v1366_v10 }
  0x35   : > { %767 = vmatpush.msra.mxu3 %v1117_v15 }
  0x36   : > { %1097 = vmatmul.msk.f32.gmra.mxu0 %vm319_vm1, %v311_v38  ;;  %1104 = vmatmul.msk.f32.gmra.mxu1 %vm319_vm1, %v311_v38 }
  0x37   : > { %768 = vmatpush.msra.mxu3 %v1116_v18 }
  0x38   : > { %1111 = vmatmul.msk.f32.gmra.mxu2 %vm319_vm1, %v311_v38 }
  0x39   : > { %769 = vmatpush.msra.mxu3 %v1115_v24 }
  0x3b   : > { %770 = vmatpush.msra.mxu3 %v1114_v26 }
  0x3e   : > { %1098 = vmatmul.msk.f32.gmra.mxu0 %vm319_vm1, %v312_v47  ;;  %1105 = vmatmul.msk.f32.gmra.mxu1 %vm319_vm1, %v312_v47 }
  0x40   : > { %1112 = vmatmul.msk.f32.gmra.mxu2 %vm319_vm1, %v312_v47 }
  0x90   : > { %v1503_v24 = vpop.permute.xlu0 %1182 }
  0x91   : > { %v1184_v33 = vunpack.i.l.bf16 %v1503_v24 }
  0x95   : > { %v349_v30 = vpop.f32.mrf.mxu0 }
  0x96   : > { %v350_v32 = vadd.f32 %v1455_v29, %v349_v30 }
  0x97   : > { %v391_v34 = vpop.f32.mrf.mxu1 }
  0x98   : > { %362 = vst.msk [vmem:[#allocation2] sm:$0xff] %vm361_vm2, %v350_v32  ;;  %v392_v35 = vadd.f32 %v1460_v31, %v391_v34 }
  0x9a   : > { %403 = vst.msk [vmem:[#allocation3] sm:$0xff] %vm361_vm2, %v392_v35 }
  0x9f   : > { %v493_v39 = vpop.f32.mrf.mxu3  ;;  %v542_v40 = vld [vmem:[#allocation2] sm:$0xff]  ;;  %v432_v42 = vpop.f32.mrf.mxu2 }
  0xa0   : > { %v494_v41 = vadd.f32 %v1473_v36, %v493_v39  ;;  %v433_v43 = vadd.f32 %v1478_v37, %v432_v42 }
  0xa1   : > { %v563_v49 = vld [vmem:[#allocation3] sm:$0xff] }
  0xa2   : > { %v543_v44 = vadd.f32 %v542_v40, %v494_v41  ;;  %444 = vst.msk [vmem:[#allocation4] sm:$0xff] %vm361_vm2, %v433_v43 }
  0xa4   : > { %v1127_v45 = vmul.f32 -1.442695, %v543_v44 }
  0xa6   : > { %1197 = vpow2.f32 %v1127_v45 }
  0xa7   : > { %v516_v48 = vpop.f32.mrf.mxu3 }
  0xa8   : > { %v517_v50 = vadd.f32 %v1490_v46, %v516_v48 }
  0xa9   : > { %v584_v8 = vld [vmem:[#allocation4] sm:$0xff] }
  0xaa   : > { %v564_v51 = vadd.f32 %v563_v49, %v517_v50 }
  0xab   : > { %v394_v38 = vpop.f32.mrf.mxu1 }
  0xac   : > { %v1198_v52 = vpop.eup %1197  ;;  %v1128_v53 = vmul.f32 -1.442695, %v564_v51  ;;  %v395_v40 = vadd.f32 %v1460_v31, %v394_v38 }
  0xad   : > { %v547_v54 = vadd.f32 1.0, %v1198_v52 }
  0xae   : > { %1199 = vpow2.f32 %v1128_v53  ;;  %404 = vst.msk [vmem:[#allocation3 + $0x8] sm:$0xff] %vm361_vm2, %v395_v40 }
  0xaf   : > { %1201 = vrcp.f32 %v547_v54  ;;  %v539_v61 = vpop.f32.mrf.mxu3  ;;  %v559_v62 = vand.u32 2147483648, %v547_v54  ;;  %v557_v0 = vand.u32 2147483647, %v547_v54  ;;  %vm553_vm6 = vweird.f32 %v547_v54 }
  0xb0   : > { %v540_v1 = vadd.f32 %v1500_v59, %v539_v61 }
  0xb1   : > { %v560_v4 = vor.u32 1.1754944e-38, %v559_v62  ;;  %vm558_vm8 = vcmp.eq.f32.partialorder %v557_v0, 8.507059e+37  ;;  %v849_v62 = vstv %s848_s28 }
  0xb2   : > { %vm850_vm13 = vcmp.lt.s32.totalorder %v849_v62, %v1384_v17 }
  0xb3   : > { %v435_v45 = vpop.f32.mrf.mxu2 }
  0xb4   : > { %v1200_v55 = vpop.eup %1199  ;;  %v436_v49 = vadd.f32 %v1478_v37, %v435_v45 }
  0xb5   : > { %v1202_v56 = vpop.eup %1201  ;;  %v568_v57 = vadd.f32 1.0, %v1200_v55  ;;  %v689_v48 = vld [vmem:[#allocation3 + $0x8] sm:$0xff] }
  0xb6   : > { %v549_v58 = vmul.f32 %v1202_v56, %v547_v54  ;;  %vm554_vm5 = vweird.f32 %v1202_v56  ;;  %445 = vst.msk [vmem:[#allocation4 + $0x8] sm:$0xff] %vm361_vm2, %v436_v49 }
  0xb7   : > { %1203 = vrcp.f32 %v568_v57  ;;  %vm555_vm7 = vmor %vm553_vm6, %vm554_vm5  ;;  %v580_v11 = vand.u32 2147483648, %v568_v57  ;;  %v578_v13 = vand.u32 2147483647, %v568_v57  ;;  %vm574_vm10 = vweird.f32 %v568_v57 }
  0xb8   : > { %v550_v60 = vsub.f32 1.0, %v549_v58 }
  0xb9   : > { %v581_v18 = vor.u32 1.1754944e-38, %v580_v11  ;;  %vm579_vm12 = vcmp.eq.f32.partialorder %v578_v13, 8.507059e+37 }
  0xba   : > { %v551_v63 = vmul.f32 %v1202_v56, %v550_v60 }
  0xbb   : > { %v438_v0 = vpop.f32.mrf.mxu2 }
  0xbc   : > { %v552_v2 = vadd.f32 %v1202_v56, %v551_v63  ;;  %v978_v63 = vstv %s977_s29 }
  0xbd   : > { %v1204_v3 = vpop.eup %1203  ;;  %vm979_vm14 = vcmp.lt.s32.totalorder %v978_v63, %v1384_v17 }
  0xbe   : > { %v570_v5 = vmul.f32 %v1204_v3, %v568_v57  ;;  %v556_v6 = vsel %vm555_vm7, %v1202_v56, %v552_v2  ;;  %vm575_vm9 = vweird.f32 %v1204_v3  ;;  %v1149_v2 = vsel %vm979_vm14, 1.0, %v1263_v19 }
  0xbf   : > { %v561_v7 = vsel %vm558_vm8, %v560_v4, %v556_v6  ;;  %vm576_vm11 = vmor %vm574_vm10, %vm575_vm9 }
  0xc0   : > { %v571_v9 = vsub.f32 1.0, %v570_v5  ;;  %v585_v10 = vmul.f32 %v561_v7, %v540_v1  ;;  %v1142_v1 = vsel %vm850_vm13, 1.0, %v1263_v19 }
  0xc1   : > { %v1186_v5 = vpack.i.bf16 %v1149_v2, %v1142_v1 }
  0xc2   : > { %v572_v12 = vmul.f32 %v1204_v3, %v571_v9  ;;  %v586_v15 = vadd.f32 %v585_v10, %v584_v8 }
  0xc3   : > { %1187 = vperm.xlu0 %1180, %v1186_v5   ;;  %v441_v10 = vpop.f32.mrf.mxu2 }
  0xc4   : > { %v573_v16 = vadd.f32 %v1204_v3, %v572_v12  ;;  %1205 = vtanh.f32 %v586_v15  ;;  %v442_v12 = vadd.f32 %v1478_v37, %v441_v10 }
  0xc6   : > { %v577_v20 = vsel %vm576_vm11, %v1204_v3, %v573_v16  ;;  %v439_v3 = vadd.f32 %v1478_v37, %v438_v0  ;;  %447 = vst.msk [vmem:[#allocation4 + $0x18] sm:$0xff] %vm361_vm2, %v442_v12 }
  0xc7   : > { %v582_v21 = vsel %vm579_vm12, %v581_v18, %v577_v20 }
  0xc8   : > { %v588_v23 = vsub.f32 1.0, %v582_v21  ;;  %v590_v32 = vmul.f32 %v582_v21, %v1373_v14  ;;  %v352_v14 = vpop.f32.mrf.mxu0  ;;  %446 = vst.msk [vmem:[#allocation4 + $0x10] sm:$0xff] %vm361_vm2, %v439_v3 }
  0xc9   : > { %v353_v39 = vadd.f32 %v1455_v29, %v352_v14 }
  0xca   : > { %v1206_v26 = vpop.eup %1205 }
  0xcb   : > { %v589_v30 = vmul.f32 %v1206_v26, %v588_v23  ;;  %363 = vst.msk [vmem:[#allocation2 + $0x8] sm:$0xff] %vm361_vm2, %v353_v39 }
  0xcd   : > { %v1507_v34 = vadd.f32 %v590_v32, %v589_v30  ;;  %v711_v30 = vld [vmem:[#allocation4 + $0x8] sm:$0xff] }
  0xcf   : > { %v601_v35 = vmul.f32 %v1184_v33, %v1507_v34  ;;  %1130 = vmatmul.msk.f32.vlgmr.msrb.gmra.mxu3 %vm361_vm2, %v1507_v34  ;;  %1131 = vmatmul.msk.f32.vlgmr.msrb.gmra.mxu0 %vm361_vm2, %v1507_v34  ;;  %v840_v10 = vld [vmem:[#allocation4 + $0x10] sm:$0xff] }
  0xd0   : > { %1132 = vmatmul.msk.f32.vlgmr.msrb.gmra.mxu1 %vm361_vm2, %v1507_v34  ;;  %916 = vmatpush.msrb.mxu3 %v1400_v22  ;;  %v355_v41 = vpop.f32.mrf.mxu0  ;;  %v397_v22 = vpop.f32.mrf.mxu1 }
  0xd1   : > { %602 = vst.msk [vmem:[%s1329_s9] sm:$0xff] %vm361_vm2, %v601_v35  ;;  %v356_v42 = vadd.f32 %v1455_v29, %v355_v41 }
  0xd2   : > { %917 = vmatpush.msrb.mxu3 %v1410_v25  ;;  %v398_v25 = vadd.f32 %v1460_v31, %v397_v22  ;;  %v667_v53 = vld [vmem:[#allocation2 + $0x8] sm:$0xff]  ;;  %v1185_v22 = vunpack.i.h.bf16 %v1503_v24 }
  0xd3   : > { %364 = vst.msk [vmem:[#allocation2 + $0x10] sm:$0xff] %vm361_vm2, %v356_v42 }
  0xd4   : > { %918 = vmatpush.msrb.mxu3 %v1419_v27  ;;  %405 = vst.msk [vmem:[#allocation3 + $0x10] sm:$0xff] %vm361_vm2, %v398_v25 }
  0xd6   : > { %919 = vmatpush.msrb.mxu3 %v1426_v28 }
  0xd8   : > { %v358_v27 = vpop.f32.mrf.mxu0  ;;  %v400_v28 = vpop.f32.mrf.mxu1 }
  0xd9   : > { %v359_v43 = vadd.f32 %v1455_v29, %v358_v27  ;;  %v401_v44 = vadd.f32 %v1460_v31, %v400_v28 }
  0xda   : > { %v796_v45 = vld [vmem:[#allocation2 + $0x10] sm:$0xff] }
  0xdb   : > { %365 = vst.msk [vmem:[#allocation2 + $0x18] sm:$0xff] %vm361_vm2, %v359_v43 }
  0xdc   : > { %406 = vst.msk [vmem:[#allocation3 + $0x18] sm:$0xff] %vm361_vm2, %v401_v44 }
 0x14c   : > { %v643_v47 = vpop.f32.mrf.mxu0 }
 0x14d   : > { %v644_v50 = vadd.f32 %v1490_v46, %v643_v47  ;;  %v663_v19 = vpop.f32.mrf.mxu1  ;;  %v818_v47 = vld [vmem:[#allocation3 + $0x10] sm:$0xff] }
 0x14e   : > { %v664_v20 = vadd.f32 %v1500_v59, %v663_v19  ;;  %v1565_v19 = vpop.permute.xlu0 %1187 }
 0x14f   : > { %v690_v51 = vadd.f32 %v689_v48, %v644_v50 }
 0x151   : > { %v1134_v52 = vmul.f32 -1.442695, %v690_v51 }
 0x152   : > { %v623_v29 = vpop.f32.mrf.mxu3 }
 0x153   : > { %1207 = vpow2.f32 %v1134_v52  ;;  %v624_v31 = vadd.f32 %v1473_v36, %v623_v29 }
 0x155   : > { %v668_v54 = vadd.f32 %v667_v53, %v624_v31 }
 0x157   : > { %v1133_v55 = vmul.f32 -1.442695, %v668_v54 }
 0x159   : > { %v1208_v56 = vpop.eup %1207  ;;  %1209 = vpow2.f32 %v1133_v55 }
 0x15a   : > { %v694_v57 = vadd.f32 1.0, %v1208_v56 }
 0x15c   : > { %1211 = vrcp.f32 %v694_v57  ;;  %v706_v37 = vand.u32 2147483648, %v694_v57  ;;  %vm700_vm5 = vweird.f32 %v694_v57  ;;  %v704_v33 = vand.u32 2147483647, %v694_v57 }
 0x15e   : > { %v707_v38 = vor.u32 1.1754944e-38, %v706_v37  ;;  %vm705_vm7 = vcmp.eq.f32.partialorder %v704_v33, 8.507059e+37  ;;  %v925_v33 = vld [vmem:[#allocation2 + $0x18] sm:$0xff] }
 0x15f   : > { %v1210_v58 = vpop.eup %1209 }
 0x160   : > { %v672_v60 = vadd.f32 1.0, %v1210_v58 }
 0x162   : > { %1213 = vrcp.f32 %v672_v60  ;;  %v1212_v61 = vpop.eup %1211  ;;  %v684_v11 = vand.u32 2147483648, %v672_v60  ;;  %v682_v13 = vand.u32 2147483647, %v672_v60  ;;  %vm678_vm0 = vweird.f32 %v672_v60 }
 0x163   : > { %v696_v4 = vmul.f32 %v1212_v61, %v694_v57  ;;  %vm701_vm4 = vweird.f32 %v1212_v61 }
 0x164   : > { %v685_v18 = vor.u32 1.1754944e-38, %v684_v11  ;;  %vm683_vm3 = vcmp.eq.f32.partialorder %v682_v13, 8.507059e+37  ;;  %vm702_vm6 = vmor %vm700_vm5, %vm701_vm4 }
 0x165   : > { %v697_v8 = vsub.f32 1.0, %v696_v4 }
 0x167   : > { %v698_v15 = vmul.f32 %v1212_v61, %v697_v8 }
 0x168   : > { %v1214_v6 = vpop.eup %1213 }
 0x169   : > { %v674_v7 = vmul.f32 %v1214_v6, %v672_v60  ;;  %vm679_vm15 = vweird.f32 %v1214_v6  ;;  %v699_v26 = vadd.f32 %v1212_v61, %v698_v15 }
 0x16a   : > { %vm680_vm1 = vmor %vm678_vm0, %vm679_vm15 }
 0x16b   : > { %v675_v9 = vsub.f32 1.0, %v674_v7  ;;  %v703_v14 = vsel %vm702_vm6, %v1212_v61, %v699_v26 }
 0x16c   : > { %v708_v39 = vsel %vm705_vm7, %v707_v38, %v703_v14 }
 0x16d   : > { %v676_v17 = vmul.f32 %v1214_v6, %v675_v9  ;;  %v715_v40 = vsub.f32 1.0, %v708_v39  ;;  %v717_v25 = vmul.f32 %v708_v39, %v1507_v34 }
 0x16f   : > { %v677_v16 = vadd.f32 %v1214_v6, %v676_v17 }
 0x171   : > { %v681_v21 = vsel %vm680_vm1, %v1214_v6, %v677_v16 }
 0x172   : > { %v686_v23 = vsel %vm683_vm3, %v685_v18, %v681_v21 }
 0x173   : > { %v712_v32 = vmul.f32 %v686_v23, %v664_v20  ;;  %v1189_v20 = vunpack.i.l.bf16 %v1565_v19 }
 0x175   : > { %v713_v35 = vadd.f32 %v712_v32, %v711_v30 }
 0x177   : > { %1215 = vtanh.f32 %v713_v35 }
 0x17d   : > { %v1216_v41 = vpop.eup %1215 }
 0x17e   : > { %v716_v42 = vmul.f32 %v1216_v41, %v715_v40  ;;  %v947_v40 = vld [vmem:[#allocation3 + $0x18] sm:$0xff] }
 0x180   : > { %v1551_v27 = vadd.f32 %v717_v25, %v716_v42 }
 0x182   : > { %1137 = vmatmul.msk.f32.vlgmr.msrb.gmra.mxu2 %vm361_vm2, %v1551_v27  ;;  %1138 = vmatmul.msk.f32.vlgmr.msra.gmra.mxu3 %vm361_vm2, %v1551_v27  ;;  %v729_v28 = vmul.f32 %v1185_v22, %v1551_v27 }
 0x183   : > { %1139 = vmatmul.msk.f32.vlgmr.msra.gmra.mxu0 %vm361_vm2, %v1551_v27 }
 0x184   : > { %1136 = vst.msk [vmem:[%s1329_s9 + $0x8] sm:$0xff] %vm361_vm2, %v729_v28 }
 0x200   : > { %v792_v0 = vpop.f32.mrf.mxu0 }
 0x201   : > { %v793_v4 = vadd.f32 %v1500_v59, %v792_v0 }
 0x205   : > { %v752_v43 = vpop.f32.mrf.mxu2  ;;  %v772_v24 = vpop.f32.mrf.mxu3 }
 0x206   : > { %v753_v44 = vadd.f32 %v1473_v36, %v752_v43  ;;  %v773_v34 = vadd.f32 %v1490_v46, %v772_v24 }
 0x208   : > { %v797_v48 = vadd.f32 %v796_v45, %v753_v44  ;;  %v819_v49 = vadd.f32 %v818_v47, %v773_v34 }
 0x20a   : > { %v1140_v50 = vmul.f32 -1.442695, %v797_v48  ;;  %v1141_v51 = vmul.f32 -1.442695, %v819_v49 }
 0x20c   : > { %1217 = vpow2.f32 %v1140_v50 }
 0x20d   : > { %1219 = vpow2.f32 %v1141_v51 }
 0x212   : > { %v1218_v52 = vpop.eup %1217 }
 0x213   : > { %v1220_v29 = vpop.eup %1219  ;;  %v801_v31 = vadd.f32 1.0, %v1218_v52 }
 0x214   : > { %v823_v53 = vadd.f32 1.0, %v1220_v29 }
 0x215   : > { %1221 = vrcp.f32 %v801_v31  ;;  %v813_v60 = vand.u32 2147483648, %v801_v31  ;;  %v811_v63 = vand.u32 2147483647, %v801_v31  ;;  %vm807_vm9 = vweird.f32 %v801_v31 }
 0x216   : > { %1223 = vrcp.f32 %v823_v53  ;;  %v835_v9 = vand.u32 2147483648, %v823_v53  ;;  %vm829_vm13 = vweird.f32 %v823_v53  ;;  %v833_v11 = vand.u32 2147483647, %v823_v53 }
 0x217   : > { %v814_v3 = vor.u32 1.1754944e-38, %v813_v60  ;;  %vm812_vm11 = vcmp.eq.f32.partialorder %v811_v63, 8.507059e+37 }
 0x218   : > { %v836_v13 = vor.u32 1.1754944e-38, %v835_v9  ;;  %vm834_vm15 = vcmp.eq.f32.partialorder %v833_v11, 8.507059e+37 }
 0x21b   : > { %v1222_v54 = vpop.eup %1221 }
 0x21c   : > { %v1224_v55 = vpop.eup %1223  ;;  %v803_v56 = vmul.f32 %v1222_v54, %v801_v31  ;;  %vm808_vm8 = vweird.f32 %v1222_v54 }
 0x21d   : > { %v825_v57 = vmul.f32 %v1224_v55, %v823_v53  ;;  %vm809_vm10 = vmor %vm807_vm9, %vm808_vm8  ;;  %vm830_vm12 = vweird.f32 %v1224_v55 }
 0x21e   : > { %v804_v58 = vsub.f32 1.0, %v803_v56  ;;  %vm831_vm14 = vmor %vm829_vm13, %vm830_vm12 }
 0x21f   : > { %v826_v61 = vsub.f32 1.0, %v825_v57  ;;  %v969_v57 = vld [vmem:[#allocation4 + $0x18] sm:$0xff] }
 0x220   : > { %v805_v62 = vmul.f32 %v1222_v54, %v804_v58 }
 0x221   : > { %v827_v1 = vmul.f32 %v1224_v55, %v826_v61 }
 0x222   : > { %v806_v2 = vadd.f32 %v1222_v54, %v805_v62 }
 0x223   : > { %v828_v7 = vadd.f32 %v1224_v55, %v827_v1 }
 0x224   : > { %v810_v5 = vsel %vm809_vm10, %v1222_v54, %v806_v2 }
 0x225   : > { %v815_v6 = vsel %vm812_vm11, %v814_v3, %v810_v5  ;;  %v832_v17 = vsel %vm831_vm14, %v1224_v55, %v828_v7  ;;  %v1190_v3 = vunpack.i.h.bf16 %v1565_v19 }
 0x226   : > { %v841_v8 = vmul.f32 %v815_v6, %v793_v4  ;;  %v837_v15 = vsel %vm834_vm15, %v836_v13, %v832_v17 }
 0x227   : > { %v844_v16 = vsub.f32 1.0, %v837_v15  ;;  %v846_v23 = vmul.f32 %v837_v15, %v1551_v27 }
 0x228   : > { %v842_v12 = vadd.f32 %v841_v8, %v840_v10 }
 0x22a   : > { %1225 = vtanh.f32 %v842_v12 }
 0x230   : > { %v1226_v18 = vpop.eup %1225 }
 0x231   : > { %v845_v21 = vmul.f32 %v1226_v18, %v844_v16 }
 0x233   : > { %v847_v26 = vadd.f32 %v846_v23, %v845_v21 }
 0x235   : > { %v858_v30 = vmul.f32 %v1189_v20, %v847_v26  ;;  %1144 = vmatmul.msk.f32.vlgmr.msra.gmra.mxu1 %vm361_vm2, %v847_v26  ;;  %1145 = vmatmul.msk.f32.vlgmr.msra.gmra.mxu2 %vm361_vm2, %v847_v26 }
 0x236   : > { %1146 = vmatmul.msk.f32.vlgmr.msrb.gmra.mxu3 %vm361_vm2, %v847_v26 }
 0x237   : > { %1143 = vst.msk [vmem:[%s1329_s9 + $0x10] sm:$0xff] %vm361_vm2, %v858_v30 }
 0x2b2   : > { %v881_v37 = vpop.f32.mrf.mxu1 }
 0x2b3   : > { %v882_v32 = vadd.f32 %v1473_v36, %v881_v37 }
 0x2b5   : > { %v926_v35 = vadd.f32 %v925_v33, %v882_v32 }
 0x2b7   : > { %v1147_v14 = vmul.f32 -1.442695, %v926_v35 }
 0x2b8   : > { %v901_v38 = vpop.f32.mrf.mxu2 }
 0x2b9   : > { %1227 = vpow2.f32 %v1147_v14  ;;  %v902_v39 = vadd.f32 %v1490_v46, %v901_v38  ;;  %v921_v48 = vpop.f32.mrf.mxu3 }
 0x2ba   : > { %v922_v52 = vadd.f32 %v1500_v59, %v921_v48 }
 0x2bb   : > { %v948_v41 = vadd.f32 %v947_v40, %v902_v39 }
 0x2bd   : > { %v1148_v22 = vmul.f32 -1.442695, %v948_v41 }
 0x2bf   : > { %v1228_v42 = vpop.eup %1227  ;;  %1229 = vpow2.f32 %v1148_v22 }
 0x2c0   : > { %v930_v25 = vadd.f32 1.0, %v1228_v42 }
 0x2c2   : > { %1231 = vrcp.f32 %v930_v25  ;;  %v942_v44 = vand.u32 2147483648, %v930_v25  ;;  %v940_v45 = vand.u32 2147483647, %v930_v25  ;;  %vm936_vm1 = vweird.f32 %v930_v25 }
 0x2c4   : > { %v943_v50 = vor.u32 1.1754944e-38, %v942_v44  ;;  %vm941_vm4 = vcmp.eq.f32.partialorder %v940_v45, 8.507059e+37 }
 0x2c5   : > { %v1230_v27 = vpop.eup %1229 }
 0x2c6   : > { %v952_v28 = vadd.f32 1.0, %v1230_v27 }
 0x2c8   : > { %v1232_v43 = vpop.eup %1231  ;;  %1233 = vrcp.f32 %v952_v28  ;;  %v964_v54 = vand.u32 2147483648, %v952_v28  ;;  %v962_v56 = vand.u32 2147483647, %v952_v28  ;;  %vm958_vm6 = vweird.f32 %v952_v28 }
 0x2c9   : > { %v932_v24 = vmul.f32 %v1232_v43, %v930_v25  ;;  %vm937_vm0 = vweird.f32 %v1232_v43 }
 0x2ca   : > { %vm938_vm3 = vmor %vm936_vm1, %vm937_vm0  ;;  %v965_v61 = vor.u32 1.1754944e-38, %v964_v54  ;;  %vm963_vm8 = vcmp.eq.f32.partialorder %v962_v56, 8.507059e+37 }
 0x2cb   : > { %v933_v36 = vsub.f32 1.0, %v932_v24 }
 0x2cd   : > { %v934_v34 = vmul.f32 %v1232_v43, %v933_v36 }
 0x2ce   : > { %v1234_v47 = vpop.eup %1233 }
 0x2cf   : > { %v954_v46 = vmul.f32 %v1234_v47, %v952_v28  ;;  %v935_v49 = vadd.f32 %v1232_v43, %v934_v34  ;;  %vm959_vm5 = vweird.f32 %v1234_v47 }
 0x2d0   : > { %vm960_vm7 = vmor %vm958_vm6, %vm959_vm5 }
 0x2d1   : > { %v955_v51 = vsub.f32 1.0, %v954_v46  ;;  %v939_v29 = vsel %vm938_vm3, %v1232_v43, %v935_v49 }
 0x2d2   : > { %v944_v31 = vsel %vm941_vm4, %v943_v50, %v939_v29 }
 0x2d3   : > { %v956_v53 = vmul.f32 %v1234_v47, %v955_v51  ;;  %v970_v55 = vmul.f32 %v944_v31, %v922_v52 }
 0x2d5   : > { %v957_v58 = vadd.f32 %v1234_v47, %v956_v53  ;;  %v971_v60 = vadd.f32 %v970_v55, %v969_v57 }
 0x2d7   : > { %v961_v62 = vsel %vm960_vm7, %v1234_v47, %v957_v58  ;;  %1235 = vtanh.f32 %v971_v60 }
 0x2d8   : > { %v966_v63 = vsel %vm963_vm8, %v965_v61, %v961_v62 }
 0x2d9   : > { %v973_v59 = vsub.f32 1.0, %v966_v63  ;;  %v975_v2 = vmul.f32 %v966_v63, %v847_v26 }
 0x2dd   : > { %v1236_v0 = vpop.eup %1235 }
 0x2de   : > { %v974_v1 = vmul.f32 %v1236_v0, %v973_v59 }
 0x2e0   : > { %v976_v4 = vadd.f32 %v975_v2, %v974_v1 }
 0x2e2   : > { %v987_v5 = vmul.f32 %v1190_v3, %v976_v4  ;;  %990 = vst.msk [vmem:[#allocation5] sm:$0xff] %vm361_vm2, %v976_v4 }
 0x2e4   : > { %1150 = vst.msk [vmem:[%s1329_s9 + $0x18] sm:$0xff] %vm361_vm2, %v987_v5 }
 0x2e5 PF: > { %s16_s23 = sadd.s32 1, %s1259_s23   ;;  %s1597_s21 = smov %s1255_s22 }
 0x2e6   : > { %p13_p6 = scmp.ge.s32.totalorder %s16_s23, 4   ;;  %s1598_s22 = smov %s1600_s24 }
 0x2e8   :  { %15 = sbr.rel (!%p13_p6) target bundleno = 2 (0x2), region = 101 }

// kernel: nnet_vae_forward.9
= control target key start
LH: loop header
LB: loop body
LE: loop exit
PB: predicated region body
PF: predicated region fallthrough
CT: control target
= control target key end

     0   :  { %s1294_s21 = smov 0   ;;  %s1296_s22 = smov 0   ;;  %s1576_s0 = inlined_call_operand.vmem [shape: s32[8,1], index: 0, kind: input, shape index: {}]   ;;  %s1577_s1 = inlined_call_operand.vmem [shape: f32[8,8,8], index: 1, kind: input, shape index: {}]   ;;  %s1578_s2 = inlined_call_operand.vmem [shape: f32[3,8,32], index: 2, kind: input, shape index: {}]   ;;  %s1579_s3 = inlined_call_operand.vmem [shape: f32[3,32,32], index: 3, kind: input, shape index: {}]   ;;  %s1580_s4 = inlined_call_operand.vmem [shape: f32[3,1,32], index: 4, kind: input, shape index: {}]   ;;  %s1581_s5 = inlined_call_operand.vmem [shape: f32[3,1,32], index: 5, kind: input, shape index: {}]   ;;  %s1582_s6 = inlined_call_operand.vmem [shape: f32[8,8,32], index: 6, kind: output, shape index: {}]  }
   0x1   :  { %s1298_s23 = smov 0  }
   0x2 LB: > { %s25_s24 = sadd.s32 1, %s1250_s22  ;;  %p1086_p0 = scmp.ge.s32.totalorder %s1254_s23, 1  ;;  %s1254_s23 = sphi %s1298_s23, %s16_s23   ;;  %s1250_s22 = sphi %s1296_s22, %s1584_s22   ;;  %s1246_s21 = sphi %s1294_s21, %s1583_s21  }
   0x3   : > { %p26_p1 = scmp.ge.s32.totalorder %s25_s24, 2  ;;  %p241_p2 = scmp.lt.s32.totalorder %s1254_s23, 3 }
   0x5   : > { %s1586_s24 = smov (%p26_p1, %s25_s24), 0  ;;  %p242_p3 = pnand %p1086_p0, %p241_p2 }
   0x6   : > { %s1312_s25 = sshll.u32 (!%p242_p3), %s1246_s21, 2  ;;  %p1091_p5 = scmp.ne.s32.totalorder (!%p242_p3), %s1246_s21, 0 }
   0x7   : > { %245 = sbr.rel (%p242_p3) target bundleno = 741 (0x2e5), region = 44  ;;  %p286_p4 = scmp.lt.s32.totalorder (!%p242_p3), %s1312_s25, 7 }
   0xc   : > { %s287_s26 = scalar_select %p286_p4, %s1312_s25, 7 }
   0xd   : > { %306 = sbr.rel (%p1091_p5) target bundleno = 20 (0x14), region = 48 }
   0xe   : > { %s1088_s27 = sshll.u32 %s287_s26, 3 }
   0xf   : > { %s1319_s30 = scalar_lea.vmem %s1577_s1, %s1088_s27  ;;  %s1324_s9 = scalar_lea.vmem %s1582_s6, %s1088_s27 }
  0x12   : > { %vm307_vm0 = vcmask 261120   ;;  %v1256_v0 = vmov 0.0  }
  0x13   : > { %308 = vst.msk [vmem:[#allocation5] sm:$0xff] %vm307_vm0, %v1256_v0 }
  0x14 PF: > { %v1329_v1 = vld [vmem:[%s1579_s3 + $0x18] sm:$0xff]  ;;  %v1334_v2 = vld [vmem:[%s1579_s3 + $0x10] sm:$0xff]  ;;  %v313_v3 = vld [vmem:[%s1578_s2] sm:$0xff]  ;;  %vm318_vm1 = vcmask 64512   ;;  %s716_s16 = sadd.s32 1, %s1312_s25  ;;  %v1257_v7 = vmov 0   ;;  %v589_v9 = vstv %s1312_s25 }
  0x15   : > { %485 = vmatpush.msra.mxu3 %v1329_v1  ;;  %346 = vmatpush.msra.mxu0 %v313_v3  ;;  %v309_v4 = vld [vmem:[%s1319_s30] sm:$0xff]  ;;  %v1345_v5 = vld [vmem:[%s1579_s3 + $0x8] sm:$0xff]  ;;  %v1351_v6 = vld [vmem:[%s1579_s3 + $0x38] sm:$0xff]  ;;  %v717_v10 = vstv %s716_s16  ;;  %vm360_vm2 = vcmask 261120   ;;  %v1258_v17 = vmov 0.0   ;;  %s845_s18 = sadd.s32 2, %s1312_s25 }
  0x16   : > { %1092 = vmatmul.msk.f32.vlgmr.msra.gmra.mxu0 %vm318_vm1, %v309_v4  ;;  %1175 = vset.pattern.permute.xlu0 %v1257_v7  ;;  %v1096_v8 = vld [vmem:[%s1578_s2 + $0x8] sm:$0xff]  ;;  %v447_v11 = vld [vmem:[%s1579_s3] sm:$0xff]  ;;  %v1102_v12 = vld [vmem:[%s1578_s2 + $0x10] sm:$0xff]  ;;  %s974_s19 = sadd.s32 3, %s1312_s25 }
  0x17   : > { %486 = vmatpush.msra.mxu3 %v1334_v2  ;;  %635 = vmatpush.msrb.mxu0 %v1351_v6  ;;  %v1111_v14 = vld [vmem:[%s1579_s3 + $0x30] sm:$0xff]  ;;  %v1375_v15 = vld [vmem:[%s1576_s0] sm:$0xff]  ;;  %v1380_v16 = vld [vmem:[%s1579_s3 + $0x58] sm:$0xff] }
  0x18   : > { %387 = vmatpush.msra.mxu1 %v1096_v8  ;;  %427 = vmatpush.msra.mxu2 %v1102_v12  ;;  %vm590_vm3 = vcmp.lt.s32.totalorder %v589_v9, %v1375_v15  ;;  %vm718_vm4 = vcmp.lt.s32.totalorder %v717_v10, %v1375_v15  ;;  %v1110_v20 = vld [vmem:[%s1579_s3 + $0x28] sm:$0xff]  ;;  %v1397_v22 = vld [vmem:[%s1579_s3 + $0x50] sm:$0xff]  ;;  %v1109_v23 = vld [vmem:[%s1579_s3 + $0x20] sm:$0xff] }
  0x19   : > { %487 = vmatpush.msra.mxu3 %v1345_v5  ;;  %1098 = vmatmul.msk.f32.vlgmr.msra.gmra.mxu1 %vm318_vm1, %v309_v4  ;;  %v1124_v18 = vsel %vm590_vm3, 1.0, %v1258_v17  ;;  %v1130_v19 = vsel %vm718_vm4, 1.0, %v1258_v17  ;;  %v1406_v24 = vld [vmem:[%s1579_s3 + $0x48] sm:$0xff]  ;;  %v1413_v25 = vld [vmem:[%s1579_s3 + $0x40] sm:$0xff]  ;;  %v311_v36 = vld [vmem:[%s1319_s30 + $0x10] sm:$0xff] }
  0x1a   : > { %v1366_v13 = vld [vmem:[#allocation5] sm:$0xff]  ;;  %636 = vmatpush.msrb.mxu0 %v1111_v14  ;;  %1104 = vmatmul.msk.f32.vlgmr.msra.gmra.mxu2 %vm318_vm1, %v309_v4  ;;  %v1176_v21 = vpack.i.bf16 %v1130_v19, %v1124_v18  ;;  %v310_v31 = vld [vmem:[%s1319_s30 + $0x8] sm:$0xff]  ;;  %v312_v44 = vld [vmem:[%s1319_s30 + $0x18] sm:$0xff] }
  0x1b   : > { %488 = vmatpush.msra.mxu3 %v447_v11  ;;  %655 = vmatpush.msrb.mxu1 %v1380_v16  ;;  %v1441_v26 = vld [vmem:[%s1580_s4] ss:$0 sm:$0xff]  ;;  %v1446_v28 = vld [vmem:[%s1580_s4 + $0x1] ss:$0 sm:$0xff]  ;;  %v1459_v33 = vld [vmem:[%s1580_s4 + $0x2] ss:$0 sm:$0xff] }
  0x1c   : > { %1119 = vmatmul.msk.f32.vlgmr.msra.gmra.mxu3 %vm360_vm2, %v1366_v13  ;;  %637 = vmatpush.msrb.mxu0 %v1110_v20  ;;  %v1464_v34 = vld [vmem:[%s1581_s5] ss:$0 sm:$0xff]  ;;  %v1476_v43 = vld [vmem:[%s1581_s5 + $0x1] ss:$0 sm:$0xff]  ;;  %v1486_v56 = vld [vmem:[%s1581_s5 + $0x2] ss:$0 sm:$0xff] }
  0x1d   : > { %508 = vmatpush.msrb.mxu3 %v1351_v6  ;;  %1177 = vperm.xlu0 %1175, %v1176_v21  }
  0x1e   : > { %656 = vmatpush.msrb.mxu1 %v1397_v22  ;;  %638 = vmatpush.msrb.mxu0 %v1109_v23 }
  0x1f   : > { %509 = vmatpush.msrb.mxu3 %v1111_v14  ;;  %744 = vmatpush.msrb.mxu2 %v1329_v1 }
  0x20   : > { %657 = vmatpush.msrb.mxu1 %v1406_v24  ;;  %784 = vmatpush.msra.mxu0 %v1380_v16 }
  0x21   : > { %510 = vmatpush.msrb.mxu3 %v1110_v20  ;;  %745 = vmatpush.msrb.mxu2 %v1334_v2 }
  0x22   : > { %658 = vmatpush.msrb.mxu1 %v1413_v25  ;;  %785 = vmatpush.msra.mxu0 %v1397_v22 }
  0x23   : > { %511 = vmatpush.msrb.mxu3 %v1109_v23  ;;  %746 = vmatpush.msrb.mxu2 %v1345_v5 }
  0x24   : > { %1120 = vmatmul.msk.f32.vlgmr.msrb.gmra.mxu3 %vm360_vm2, %v1366_v13  ;;  %786 = vmatpush.msra.mxu0 %v1406_v24 }
  0x25   : > { %531 = vmatpush.msra.mxu3 %v1380_v16  ;;  %747 = vmatpush.msrb.mxu2 %v447_v11 }
  0x26   : > { %873 = vmatpush.msra.mxu1 %v1329_v1  ;;  %787 = vmatpush.msra.mxu0 %v1413_v25 }
  0x27   : > { %532 = vmatpush.msra.mxu3 %v1397_v22  ;;  %893 = vmatpush.msra.mxu2 %v1351_v6 }
  0x28   : > { %874 = vmatpush.msra.mxu1 %v1334_v2  ;;  %1093 = vmatmul.msk.f32.gmra.mxu0 %vm318_vm1, %v310_v31 }
  0x29   : > { %533 = vmatpush.msra.mxu3 %v1406_v24  ;;  %894 = vmatpush.msra.mxu2 %v1111_v14 }
  0x2a   : > { %875 = vmatpush.msra.mxu1 %v1345_v5  ;;  %1105 = vmatmul.msk.f32.gmra.mxu2 %vm318_vm1, %v310_v31 }
  0x2b   : > { %534 = vmatpush.msra.mxu3 %v1413_v25  ;;  %895 = vmatpush.msra.mxu2 %v1110_v20 }
  0x2c   : > { %1121 = vmatmul.msk.f32.vlgmr.msra.gmra.mxu3 %vm360_vm2, %v1366_v13  ;;  %876 = vmatpush.msra.mxu1 %v447_v11 }
  0x2d   : > { %615 = vmatpush.msrb.mxu3 %v1329_v1  ;;  %896 = vmatpush.msra.mxu2 %v1109_v23 }
  0x2e   : > { %1099 = vmatmul.msk.f32.gmra.mxu1 %vm318_vm1, %v310_v31 }
  0x2f   : > { %616 = vmatpush.msrb.mxu3 %v1334_v2 }
  0x30   : > { %1094 = vmatmul.msk.f32.gmra.mxu0 %vm318_vm1, %v311_v36 }
  0x31   : > { %617 = vmatpush.msrb.mxu3 %v1345_v5 }
  0x32   : > { %1106 = vmatmul.msk.f32.gmra.mxu2 %vm318_vm1, %v311_v36 }
  0x33   : > { %618 = vmatpush.msrb.mxu3 %v447_v11 }
  0x35   : > { %764 = vmatpush.msra.mxu3 %v1351_v6 }
  0x36   : > { %1100 = vmatmul.msk.f32.gmra.mxu1 %vm318_vm1, %v311_v36 }
  0x37   : > { %765 = vmatpush.msra.mxu3 %v1111_v14 }
  0x38   : > { %1095 = vmatmul.msk.f32.gmra.mxu0 %vm318_vm1, %v312_v44 }
  0x39   : > { %766 = vmatpush.msra.mxu3 %v1110_v20 }
  0x3a   : > { %1107 = vmatmul.msk.f32.gmra.mxu2 %vm318_vm1, %v312_v44 }
  0x3b   : > { %767 = vmatpush.msra.mxu3 %v1109_v23 }
  0x3e   : > { %1101 = vmatmul.msk.f32.gmra.mxu1 %vm318_vm1, %v312_v44 }
  0x8f   : > { %v1489_v21 = vpop.permute.xlu0 %1177 }
  0x93   : > { %v348_v27 = vpop.f32.mrf.mxu0 }
  0x94   : > { %v349_v29 = vadd.f32 %v1441_v26, %v348_v27 }
  0x96   : > { %361 = vst.msk [vmem:[#allocation2] sm:$0xff] %vm360_vm2, %v349_v29  ;;  %v389_v30 = vpop.f32.mrf.mxu1 }
  0x97   : > { %v390_v32 = vadd.f32 %v1446_v28, %v389_v30  ;;  %v1179_v30 = vunpack.i.l.bf16 %v1489_v21 }
  0x99   : > { %401 = vst.msk [vmem:[#allocation3] sm:$0xff] %vm360_vm2, %v390_v32 }
  0x9d   : > { %v429_v35 = vpop.f32.mrf.mxu2  ;;  %v539_v38 = vld [vmem:[#allocation2] sm:$0xff] }
  0x9e   : > { %v430_v39 = vadd.f32 %v1459_v33, %v429_v35 }
  0x9f   : > { %v490_v37 = vpop.f32.mrf.mxu3 }
  0xa0   : > { %v491_v40 = vadd.f32 %v1464_v34, %v490_v37  ;;  %441 = vst.msk [vmem:[#allocation4] sm:$0xff] %vm360_vm2, %v430_v39  ;;  %v560_v46 = vld [vmem:[#allocation3] sm:$0xff] }
  0xa2   : > { %v540_v41 = vadd.f32 %v539_v38, %v491_v40 }
  0xa4   : > { %v1122_v42 = vmul.f32 -1.442695, %v540_v41 }
  0xa6   : > { %1192 = vpow2.f32 %v1122_v42 }
  0xa7   : > { %v513_v45 = vpop.f32.mrf.mxu3  ;;  %v581_v5 = vld [vmem:[#allocation4] sm:$0xff] }
  0xa8   : > { %v514_v47 = vadd.f32 %v1476_v43, %v513_v45 }
  0xaa   : > { %v561_v48 = vadd.f32 %v560_v46, %v514_v47 }
  0xab   : > { %v392_v35 = vpop.f32.mrf.mxu1 }
  0xac   : > { %v1193_v49 = vpop.eup %1192  ;;  %v1123_v50 = vmul.f32 -1.442695, %v561_v48  ;;  %v393_v37 = vadd.f32 %v1446_v28, %v392_v35 }
  0xad   : > { %v544_v51 = vadd.f32 1.0, %v1193_v49  ;;  %v432_v42 = vpop.f32.mrf.mxu2 }
  0xae   : > { %1194 = vpow2.f32 %v1123_v50  ;;  %402 = vst.msk [vmem:[#allocation3 + $0x8] sm:$0xff] %vm360_vm2, %v393_v37  ;;  %v433_v46 = vadd.f32 %v1459_v33, %v432_v42 }
  0xaf   : > { %1196 = vrcp.f32 %v544_v51  ;;  %v536_v58 = vpop.f32.mrf.mxu3  ;;  %v556_v59 = vand.u32 2147483648, %v544_v51  ;;  %v554_v61 = vand.u32 2147483647, %v544_v51  ;;  %vm550_vm6 = vweird.f32 %v544_v51 }
  0xb0   : > { %v537_v62 = vadd.f32 %v1486_v56, %v536_v58  ;;  %442 = vst.msk [vmem:[#allocation4 + $0x8] sm:$0xff] %vm360_vm2, %v433_v46 }
  0xb1   : > { %v557_v1 = vor.u32 1.1754944e-38, %v556_v59  ;;  %vm555_vm8 = vcmp.eq.f32.partialorder %v554_v61, 8.507059e+37  ;;  %v846_v59 = vstv %s845_s18 }
  0xb2   : > { %vm847_vm13 = vcmp.lt.s32.totalorder %v846_v59, %v1375_v15 }
  0xb4   : > { %v1195_v52 = vpop.eup %1194 }
  0xb5   : > { %v1197_v53 = vpop.eup %1196  ;;  %v565_v54 = vadd.f32 1.0, %v1195_v52  ;;  %v686_v45 = vld [vmem:[#allocation3 + $0x8] sm:$0xff]  ;;  %v435_v61 = vpop.f32.mrf.mxu2 }
  0xb6   : > { %v546_v55 = vmul.f32 %v1197_v53, %v544_v51  ;;  %vm551_vm5 = vweird.f32 %v1197_v53 }
  0xb7   : > { %1198 = vrcp.f32 %v565_v54  ;;  %vm552_vm7 = vmor %vm550_vm6, %vm551_vm5  ;;  %v577_v8 = vand.u32 2147483648, %v565_v54  ;;  %v575_v10 = vand.u32 2147483647, %v565_v54  ;;  %vm571_vm10 = vweird.f32 %v565_v54 }
  0xb8   : > { %v547_v57 = vsub.f32 1.0, %v546_v55 }
  0xb9   : > { %v578_v14 = vor.u32 1.1754944e-38, %v577_v8  ;;  %vm576_vm12 = vcmp.eq.f32.partialorder %v575_v10, 8.507059e+37 }
  0xba   : > { %v548_v60 = vmul.f32 %v1197_v53, %v547_v57 }
  0xbc   : > { %v549_v63 = vadd.f32 %v1197_v53, %v548_v60  ;;  %v975_v60 = vstv %s974_s19 }
  0xbd   : > { %v1199_v0 = vpop.eup %1198  ;;  %vm976_vm14 = vcmp.lt.s32.totalorder %v975_v60, %v1375_v15 }
  0xbe   : > { %v567_v2 = vmul.f32 %v1199_v0, %v565_v54  ;;  %v553_v3 = vsel %vm552_vm7, %v1197_v53, %v549_v63  ;;  %vm572_vm9 = vweird.f32 %v1199_v0  ;;  %v1144_v63 = vsel %vm976_vm14, 1.0, %v1258_v17 }
  0xbf   : > { %v558_v4 = vsel %vm555_vm8, %v557_v1, %v553_v3  ;;  %vm573_vm11 = vmor %vm571_vm10, %vm572_vm9 }
  0xc0   : > { %v568_v6 = vsub.f32 1.0, %v567_v2  ;;  %v582_v7 = vmul.f32 %v558_v4, %v537_v62  ;;  %v1137_v62 = vsel %vm847_vm13, 1.0, %v1258_v17 }
  0xc1   : > { %v1181_v2 = vpack.i.bf16 %v1144_v63, %v1137_v62 }
  0xc2   : > { %v569_v9 = vmul.f32 %v1199_v0, %v568_v6  ;;  %v583_v11 = vadd.f32 %v582_v7, %v581_v5  ;;  %v438_v7 = vpop.f32.mrf.mxu2 }
  0xc3   : > { %1182 = vperm.xlu0 %1175, %v1181_v2  }
  0xc4   : > { %v570_v12 = vadd.f32 %v1199_v0, %v569_v9  ;;  %1200 = vtanh.f32 %v583_v11  ;;  %v439_v9 = vadd.f32 %v1459_v33, %v438_v7 }
  0xc6   : > { %v574_v18 = vsel %vm573_vm11, %v1199_v0, %v570_v12  ;;  %v436_v0 = vadd.f32 %v1459_v33, %v435_v61  ;;  %444 = vst.msk [vmem:[#allocation4 + $0x18] sm:$0xff] %vm360_vm2, %v439_v9 }
  0xc7   : > { %v579_v19 = vsel %vm576_vm12, %v578_v14, %v574_v18 }
  0xc8   : > { %v585_v20 = vsub.f32 1.0, %v579_v19  ;;  %v587_v29 = vmul.f32 %v579_v19, %v1366_v13  ;;  %v351_v13 = vpop.f32.mrf.mxu0  ;;  %443 = vst.msk [vmem:[#allocation4 + $0x10] sm:$0xff] %vm360_vm2, %v436_v0 }
  0xc9   : > { %v352_v36 = vadd.f32 %v1441_v26, %v351_v13 }
  0xca   : > { %v1201_v23 = vpop.eup %1200 }
  0xcb   : > { %v586_v27 = vmul.f32 %v1201_v23, %v585_v20  ;;  %362 = vst.msk [vmem:[#allocation2 + $0x8] sm:$0xff] %vm360_vm2, %v352_v36 }
  0xcd   : > { %v1493_v31 = vadd.f32 %v587_v29, %v586_v27  ;;  %v708_v27 = vld [vmem:[#allocation4 + $0x8] sm:$0xff] }
  0xcf   : > { %v598_v32 = vmul.f32 %v1179_v30, %v1493_v31  ;;  %1125 = vmatmul.msk.f32.vlgmr.msrb.gmra.mxu3 %vm360_vm2, %v1493_v31  ;;  %1126 = vmatmul.msk.f32.vlgmr.msrb.gmra.mxu0 %vm360_vm2, %v1493_v31  ;;  %v837_v7 = vld [vmem:[#allocation4 + $0x10] sm:$0xff] }
  0xd0   : > { %1127 = vmatmul.msk.f32.vlgmr.msrb.gmra.mxu1 %vm360_vm2, %v1493_v31  ;;  %913 = vmatpush.msrb.mxu3 %v1380_v16  ;;  %v354_v38 = vpop.f32.mrf.mxu0  ;;  %v395_v16 = vpop.f32.mrf.mxu1 }
  0xd1   : > { %599 = vst.msk [vmem:[%s1324_s9] sm:$0xff] %vm360_vm2, %v598_v32  ;;  %v355_v39 = vadd.f32 %v1441_v26, %v354_v38 }
  0xd2   : > { %914 = vmatpush.msrb.mxu3 %v1397_v22  ;;  %v396_v22 = vadd.f32 %v1446_v28, %v395_v16  ;;  %v664_v50 = vld [vmem:[#allocation2 + $0x8] sm:$0xff]  ;;  %v1180_v16 = vunpack.i.h.bf16 %v1489_v21 }
  0xd3   : > { %363 = vst.msk [vmem:[#allocation2 + $0x10] sm:$0xff] %vm360_vm2, %v355_v39 }
  0xd4   : > { %915 = vmatpush.msrb.mxu3 %v1406_v24  ;;  %403 = vst.msk [vmem:[#allocation3 + $0x10] sm:$0xff] %vm360_vm2, %v396_v22 }
  0xd6   : > { %916 = vmatpush.msrb.mxu3 %v1413_v25 }
  0xd8   : > { %v357_v24 = vpop.f32.mrf.mxu0  ;;  %v398_v25 = vpop.f32.mrf.mxu1 }
  0xd9   : > { %v358_v40 = vadd.f32 %v1441_v26, %v357_v24  ;;  %v399_v41 = vadd.f32 %v1446_v28, %v398_v25 }
  0xda   : > { %v793_v42 = vld [vmem:[#allocation2 + $0x10] sm:$0xff] }
  0xdb   : > { %364 = vst.msk [vmem:[#allocation2 + $0x18] sm:$0xff] %vm360_vm2, %v358_v40 }
  0xdc   : > { %404 = vst.msk [vmem:[#allocation3 + $0x18] sm:$0xff] %vm360_vm2, %v399_v41 }
 0x14c   : > { %v640_v44 = vpop.f32.mrf.mxu0 }
 0x14d   : > { %v641_v47 = vadd.f32 %v1476_v43, %v640_v44  ;;  %v660_v17 = vpop.f32.mrf.mxu1  ;;  %v815_v44 = vld [vmem:[#allocation3 + $0x10] sm:$0xff] }
 0x14e   : > { %v661_v18 = vadd.f32 %v1486_v56, %v660_v17  ;;  %v1551_v17 = vpop.permute.xlu0 %1182 }
 0x14f   : > { %v687_v48 = vadd.f32 %v686_v45, %v641_v47 }
 0x151   : > { %v1129_v49 = vmul.f32 -1.442695, %v687_v48 }
 0x152   : > { %v620_v26 = vpop.f32.mrf.mxu3 }
 0x153   : > { %1202 = vpow2.f32 %v1129_v49  ;;  %v621_v28 = vadd.f32 %v1464_v34, %v620_v26 }
 0x155   : > { %v665_v51 = vadd.f32 %v664_v50, %v621_v28 }
 0x157   : > { %v1128_v52 = vmul.f32 -1.442695, %v665_v51 }
 0x159   : > { %v1203_v53 = vpop.eup %1202  ;;  %1204 = vpow2.f32 %v1128_v52 }
 0x15a   : > { %v691_v54 = vadd.f32 1.0, %v1203_v53 }
 0x15c   : > { %1206 = vrcp.f32 %v691_v54  ;;  %v703_v33 = vand.u32 2147483648, %v691_v54  ;;  %vm697_vm5 = vweird.f32 %v691_v54  ;;  %v701_v30 = vand.u32 2147483647, %v691_v54 }
 0x15e   : > { %v704_v35 = vor.u32 1.1754944e-38, %v703_v33  ;;  %vm702_vm7 = vcmp.eq.f32.partialorder %v701_v30, 8.507059e+37  ;;  %v922_v30 = vld [vmem:[#allocation2 + $0x18] sm:$0xff] }
 0x15f   : > { %v1205_v55 = vpop.eup %1204 }
 0x160   : > { %v669_v57 = vadd.f32 1.0, %v1205_v55 }
 0x162   : > { %1208 = vrcp.f32 %v669_v57  ;;  %v1207_v58 = vpop.eup %1206  ;;  %v681_v8 = vand.u32 2147483648, %v669_v57  ;;  %v679_v10 = vand.u32 2147483647, %v669_v57  ;;  %vm675_vm0 = vweird.f32 %v669_v57 }
 0x163   : > { %v693_v1 = vmul.f32 %v1207_v58, %v691_v54  ;;  %vm698_vm4 = vweird.f32 %v1207_v58 }
 0x164   : > { %v682_v14 = vor.u32 1.1754944e-38, %v681_v8  ;;  %vm680_vm3 = vcmp.eq.f32.partialorder %v679_v10, 8.507059e+37  ;;  %vm699_vm6 = vmor %vm697_vm5, %vm698_vm4 }
 0x165   : > { %v694_v5 = vsub.f32 1.0, %v693_v1 }
 0x167   : > { %v695_v11 = vmul.f32 %v1207_v58, %v694_v5 }
 0x168   : > { %v1209_v3 = vpop.eup %1208 }
 0x169   : > { %v671_v4 = vmul.f32 %v1209_v3, %v669_v57  ;;  %vm676_vm15 = vweird.f32 %v1209_v3  ;;  %v696_v23 = vadd.f32 %v1207_v58, %v695_v11 }
 0x16a   : > { %vm677_vm1 = vmor %vm675_vm0, %vm676_vm15 }
 0x16b   : > { %v672_v6 = vsub.f32 1.0, %v671_v4  ;;  %v700_v13 = vsel %vm699_vm6, %v1207_v58, %v696_v23 }
 0x16c   : > { %v705_v36 = vsel %vm702_vm7, %v704_v35, %v700_v13 }
 0x16d   : > { %v673_v15 = vmul.f32 %v1209_v3, %v672_v6  ;;  %v712_v37 = vsub.f32 1.0, %v705_v36  ;;  %v714_v22 = vmul.f32 %v705_v36, %v1493_v31 }
 0x16f   : > { %v674_v12 = vadd.f32 %v1209_v3, %v673_v15 }
 0x171   : > { %v678_v19 = vsel %vm677_vm1, %v1209_v3, %v674_v12 }
 0x172   : > { %v683_v20 = vsel %vm680_vm3, %v682_v14, %v678_v19 }
 0x173   : > { %v709_v29 = vmul.f32 %v683_v20, %v661_v18  ;;  %v1184_v18 = vunpack.i.l.bf16 %v1551_v17 }
 0x175   : > { %v710_v32 = vadd.f32 %v709_v29, %v708_v27 }
 0x177   : > { %1210 = vtanh.f32 %v710_v32 }
 0x17d   : > { %v1211_v38 = vpop.eup %1210 }
 0x17e   : > { %v713_v39 = vmul.f32 %v1211_v38, %v712_v37  ;;  %v944_v37 = vld [vmem:[#allocation3 + $0x18] sm:$0xff] }
 0x180   : > { %v1537_v24 = vadd.f32 %v714_v22, %v713_v39 }
 0x182   : > { %1132 = vmatmul.msk.f32.vlgmr.msrb.gmra.mxu2 %vm360_vm2, %v1537_v24  ;;  %1133 = vmatmul.msk.f32.vlgmr.msra.gmra.mxu3 %vm360_vm2, %v1537_v24  ;;  %v726_v25 = vmul.f32 %v1180_v16, %v1537_v24 }
 0x183   : > { %1134 = vmatmul.msk.f32.vlgmr.msra.gmra.mxu0 %vm360_vm2, %v1537_v24 }
 0x184   : > { %1131 = vst.msk [vmem:[%s1324_s9 + $0x8] sm:$0xff] %vm360_vm2, %v726_v25 }
 0x200   : > { %v789_v61 = vpop.f32.mrf.mxu0 }
 0x201   : > { %v790_v1 = vadd.f32 %v1486_v56, %v789_v61 }
 0x205   : > { %v749_v40 = vpop.f32.mrf.mxu2  ;;  %v769_v21 = vpop.f32.mrf.mxu3 }
 0x206   : > { %v750_v41 = vadd.f32 %v1464_v34, %v749_v40  ;;  %v770_v31 = vadd.f32 %v1476_v43, %v769_v21 }
 0x208   : > { %v794_v45 = vadd.f32 %v793_v42, %v750_v41  ;;  %v816_v46 = vadd.f32 %v815_v44, %v770_v31 }
 0x20a   : > { %v1135_v47 = vmul.f32 -1.442695, %v794_v45  ;;  %v1136_v48 = vmul.f32 -1.442695, %v816_v46 }
 0x20c   : > { %1212 = vpow2.f32 %v1135_v47 }
 0x20d   : > { %1214 = vpow2.f32 %v1136_v48 }
 0x212   : > { %v1213_v49 = vpop.eup %1212 }
 0x213   : > { %v1215_v26 = vpop.eup %1214  ;;  %v798_v28 = vadd.f32 1.0, %v1213_v49 }
 0x214   : > { %v820_v50 = vadd.f32 1.0, %v1215_v26 }
 0x215   : > { %1216 = vrcp.f32 %v798_v28  ;;  %v810_v57 = vand.u32 2147483648, %v798_v28  ;;  %v808_v60 = vand.u32 2147483647, %v798_v28  ;;  %vm804_vm9 = vweird.f32 %v798_v28 }
 0x216   : > { %1218 = vrcp.f32 %v820_v50  ;;  %v832_v6 = vand.u32 2147483648, %v820_v50  ;;  %vm826_vm13 = vweird.f32 %v820_v50  ;;  %v830_v8 = vand.u32 2147483647, %v820_v50 }
 0x217   : > { %v811_v0 = vor.u32 1.1754944e-38, %v810_v57  ;;  %vm809_vm11 = vcmp.eq.f32.partialorder %v808_v60, 8.507059e+37 }
 0x218   : > { %v833_v10 = vor.u32 1.1754944e-38, %v832_v6  ;;  %vm831_vm15 = vcmp.eq.f32.partialorder %v830_v8, 8.507059e+37 }
 0x21b   : > { %v1217_v51 = vpop.eup %1216 }
 0x21c   : > { %v1219_v52 = vpop.eup %1218  ;;  %v800_v53 = vmul.f32 %v1217_v51, %v798_v28  ;;  %vm805_vm8 = vweird.f32 %v1217_v51 }
 0x21d   : > { %v822_v54 = vmul.f32 %v1219_v52, %v820_v50  ;;  %vm806_vm10 = vmor %vm804_vm9, %vm805_vm8  ;;  %vm827_vm12 = vweird.f32 %v1219_v52 }
 0x21e   : > { %v801_v55 = vsub.f32 1.0, %v800_v53  ;;  %vm828_vm14 = vmor %vm826_vm13, %vm827_vm12 }
 0x21f   : > { %v823_v58 = vsub.f32 1.0, %v822_v54  ;;  %v966_v54 = vld [vmem:[#allocation4 + $0x18] sm:$0xff] }
 0x220   : > { %v802_v59 = vmul.f32 %v1217_v51, %v801_v55 }
 0x221   : > { %v824_v62 = vmul.f32 %v1219_v52, %v823_v58 }
 0x222   : > { %v803_v63 = vadd.f32 %v1217_v51, %v802_v59 }
 0x223   : > { %v825_v4 = vadd.f32 %v1219_v52, %v824_v62 }
 0x224   : > { %v807_v2 = vsel %vm806_vm10, %v1217_v51, %v803_v63 }
 0x225   : > { %v812_v3 = vsel %vm809_vm11, %v811_v0, %v807_v2  ;;  %v829_v15 = vsel %vm828_vm14, %v1219_v52, %v825_v4  ;;  %v1185_v0 = vunpack.i.h.bf16 %v1551_v17 }
 0x226   : > { %v838_v5 = vmul.f32 %v812_v3, %v790_v1  ;;  %v834_v11 = vsel %vm831_vm15, %v833_v10, %v829_v15 }
 0x227   : > { %v841_v12 = vsub.f32 1.0, %v834_v11  ;;  %v843_v20 = vmul.f32 %v834_v11, %v1537_v24 }
 0x228   : > { %v839_v9 = vadd.f32 %v838_v5, %v837_v7 }
 0x22a   : > { %1220 = vtanh.f32 %v839_v9 }
 0x230   : > { %v1221_v14 = vpop.eup %1220 }
 0x231   : > { %v842_v19 = vmul.f32 %v1221_v14, %v841_v12 }
 0x233   : > { %v844_v23 = vadd.f32 %v843_v20, %v842_v19 }
 0x235   : > { %v855_v27 = vmul.f32 %v1184_v18, %v844_v23  ;;  %1139 = vmatmul.msk.f32.vlgmr.msra.gmra.mxu1 %vm360_vm2, %v844_v23  ;;  %1140 = vmatmul.msk.f32.vlgmr.msra.gmra.mxu2 %vm360_vm2, %v844_v23 }
 0x236   : > { %1141 = vmatmul.msk.f32.vlgmr.msrb.gmra.mxu3 %vm360_vm2, %v844_v23 }
 0x237   : > { %1138 = vst.msk [vmem:[%s1324_s9 + $0x10] sm:$0xff] %vm360_vm2, %v855_v27 }
 0x2b2   : > { %v878_v33 = vpop.f32.mrf.mxu1 }
 0x2b3   : > { %v879_v29 = vadd.f32 %v1464_v34, %v878_v33 }
 0x2b5   : > { %v923_v32 = vadd.f32 %v922_v30, %v879_v29 }
 0x2b7   : > { %v1142_v13 = vmul.f32 -1.442695, %v923_v32 }
 0x2b8   : > { %v898_v35 = vpop.f32.mrf.mxu2 }
 0x2b9   : > { %1222 = vpow2.f32 %v1142_v13  ;;  %v899_v36 = vadd.f32 %v1476_v43, %v898_v35  ;;  %v918_v45 = vpop.f32.mrf.mxu3 }
 0x2ba   : > { %v919_v49 = vadd.f32 %v1486_v56, %v918_v45 }
 0x2bb   : > { %v945_v38 = vadd.f32 %v944_v37, %v899_v36 }
 0x2bd   : > { %v1143_v16 = vmul.f32 -1.442695, %v945_v38 }
 0x2bf   : > { %v1223_v39 = vpop.eup %1222  ;;  %1224 = vpow2.f32 %v1143_v16 }
 0x2c0   : > { %v927_v22 = vadd.f32 1.0, %v1223_v39 }
 0x2c2   : > { %1226 = vrcp.f32 %v927_v22  ;;  %v939_v41 = vand.u32 2147483648, %v927_v22  ;;  %v937_v42 = vand.u32 2147483647, %v927_v22  ;;  %vm933_vm1 = vweird.f32 %v927_v22 }
 0x2c4   : > { %v940_v47 = vor.u32 1.1754944e-38, %v939_v41  ;;  %vm938_vm4 = vcmp.eq.f32.partialorder %v937_v42, 8.507059e+37 }
 0x2c5   : > { %v1225_v24 = vpop.eup %1224 }
 0x2c6   : > { %v949_v25 = vadd.f32 1.0, %v1225_v24 }
 0x2c8   : > { %v1227_v40 = vpop.eup %1226  ;;  %1228 = vrcp.f32 %v949_v25  ;;  %v961_v51 = vand.u32 2147483648, %v949_v25  ;;  %v959_v53 = vand.u32 2147483647, %v949_v25  ;;  %vm955_vm6 = vweird.f32 %v949_v25 }
 0x2c9   : > { %v929_v21 = vmul.f32 %v1227_v40, %v927_v22  ;;  %vm934_vm0 = vweird.f32 %v1227_v40 }
 0x2ca   : > { %vm935_vm3 = vmor %vm933_vm1, %vm934_vm0  ;;  %v962_v58 = vor.u32 1.1754944e-38, %v961_v51  ;;  %vm960_vm8 = vcmp.eq.f32.partialorder %v959_v53, 8.507059e+37 }
 0x2cb   : > { %v930_v34 = vsub.f32 1.0, %v929_v21 }
 0x2cd   : > { %v931_v31 = vmul.f32 %v1227_v40, %v930_v34 }
 0x2ce   : > { %v1229_v44 = vpop.eup %1228 }
 0x2cf   : > { %v951_v43 = vmul.f32 %v1229_v44, %v949_v25  ;;  %v932_v46 = vadd.f32 %v1227_v40, %v931_v31  ;;  %vm956_vm5 = vweird.f32 %v1229_v44 }
 0x2d0   : > { %vm957_vm7 = vmor %vm955_vm6, %vm956_vm5 }
 0x2d1   : > { %v952_v48 = vsub.f32 1.0, %v951_v43  ;;  %v936_v26 = vsel %vm935_vm3, %v1227_v40, %v932_v46 }
 0x2d2   : > { %v941_v28 = vsel %vm938_vm4, %v940_v47, %v936_v26 }
 0x2d3   : > { %v953_v50 = vmul.f32 %v1229_v44, %v952_v48  ;;  %v967_v52 = vmul.f32 %v941_v28, %v919_v49 }
 0x2d5   : > { %v954_v55 = vadd.f32 %v1229_v44, %v953_v50  ;;  %v968_v57 = vadd.f32 %v967_v52, %v966_v54 }
 0x2d7   : > { %v958_v59 = vsel %vm957_vm7, %v1229_v44, %v954_v55  ;;  %1230 = vtanh.f32 %v968_v57 }
 0x2d8   : > { %v963_v60 = vsel %vm960_vm8, %v962_v58, %v958_v59 }
 0x2d9   : > { %v970_v56 = vsub.f32 1.0, %v963_v60  ;;  %v972_v63 = vmul.f32 %v963_v60, %v844_v23 }
 0x2dd   : > { %v1231_v61 = vpop.eup %1230 }
 0x2de   : > { %v971_v62 = vmul.f32 %v1231_v61, %v970_v56 }
 0x2e0   : > { %v973_v1 = vadd.f32 %v972_v63, %v971_v62 }
 0x2e2   : > { %v984_v2 = vmul.f32 %v1185_v0, %v973_v1  ;;  %987 = vst.msk [vmem:[#allocation5] sm:$0xff] %vm360_vm2, %v973_v1 }
 0x2e4   : > { %1145 = vst.msk [vmem:[%s1324_s9 + $0x18] sm:$0xff] %vm360_vm2, %v984_v2 }
 0x2e5 PF: > { %s16_s23 = sadd.s32 1, %s1254_s23   ;;  %s1583_s21 = smov %s1250_s22 }
 0x2e6   : > { %p13_p6 = scmp.ge.s32.totalorder %s16_s23, 4   ;;  %s1584_s22 = smov %s1586_s24 }
 0x2e8   :  { %15 = sbr.rel (!%p13_p6) target bundleno = 2 (0x2), region = 101 }

// kernel: nnet_vae_forward.7
= control target key start
LH: loop header
LB: loop body
LE: loop exit
PB: predicated region body
PF: predicated region fallthrough
CT: control target
= control target key end

     0   :  { %11 = vsyncpa [#allocation7], 0  ;;  %s1381_s21 = smov 0   ;;  %s1383_s22 = smov 0   ;;  %s1680_s0 = inlined_call_operand.vmem [shape: s32[8,1], index: 0, kind: input, shape index: {}]   ;;  %s1681_s1 = inlined_call_operand.vmem [shape: f32[8,8,32], index: 1, kind: input, shape index: {}]   ;;  %s1682_s2 = inlined_call_operand.vmem [shape: f32[3,32,32], index: 2, kind: input, shape index: {}]   ;;  %s1683_s3 = inlined_call_operand.hbm [shape: f32[3,32,32], index: 3, kind: input, shape index: {}]   ;;  %s1684_s4 = inlined_call_operand.vmem [shape: f32[3,1,32], index: 4, kind: input, shape index: {}]   ;;  %s1685_s5 = inlined_call_operand.vmem [shape: f32[3,1,32], index: 5, kind: input, shape index: {}]   ;;  %s1686_s6 = inlined_call_operand.vmem [shape: f32[8,8,32], index: 6, kind: output, shape index: {}]  }
   0x1   :  { %s1385_s23 = smov 0  }
   0x2 LB: > { %s1118_s24 = sadd.s32 4294967295, %s1338_s23   ;;  %s26_s25 = sadd.s32 1, %s1334_s22  ;;  %s1338_s23 = sphi %s1385_s23, %s17_s23   ;;  %s1334_s22 = sphi %s1383_s22, %s1688_s22   ;;  %s1330_s21 = sphi %s1381_s21, %s1687_s21  }
   0x3   : > { %p27_p0 = scmp.ge.s32.totalorder %s26_s25, 2  ;;  %p1120_p1 = scmp.ge.s32.totalorder %s1338_s23, 1 }
   0x4   : > { %p200_p2 = scmp.lt.s32.totalorder %s1338_s23, 3  ;;  %p1193_p4 = scmp.eq.s32.totalorder %s1118_s24, 0 }
   0x5   : > { %s1690_s25 = smov (%p27_p0, %s26_s25), 0  ;;  %s221_s28 = sshll.u32 %s1683_s3, 4  ;;  %s222_s28 = int_to_ptr.hbm [resolvable:$true] %s221_s28 }
   0x6   : > { %p201_p3 = pnand %p1120_p1, %p200_p2  ;;  %s1340_s29 = smov [#allocation6]  }
   0x7   : > { %s223_s30 = sshll.u32 %s1340_s29, 4  ;;  %s1341_s7 = smov 128   ;;  %s224_s30 = int_to_ptr.vmem [resolvable:$true] %s223_s30 }
   0x8   : > { %p1189_p5 = pneg %p201_p3  ;;  %s1342_s8 = smov 8  }
   0x9   : > { %257 = sbr.rel (%p201_p3) target bundleno = 747 (0x2eb), region = 44 }
   0xa   : > { %p1190_p6 = pnand %p1193_p4, %p1189_p5 }
   0xc   : > { %1192 = dma.hbm_to_vmem [thread:$0]  (!%p1190_p6), %s222_s28, 1536, %s224_s30, [#allocation7], %s1341_s7, %s1341_s7, %s1342_s8  }
   0xe   : > { %1325 = dma.done.wait (%p1193_p4), [#allocation7], 1536  }
   0xf   : > { %1327 = vsyncadd (%p1193_p4), [#allocation7], 4294965760  ;;  %s1406_s9 = sshll.u32 %s1330_s21, 2  ;;  %p1130_p8 = scmp.ne.s32.totalorder %s1330_s21, 0 }
  0x10   : > { %p303_p7 = scmp.lt.s32.totalorder %s1406_s9, 7 }
  0x11   : > { %323 = sbr.rel (%p1130_p8) target bundleno = 24 (0x18), region = 52 }
  0x12   : > { %s304_s10 = scalar_select %p303_p7, %s1406_s9, 7 }
  0x14   : > { %s1127_s11 = sshll.u32 %s304_s10, 3 }
  0x15   : > { %s1413_s14 = scalar_lea.vmem %s1681_s1, %s1127_s11  ;;  %s1418_s17 = scalar_lea.vmem %s1686_s6, %s1127_s11 }
  0x16   : > { %vm324_vm0 = vcmask 261120   ;;  %v1343_v0 = vmov 0.0  }
  0x17   : > { %325 = vst.msk [vmem:[#allocation5] sm:$0xff] %vm324_vm0, %v1343_v0 }
  0x18 PF: > { %v333_v1 = vld [vmem:[%s1682_s2 + $0x18] sm:$0xff]  ;;  %v1424_v2 = vld [vmem:[#allocation6 + $0x18] sm:$0xff]  ;;  %v332_v3 = vld [vmem:[%s1682_s2 + $0x10] sm:$0xff]  ;;  %v1344_v8 = vmov 0   ;;  %s741_s7 = sadd.s32 1, %s1406_s9  ;;  %vm338_vm1 = vcmask 261120   ;;  %v614_v16 = vstv %s1406_s9 }
  0x19   : > { %363 = vmatpush.msra.mxu0 %v333_v1  ;;  %510 = vmatpush.msra.mxu3 %v1424_v2  ;;  %v1430_v4 = vld [vmem:[#allocation6 + $0x10] sm:$0xff]  ;;  %v331_v5 = vld [vmem:[%s1682_s2 + $0x8] sm:$0xff]  ;;  %v1435_v6 = vld [vmem:[#allocation6 + $0x8] sm:$0xff]  ;;  %v742_v17 = vstv %s741_s7  ;;  %v1345_v24 = vmov 0.0   ;;  %s870_s20 = sadd.s32 2, %s1406_s9  ;;  %s999_s24 = sadd.s32 3, %s1406_s9 }
  0x1a   : > { %v1138_v7 = vld [vmem:[%s1682_s2 + $0x38] sm:$0xff]  ;;  %1225 = vset.pattern.permute.xlu0 %v1344_v8  ;;  %v1137_v9 = vld [vmem:[%s1682_s2 + $0x30] sm:$0xff]  ;;  %v330_v10 = vld [vmem:[%s1682_s2] sm:$0xff] }
  0x1b   : > { %364 = vmatpush.msra.mxu0 %v332_v3  ;;  %511 = vmatpush.msra.mxu3 %v1430_v4  ;;  %v1448_v11 = vld [vmem:[#allocation6] sm:$0xff]  ;;  %v326_v12 = vld [vmem:[%s1413_s14] sm:$0xff]  ;;  %v1461_v18 = vld [vmem:[#allocation6 + $0x30] sm:$0xff] }
  0x1c   : > { %406 = vmatpush.msra.mxu1 %v1138_v7  ;;  %v1454_v14 = vld [vmem:[#allocation6 + $0x38] sm:$0xff]  ;;  %v1136_v15 = vld [vmem:[%s1682_s2 + $0x28] sm:$0xff]  ;;  %v1147_v19 = vld [vmem:[%s1682_s2 + $0x58] sm:$0xff] }
  0x1d   : > { %365 = vmatpush.msra.mxu0 %v331_v5  ;;  %512 = vmatpush.msra.mxu3 %v1435_v6  ;;  %v1135_v20 = vld [vmem:[%s1682_s2 + $0x20] sm:$0xff]  ;;  %v1472_v21 = vld [vmem:[#allocation6 + $0x28] sm:$0xff]  ;;  %v1145_v27 = vld [vmem:[%s1682_s2 + $0x48] sm:$0xff] }
  0x1e   : > { %v1452_v13 = vld [vmem:[#allocation5] sm:$0xff]  ;;  %407 = vmatpush.msra.mxu1 %v1137_v9  ;;  %v1146_v23 = vld [vmem:[%s1682_s2 + $0x50] sm:$0xff]  ;;  %449 = vmatpush.msra.mxu2 %v1147_v19  ;;  %v477_v29 = vld [vmem:[#allocation6 + $0x20] sm:$0xff] }
  0x1f   : > { %366 = vmatpush.msra.mxu0 %v330_v10  ;;  %513 = vmatpush.msra.mxu3 %v1448_v11  ;;  %v1477_v22 = vld [vmem:[%s1680_s0] sm:$0xff]  ;;  %v1503_v32 = vld [vmem:[#allocation6 + $0x50] sm:$0xff]  ;;  %v1507_v33 = vld [vmem:[#allocation6 + $0x48] sm:$0xff] }
  0x20   : > { %1131 = vmatmul.msk.f32.vlgmr.msra.gmra.mxu0 %vm338_vm1, %v326_v12  ;;  %1156 = vmatmul.msk.f32.vlgmr.msra.gmra.mxu3 %vm338_vm1, %v1452_v13  ;;  %vm615_vm2 = vcmp.lt.s32.totalorder %v614_v16, %v1477_v22  ;;  %vm743_vm3 = vcmp.lt.s32.totalorder %v742_v17, %v1477_v22  ;;  %v1144_v30 = vld [vmem:[%s1682_s2 + $0x40] sm:$0xff]  ;;  %v1513_v34 = vld [vmem:[#allocation6 + $0x40] sm:$0xff]  ;;  %v328_v45 = vld [vmem:[%s1413_s14 + $0x10] sm:$0xff] }
  0x21   : > { %533 = vmatpush.msrb.mxu3 %v1454_v14  ;;  %408 = vmatpush.msra.mxu1 %v1136_v15  ;;  %v1161_v25 = vsel %vm615_vm2, 1.0, %v1345_v24  ;;  %v1167_v26 = vsel %vm743_vm3, 1.0, %v1345_v24  ;;  %v1497_v31 = vld [vmem:[#allocation6 + $0x58] sm:$0xff]  ;;  %v327_v36 = vld [vmem:[%s1413_s14 + $0x8] sm:$0xff]  ;;  %v329_v55 = vld [vmem:[%s1413_s14 + $0x18] sm:$0xff] }
  0x22   : > { %660 = vmatpush.msrb.mxu0 %v1454_v14  ;;  %v1226_v28 = vpack.i.bf16 %v1167_v26, %v1161_v25  ;;  %450 = vmatpush.msra.mxu2 %v1146_v23  ;;  %v1545_v35 = vld [vmem:[%s1684_s4] ss:$0 sm:$0xff]  ;;  %v1554_v39 = vld [vmem:[%s1684_s4 + $0x1] ss:$0 sm:$0xff]  ;;  %v1578_v49 = vld [vmem:[%s1684_s4 + $0x2] ss:$0 sm:$0xff] }
  0x23   : > { %534 = vmatpush.msrb.mxu3 %v1461_v18  ;;  %409 = vmatpush.msra.mxu1 %v1135_v20  ;;  %v1561_v40 = vld [vmem:[%s1685_s5] ss:$0 sm:$0xff]  ;;  %v1573_v48 = vld [vmem:[%s1685_s5 + $0x1] ss:$0 sm:$0xff]  ;;  %v1590_v1 = vld [vmem:[%s1685_s5 + $0x2] ss:$0 sm:$0xff] }
  0x24   : > { %1140 = vmatmul.msk.f32.vlgmr.msra.gmra.mxu1 %vm338_vm1, %v326_v12  ;;  %1227 = vperm.xlu0 %1225, %v1226_v28  }
  0x25   : > { %535 = vmatpush.msrb.mxu3 %v1472_v21  ;;  %451 = vmatpush.msra.mxu2 %v1145_v27 }
  0x26   : > { %661 = vmatpush.msrb.mxu0 %v1461_v18  ;;  %680 = vmatpush.msrb.mxu1 %v1497_v31 }
  0x27   : > { %536 = vmatpush.msrb.mxu3 %v477_v29  ;;  %452 = vmatpush.msra.mxu2 %v1144_v30 }
  0x28   : > { %1157 = vmatmul.msk.f32.vlgmr.msrb.gmra.mxu3 %vm338_vm1, %v1452_v13  ;;  %1149 = vmatmul.msk.f32.vlgmr.msra.gmra.mxu2 %vm338_vm1, %v326_v12 }
  0x29   : > { %556 = vmatpush.msra.mxu3 %v1497_v31  ;;  %681 = vmatpush.msrb.mxu1 %v1503_v32 }
  0x2a   : > { %662 = vmatpush.msrb.mxu0 %v1472_v21  ;;  %769 = vmatpush.msrb.mxu2 %v1424_v2 }
  0x2b   : > { %557 = vmatpush.msra.mxu3 %v1503_v32  ;;  %682 = vmatpush.msrb.mxu1 %v1507_v33 }
  0x2c   : > { %663 = vmatpush.msrb.mxu0 %v477_v29  ;;  %770 = vmatpush.msrb.mxu2 %v1430_v4 }
  0x2d   : > { %558 = vmatpush.msra.mxu3 %v1507_v33  ;;  %683 = vmatpush.msrb.mxu1 %v1513_v34 }
  0x2e   : > { %809 = vmatpush.msra.mxu0 %v1497_v31  ;;  %771 = vmatpush.msrb.mxu2 %v1435_v6 }
  0x2f   : > { %559 = vmatpush.msra.mxu3 %v1513_v34  ;;  %898 = vmatpush.msra.mxu1 %v1424_v2 }
  0x30   : > { %1158 = vmatmul.msk.f32.vlgmr.msra.gmra.mxu3 %vm338_vm1, %v1452_v13  ;;  %810 = vmatpush.msra.mxu0 %v1503_v32 }
  0x31   : > { %640 = vmatpush.msrb.mxu3 %v1424_v2  ;;  %772 = vmatpush.msrb.mxu2 %v1448_v11 }
  0x32   : > { %811 = vmatpush.msra.mxu0 %v1507_v33  ;;  %899 = vmatpush.msra.mxu1 %v1430_v4 }
  0x33   : > { %641 = vmatpush.msrb.mxu3 %v1430_v4  ;;  %918 = vmatpush.msra.mxu2 %v1454_v14 }
  0x34   : > { %812 = vmatpush.msra.mxu0 %v1513_v34  ;;  %900 = vmatpush.msra.mxu1 %v1435_v6 }
  0x35   : > { %642 = vmatpush.msrb.mxu3 %v1435_v6  ;;  %919 = vmatpush.msra.mxu2 %v1461_v18 }
  0x36   : > { %901 = vmatpush.msra.mxu1 %v1448_v11  ;;  %1132 = vmatmul.msk.f32.gmra.mxu0 %vm338_vm1, %v327_v36 }
  0x37   : > { %643 = vmatpush.msrb.mxu3 %v1448_v11  ;;  %920 = vmatpush.msra.mxu2 %v1472_v21 }
  0x38   : > { %1141 = vmatmul.msk.f32.gmra.mxu1 %vm338_vm1, %v327_v36  ;;  %1150 = vmatmul.msk.f32.gmra.mxu2 %vm338_vm1, %v327_v36 }
  0x39   : > { %789 = vmatpush.msra.mxu3 %v1454_v14  ;;  %921 = vmatpush.msra.mxu2 %v477_v29 }
  0x3b   : > { %790 = vmatpush.msra.mxu3 %v1461_v18 }
  0x3d   : > { %791 = vmatpush.msra.mxu3 %v1472_v21 }
  0x3e   : > { %1133 = vmatmul.msk.f32.gmra.mxu0 %vm338_vm1, %v328_v45 }
  0x3f   : > { %792 = vmatpush.msra.mxu3 %v477_v29 }
  0x40   : > { %1142 = vmatmul.msk.f32.gmra.mxu1 %vm338_vm1, %v328_v45  ;;  %1151 = vmatmul.msk.f32.gmra.mxu2 %vm338_vm1, %v328_v45 }
  0x46   : > { %1134 = vmatmul.msk.f32.gmra.mxu0 %vm338_vm1, %v329_v55 }
  0x48   : > { %1143 = vmatmul.msk.f32.gmra.mxu1 %vm338_vm1, %v329_v55  ;;  %1152 = vmatmul.msk.f32.gmra.mxu2 %vm338_vm1, %v329_v55 }
  0x96   : > { %v1593_v28 = vpop.permute.xlu0 %1227 }
  0x9d   : > { %v368_v37 = vpop.f32.mrf.mxu0 }
  0x9e   : > { %v369_v38 = vadd.f32 %v1545_v35, %v368_v37 }
  0xa0   : > { %380 = vst.msk [vmem:[#allocation2] sm:$0xff] %vm338_vm1, %v369_v38  ;;  %v1229_v38 = vunpack.i.l.bf16 %v1593_v28 }
  0xa1   : > { %v411_v41 = vpop.f32.mrf.mxu1 }
  0xa2   : > { %v412_v42 = vadd.f32 %v1554_v39, %v411_v41 }
  0xa3   : > { %v515_v43 = vpop.f32.mrf.mxu3 }
  0xa4   : > { %423 = vst.msk [vmem:[#allocation3] sm:$0xff] %vm338_vm1, %v412_v42  ;;  %v516_v44 = vadd.f32 %v1561_v40, %v515_v43 }
  0xa7   : > { %v564_v46 = vld [vmem:[#allocation2] sm:$0xff] }
  0xa8   : > { %v565_v47 = vadd.f32 %v564_v46, %v516_v44 }
  0xaa   : > { %v1159_v50 = vmul.f32 -1.442695, %v565_v47 }
  0xab   : > { %v538_v51 = vpop.f32.mrf.mxu3  ;;  %v585_v52 = vld [vmem:[#allocation3] sm:$0xff]  ;;  %v454_v54 = vpop.f32.mrf.mxu2 }
  0xac   : > { %1242 = vpow2.f32 %v1159_v50  ;;  %v539_v53 = vadd.f32 %v1573_v48, %v538_v51  ;;  %v455_v56 = vadd.f32 %v1578_v49, %v454_v54 }
  0xae   : > { %v586_v57 = vadd.f32 %v585_v52, %v539_v53  ;;  %466 = vst.msk [vmem:[#allocation4] sm:$0xff] %vm338_vm1, %v455_v56 }
  0xb0   : > { %v1160_v58 = vmul.f32 -1.442695, %v586_v57 }
  0xb2   : > { %v1243_v59 = vpop.eup %1242  ;;  %1244 = vpow2.f32 %v1160_v58 }
  0xb3   : > { %v569_v60 = vadd.f32 1.0, %v1243_v59  ;;  %v561_v3 = vpop.f32.mrf.mxu3 }
  0xb4   : > { %v562_v9 = vadd.f32 %v1590_v1, %v561_v3 }
  0xb5   : > { %1246 = vrcp.f32 %v569_v60  ;;  %v581_v4 = vand.u32 2147483648, %v569_v60  ;;  %v579_v6 = vand.u32 2147483647, %v569_v60  ;;  %vm575_vm5 = vweird.f32 %v569_v60  ;;  %v606_v16 = vld [vmem:[#allocation4] sm:$0xff]  ;;  %v414_v43 = vpop.f32.mrf.mxu1 }
  0xb6   : > { %v415_v45 = vadd.f32 %v1554_v39, %v414_v43 }
  0xb7   : > { %v582_v11 = vor.u32 1.1754944e-38, %v581_v4  ;;  %vm580_vm7 = vcmp.eq.f32.partialorder %v579_v6, 8.507059e+37  ;;  %v871_v4 = vstv %s870_s20 }
  0xb8   : > { %v1245_v61 = vpop.eup %1244  ;;  %424 = vst.msk [vmem:[#allocation3 + $0x8] sm:$0xff] %vm338_vm1, %v415_v45  ;;  %vm872_vm12 = vcmp.lt.s32.totalorder %v871_v4, %v1477_v22 }
  0xb9   : > { %v590_v62 = vadd.f32 1.0, %v1245_v61 }
  0xbb   : > { %v1247_v63 = vpop.eup %1246  ;;  %1248 = vrcp.f32 %v590_v62  ;;  %v602_v18 = vand.u32 2147483648, %v590_v62  ;;  %v600_v20 = vand.u32 2147483647, %v590_v62  ;;  %vm596_vm9 = vweird.f32 %v590_v62  ;;  %v457_v52 = vpop.f32.mrf.mxu2 }
  0xbc   : > { %v571_v0 = vmul.f32 %v1247_v63, %v569_v60  ;;  %vm576_vm4 = vweird.f32 %v1247_v63  ;;  %v458_v55 = vadd.f32 %v1578_v49, %v457_v52 }
  0xbd   : > { %vm577_vm6 = vmor %vm575_vm5, %vm576_vm4  ;;  %v603_v25 = vor.u32 1.1754944e-38, %v602_v18  ;;  %vm601_vm11 = vcmp.eq.f32.partialorder %v600_v20, 8.507059e+37 }
  0xbe   : > { %v572_v2 = vsub.f32 1.0, %v571_v0  ;;  %467 = vst.msk [vmem:[#allocation4 + $0x8] sm:$0xff] %vm338_vm1, %v458_v55 }
  0xbf   : > { %v711_v54 = vld [vmem:[#allocation3 + $0x8] sm:$0xff] }
  0xc0   : > { %v573_v5 = vmul.f32 %v1247_v63, %v572_v2 }
  0xc1   : > { %v1249_v7 = vpop.eup %1248 }
  0xc2   : > { %v592_v8 = vmul.f32 %v1249_v7, %v590_v62  ;;  %v574_v10 = vadd.f32 %v1247_v63, %v573_v5  ;;  %vm597_vm8 = vweird.f32 %v1249_v7  ;;  %v1000_v5 = vstv %s999_s24 }
  0xc3   : > { %vm598_vm10 = vmor %vm596_vm9, %vm597_vm8  ;;  %v460_v6 = vpop.f32.mrf.mxu2  ;;  %vm1001_vm13 = vcmp.lt.s32.totalorder %v1000_v5, %v1477_v22 }
  0xc4   : > { %v593_v12 = vsub.f32 1.0, %v592_v8  ;;  %v578_v14 = vsel %vm577_vm6, %v1247_v63, %v574_v10  ;;  %v1181_v8 = vsel %vm1001_vm13, 1.0, %v1345_v24 }
  0xc5   : > { %v583_v15 = vsel %vm580_vm7, %v582_v11, %v578_v14 }
  0xc6   : > { %v594_v17 = vmul.f32 %v1249_v7, %v593_v12  ;;  %v607_v19 = vmul.f32 %v583_v15, %v562_v9  ;;  %v461_v9 = vadd.f32 %v1578_v49, %v460_v6 }
  0xc8   : > { %v595_v21 = vadd.f32 %v1249_v7, %v594_v17  ;;  %v608_v23 = vadd.f32 %v607_v19, %v606_v16  ;;  %468 = vst.msk [vmem:[#allocation4 + $0x10] sm:$0xff] %vm338_vm1, %v461_v9 }
  0xca   : > { %v599_v26 = vsel %vm598_vm10, %v1249_v7, %v595_v21  ;;  %1250 = vtanh.f32 %v608_v23  ;;  %v1174_v7 = vsel %vm872_vm12, 1.0, %v1345_v24 }
  0xcb   : > { %v604_v27 = vsel %vm601_vm11, %v603_v25, %v599_v26  ;;  %v1231_v11 = vpack.i.bf16 %v1181_v8, %v1174_v7  ;;  %v463_v17 = vpop.f32.mrf.mxu2 }
  0xcc   : > { %v610_v29 = vsub.f32 1.0, %v604_v27  ;;  %v612_v37 = vmul.f32 %v604_v27, %v1452_v13  ;;  %v371_v13 = vpop.f32.mrf.mxu0  ;;  %v464_v19 = vadd.f32 %v1578_v49, %v463_v17 }
  0xcd   : > { %v372_v44 = vadd.f32 %v1545_v35, %v371_v13  ;;  %1232 = vperm.xlu0 %1225, %v1231_v11  }
  0xce   : > { %469 = vst.msk [vmem:[#allocation4 + $0x18] sm:$0xff] %vm338_vm1, %v464_v19 }
  0xcf   : > { %381 = vst.msk [vmem:[#allocation2 + $0x8] sm:$0xff] %vm338_vm1, %v372_v44  ;;  %v862_v17 = vld [vmem:[#allocation4 + $0x10] sm:$0xff] }
  0xd0   : > { %v1251_v30 = vpop.eup %1250 }
  0xd1   : > { %v611_v36 = vmul.f32 %v1251_v30, %v610_v29 }
  0xd3   : > { %v1597_v41 = vadd.f32 %v612_v37, %v611_v36  ;;  %v733_v36 = vld [vmem:[#allocation4 + $0x8] sm:$0xff] }
  0xd4   : > { %v374_v46 = vpop.f32.mrf.mxu0 }
  0xd5   : > { %v623_v42 = vmul.f32 %v1229_v38, %v1597_v41  ;;  %1162 = vmatmul.msk.f32.vlgmr.msrb.gmra.mxu3 %vm338_vm1, %v1597_v41  ;;  %1163 = vmatmul.msk.f32.vlgmr.msrb.gmra.mxu0 %vm338_vm1, %v1597_v41  ;;  %v375_v47 = vadd.f32 %v1545_v35, %v374_v46 }
  0xd6   : > { %1164 = vmatmul.msk.f32.vlgmr.msrb.gmra.mxu1 %vm338_vm1, %v1597_v41  ;;  %938 = vmatpush.msrb.mxu3 %v1497_v31  ;;  %v417_v31 = vpop.f32.mrf.mxu1  ;;  %v689_v59 = vld [vmem:[#allocation2 + $0x8] sm:$0xff] }
  0xd7   : > { %624 = vst.msk [vmem:[%s1418_s17] sm:$0xff] %vm338_vm1, %v623_v42 }
  0xd8   : > { %939 = vmatpush.msrb.mxu3 %v1503_v32  ;;  %v418_v32 = vadd.f32 %v1554_v39, %v417_v31  ;;  %382 = vst.msk [vmem:[#allocation2 + $0x10] sm:$0xff] %vm338_vm1, %v375_v47  ;;  %v1230_v31 = vunpack.i.h.bf16 %v1593_v28 }
  0xda   : > { %940 = vmatpush.msrb.mxu3 %v1507_v33  ;;  %425 = vst.msk [vmem:[#allocation3 + $0x10] sm:$0xff] %vm338_vm1, %v418_v32 }
  0xdc   : > { %941 = vmatpush.msrb.mxu3 %v1513_v34  ;;  %v377_v33 = vpop.f32.mrf.mxu0 }
  0xdd   : > { %v378_v50 = vadd.f32 %v1545_v35, %v377_v33 }
  0xde   : > { %v420_v34 = vpop.f32.mrf.mxu1 }
  0xdf   : > { %v421_v51 = vadd.f32 %v1554_v39, %v420_v34  ;;  %383 = vst.msk [vmem:[#allocation2 + $0x18] sm:$0xff] %vm338_vm1, %v378_v50  ;;  %v818_v52 = vld [vmem:[#allocation2 + $0x10] sm:$0xff] }
  0xe1   : > { %426 = vst.msk [vmem:[#allocation3 + $0x18] sm:$0xff] %vm338_vm1, %v421_v51 }
 0x152   : > { %v665_v53 = vpop.f32.mrf.mxu0 }
 0x153   : > { %v666_v56 = vadd.f32 %v1573_v48, %v665_v53  ;;  %v685_v24 = vpop.f32.mrf.mxu1  ;;  %v840_v53 = vld [vmem:[#allocation3 + $0x10] sm:$0xff] }
 0x154   : > { %v686_v26 = vadd.f32 %v1590_v1, %v685_v24  ;;  %v1655_v24 = vpop.permute.xlu0 %1232 }
 0x155   : > { %v712_v57 = vadd.f32 %v711_v54, %v666_v56 }
 0x157   : > { %v1166_v58 = vmul.f32 -1.442695, %v712_v57 }
 0x158   : > { %v645_v35 = vpop.f32.mrf.mxu3 }
 0x159   : > { %1252 = vpow2.f32 %v1166_v58  ;;  %v646_v39 = vadd.f32 %v1561_v40, %v645_v35 }
 0x15b   : > { %v690_v60 = vadd.f32 %v689_v59, %v646_v39 }
 0x15d   : > { %v1165_v61 = vmul.f32 -1.442695, %v690_v60 }
 0x15f   : > { %v1253_v62 = vpop.eup %1252  ;;  %1254 = vpow2.f32 %v1165_v61 }
 0x160   : > { %v716_v63 = vadd.f32 1.0, %v1253_v62 }
 0x162   : > { %1256 = vrcp.f32 %v716_v63  ;;  %v728_v49 = vand.u32 2147483648, %v716_v63  ;;  %vm722_vm4 = vweird.f32 %v716_v63  ;;  %v726_v38 = vand.u32 2147483647, %v716_v63 }
 0x164   : > { %v729_v43 = vor.u32 1.1754944e-38, %v728_v49  ;;  %vm727_vm6 = vcmp.eq.f32.partialorder %v726_v38, 8.507059e+37  ;;  %v947_v38 = vld [vmem:[#allocation2 + $0x18] sm:$0xff] }
 0x165   : > { %v1255_v0 = vpop.eup %1254 }
 0x166   : > { %v694_v2 = vadd.f32 1.0, %v1255_v0 }
 0x168   : > { %1258 = vrcp.f32 %v694_v2  ;;  %v1257_v3 = vpop.eup %1256  ;;  %v706_v18 = vand.u32 2147483648, %v694_v2  ;;  %v704_v20 = vand.u32 2147483647, %v694_v2  ;;  %vm700_vm15 = vweird.f32 %v694_v2 }
 0x169   : > { %v718_v10 = vmul.f32 %v1257_v3, %v716_v63  ;;  %vm723_vm3 = vweird.f32 %v1257_v3 }
 0x16a   : > { %v707_v25 = vor.u32 1.1754944e-38, %v706_v18  ;;  %vm705_vm2 = vcmp.eq.f32.partialorder %v704_v20, 8.507059e+37  ;;  %vm724_vm5 = vmor %vm722_vm4, %vm723_vm3 }
 0x16b   : > { %v719_v15 = vsub.f32 1.0, %v718_v10 }
 0x16d   : > { %v720_v21 = vmul.f32 %v1257_v3, %v719_v15 }
 0x16e   : > { %v1259_v12 = vpop.eup %1258 }
 0x16f   : > { %v696_v14 = vmul.f32 %v1259_v12, %v694_v2  ;;  %vm701_vm14 = vweird.f32 %v1259_v12  ;;  %v721_v30 = vadd.f32 %v1257_v3, %v720_v21 }
 0x170   : > { %vm702_vm0 = vmor %vm700_vm15, %vm701_vm14 }
 0x171   : > { %v697_v16 = vsub.f32 1.0, %v696_v14  ;;  %v725_v13 = vsel %vm724_vm5, %v1257_v3, %v721_v30 }
 0x172   : > { %v730_v44 = vsel %vm727_vm6, %v729_v43, %v725_v13 }
 0x173   : > { %v698_v22 = vmul.f32 %v1259_v12, %v697_v16  ;;  %v737_v45 = vsub.f32 1.0, %v730_v44  ;;  %v739_v32 = vmul.f32 %v730_v44, %v1597_v41 }
 0x175   : > { %v699_v23 = vadd.f32 %v1259_v12, %v698_v22 }
 0x177   : > { %v703_v27 = vsel %vm702_vm0, %v1259_v12, %v699_v23 }
 0x178   : > { %v708_v29 = vsel %vm705_vm2, %v707_v25, %v703_v27 }
 0x179   : > { %v734_v37 = vmul.f32 %v708_v29, %v686_v26  ;;  %v1234_v26 = vunpack.i.l.bf16 %v1655_v24 }
 0x17b   : > { %v735_v42 = vadd.f32 %v734_v37, %v733_v36 }
 0x17d   : > { %1260 = vtanh.f32 %v735_v42 }
 0x183   : > { %v1261_v46 = vpop.eup %1260 }
 0x184   : > { %v738_v47 = vmul.f32 %v1261_v46, %v737_v45  ;;  %v969_v45 = vld [vmem:[#allocation3 + $0x18] sm:$0xff] }
 0x186   : > { %v1641_v33 = vadd.f32 %v739_v32, %v738_v47 }
 0x188   : > { %1169 = vmatmul.msk.f32.vlgmr.msrb.gmra.mxu2 %vm338_vm1, %v1641_v33  ;;  %1170 = vmatmul.msk.f32.vlgmr.msra.gmra.mxu3 %vm338_vm1, %v1641_v33  ;;  %v751_v34 = vmul.f32 %v1230_v31, %v1641_v33 }
 0x189   : > { %1171 = vmatmul.msk.f32.vlgmr.msra.gmra.mxu0 %vm338_vm1, %v1641_v33 }
 0x18a   : > { %1168 = vst.msk [vmem:[%s1418_s17 + $0x8] sm:$0xff] %vm338_vm1, %v751_v34 }
 0x206   : > { %v814_v6 = vpop.f32.mrf.mxu0 }
 0x207   : > { %v815_v10 = vadd.f32 %v1590_v1, %v814_v6 }
 0x20b   : > { %v774_v50 = vpop.f32.mrf.mxu2  ;;  %v794_v28 = vpop.f32.mrf.mxu3 }
 0x20c   : > { %v775_v51 = vadd.f32 %v1561_v40, %v774_v50  ;;  %v795_v41 = vadd.f32 %v1573_v48, %v794_v28 }
 0x20e   : > { %v819_v54 = vadd.f32 %v818_v52, %v775_v51  ;;  %v841_v55 = vadd.f32 %v840_v53, %v795_v41 }
 0x210   : > { %v1172_v56 = vmul.f32 -1.442695, %v819_v54  ;;  %v1173_v57 = vmul.f32 -1.442695, %v841_v55 }
 0x212   : > { %1262 = vpow2.f32 %v1172_v56 }
 0x213   : > { %1264 = vpow2.f32 %v1173_v57 }
 0x218   : > { %v1263_v58 = vpop.eup %1262 }
 0x219   : > { %v1265_v35 = vpop.eup %1264  ;;  %v823_v39 = vadd.f32 1.0, %v1263_v58 }
 0x21a   : > { %v845_v59 = vadd.f32 1.0, %v1265_v35 }
 0x21b   : > { %1266 = vrcp.f32 %v823_v39  ;;  %v835_v2 = vand.u32 2147483648, %v823_v39  ;;  %v833_v5 = vand.u32 2147483647, %v823_v39  ;;  %vm829_vm8 = vweird.f32 %v823_v39 }
 0x21c   : > { %1268 = vrcp.f32 %v845_v59  ;;  %v857_v16 = vand.u32 2147483648, %v845_v59  ;;  %vm851_vm12 = vweird.f32 %v845_v59  ;;  %v855_v18 = vand.u32 2147483647, %v845_v59 }
 0x21d   : > { %v836_v9 = vor.u32 1.1754944e-38, %v835_v2  ;;  %vm834_vm10 = vcmp.eq.f32.partialorder %v833_v5, 8.507059e+37 }
 0x21e   : > { %v858_v20 = vor.u32 1.1754944e-38, %v857_v16  ;;  %vm856_vm14 = vcmp.eq.f32.partialorder %v855_v18, 8.507059e+37 }
 0x221   : > { %v1267_v60 = vpop.eup %1266 }
 0x222   : > { %v1269_v61 = vpop.eup %1268  ;;  %v825_v62 = vmul.f32 %v1267_v60, %v823_v39  ;;  %vm830_vm7 = vweird.f32 %v1267_v60 }
 0x223   : > { %v847_v63 = vmul.f32 %v1269_v61, %v845_v59  ;;  %vm831_vm9 = vmor %vm829_vm8, %vm830_vm7  ;;  %vm852_vm11 = vweird.f32 %v1269_v61 }
 0x224   : > { %v826_v0 = vsub.f32 1.0, %v825_v62  ;;  %vm853_vm13 = vmor %vm851_vm12, %vm852_vm11 }
 0x225   : > { %v848_v3 = vsub.f32 1.0, %v847_v63  ;;  %v991_v63 = vld [vmem:[#allocation4 + $0x18] sm:$0xff] }
 0x226   : > { %v827_v4 = vmul.f32 %v1267_v60, %v826_v0 }
 0x227   : > { %v849_v7 = vmul.f32 %v1269_v61, %v848_v3 }
 0x228   : > { %v828_v8 = vadd.f32 %v1267_v60, %v827_v4 }
 0x229   : > { %v850_v14 = vadd.f32 %v1269_v61, %v849_v7 }
 0x22a   : > { %v832_v11 = vsel %vm831_vm9, %v1267_v60, %v828_v8 }
 0x22b   : > { %v837_v12 = vsel %vm834_vm10, %v836_v9, %v832_v11  ;;  %v854_v22 = vsel %vm853_vm13, %v1269_v61, %v850_v14  ;;  %v1235_v9 = vunpack.i.h.bf16 %v1655_v24 }
 0x22c   : > { %v863_v15 = vmul.f32 %v837_v12, %v815_v10  ;;  %v859_v21 = vsel %vm856_vm14, %v858_v20, %v854_v22 }
 0x22d   : > { %v866_v23 = vsub.f32 1.0, %v859_v21  ;;  %v868_v29 = vmul.f32 %v859_v21, %v1641_v33 }
 0x22e   : > { %v864_v19 = vadd.f32 %v863_v15, %v862_v17 }
 0x230   : > { %1270 = vtanh.f32 %v864_v19 }
 0x236   : > { %v1271_v25 = vpop.eup %1270 }
 0x237   : > { %v867_v27 = vmul.f32 %v1271_v25, %v866_v23 }
 0x239   : > { %v869_v30 = vadd.f32 %v868_v29, %v867_v27 }
 0x23b   : > { %v880_v36 = vmul.f32 %v1234_v26, %v869_v30  ;;  %1176 = vmatmul.msk.f32.vlgmr.msra.gmra.mxu1 %vm338_vm1, %v869_v30  ;;  %1177 = vmatmul.msk.f32.vlgmr.msra.gmra.mxu2 %vm338_vm1, %v869_v30 }
 0x23c   : > { %1178 = vmatmul.msk.f32.vlgmr.msrb.gmra.mxu3 %vm338_vm1, %v869_v30 }
 0x23d   : > { %1175 = vst.msk [vmem:[%s1418_s17 + $0x10] sm:$0xff] %vm338_vm1, %v880_v36 }
 0x2b8   : > { %v903_v49 = vpop.f32.mrf.mxu1 }
 0x2b9   : > { %v904_v37 = vadd.f32 %v1561_v40, %v903_v49 }
 0x2bb   : > { %v948_v42 = vadd.f32 %v947_v38, %v904_v37 }
 0x2bd   : > { %v1179_v13 = vmul.f32 -1.442695, %v948_v42 }
 0x2be   : > { %v923_v43 = vpop.f32.mrf.mxu2 }
 0x2bf   : > { %1272 = vpow2.f32 %v1179_v13  ;;  %v924_v44 = vadd.f32 %v1573_v48, %v923_v43  ;;  %v943_v54 = vpop.f32.mrf.mxu3 }
 0x2c0   : > { %v944_v58 = vadd.f32 %v1590_v1, %v943_v54 }
 0x2c1   : > { %v970_v46 = vadd.f32 %v969_v45, %v924_v44 }
 0x2c3   : > { %v1180_v31 = vmul.f32 -1.442695, %v970_v46 }
 0x2c5   : > { %v1273_v47 = vpop.eup %1272  ;;  %1274 = vpow2.f32 %v1180_v31 }
 0x2c6   : > { %v952_v32 = vadd.f32 1.0, %v1273_v47 }
 0x2c8   : > { %1276 = vrcp.f32 %v952_v32  ;;  %v964_v51 = vand.u32 2147483648, %v952_v32  ;;  %v962_v52 = vand.u32 2147483647, %v952_v32  ;;  %vm958_vm0 = vweird.f32 %v952_v32 }
 0x2ca   : > { %v965_v56 = vor.u32 1.1754944e-38, %v964_v51  ;;  %vm963_vm3 = vcmp.eq.f32.partialorder %v962_v52, 8.507059e+37 }
 0x2cb   : > { %v1275_v33 = vpop.eup %1274 }
 0x2cc   : > { %v974_v34 = vadd.f32 1.0, %v1275_v33 }
 0x2ce   : > { %v1277_v50 = vpop.eup %1276  ;;  %1278 = vrcp.f32 %v974_v34  ;;  %v986_v60 = vand.u32 2147483648, %v974_v34  ;;  %v984_v62 = vand.u32 2147483647, %v974_v34  ;;  %vm980_vm5 = vweird.f32 %v974_v34 }
 0x2cf   : > { %v954_v28 = vmul.f32 %v1277_v50, %v952_v32  ;;  %vm959_vm15 = vweird.f32 %v1277_v50 }
 0x2d0   : > { %vm960_vm2 = vmor %vm958_vm0, %vm959_vm15  ;;  %v987_v3 = vor.u32 1.1754944e-38, %v986_v60  ;;  %vm985_vm7 = vcmp.eq.f32.partialorder %v984_v62, 8.507059e+37 }
 0x2d1   : > { %v955_v40 = vsub.f32 1.0, %v954_v28 }
 0x2d3   : > { %v956_v41 = vmul.f32 %v1277_v50, %v955_v40 }
 0x2d4   : > { %v1279_v53 = vpop.eup %1278 }
 0x2d5   : > { %v976_v48 = vmul.f32 %v1279_v53, %v974_v34  ;;  %v957_v55 = vadd.f32 %v1277_v50, %v956_v41  ;;  %vm981_vm4 = vweird.f32 %v1279_v53 }
 0x2d6   : > { %vm982_vm6 = vmor %vm980_vm5, %vm981_vm4 }
 0x2d7   : > { %v977_v57 = vsub.f32 1.0, %v976_v48  ;;  %v961_v35 = vsel %vm960_vm2, %v1277_v50, %v957_v55 }
 0x2d8   : > { %v966_v39 = vsel %vm963_vm3, %v965_v56, %v961_v35 }
 0x2d9   : > { %v978_v59 = vmul.f32 %v1279_v53, %v977_v57  ;;  %v992_v61 = vmul.f32 %v966_v39, %v944_v58 }
 0x2db   : > { %v979_v0 = vadd.f32 %v1279_v53, %v978_v59  ;;  %v993_v2 = vadd.f32 %v992_v61, %v991_v63 }
 0x2dd   : > { %v983_v4 = vsel %vm982_vm6, %v1279_v53, %v979_v0  ;;  %1280 = vtanh.f32 %v993_v2 }
 0x2de   : > { %v988_v5 = vsel %vm985_vm7, %v987_v3, %v983_v4 }
 0x2df   : > { %v995_v1 = vsub.f32 1.0, %v988_v5  ;;  %v997_v8 = vmul.f32 %v988_v5, %v869_v30 }
 0x2e3   : > { %v1281_v6 = vpop.eup %1280 }
 0x2e4   : > { %v996_v7 = vmul.f32 %v1281_v6, %v995_v1 }
 0x2e6   : > { %v998_v10 = vadd.f32 %v997_v8, %v996_v7 }
 0x2e8   : > { %v1009_v11 = vmul.f32 %v1235_v9, %v998_v10  ;;  %1012 = vst.msk [vmem:[#allocation5] sm:$0xff] %vm338_vm1, %v998_v10 }
 0x2ea   : > { %1182 = vst.msk [vmem:[%s1418_s17 + $0x18] sm:$0xff] %vm338_vm1, %v1009_v11 }
 0x2eb PF: > { %s17_s23 = sadd.s32 1, %s1338_s23   ;;  %s1687_s21 = smov %s1334_s22 }
 0x2ec   : > { %p14_p9 = scmp.ge.s32.totalorder %s17_s23, 4   ;;  %s1688_s22 = smov %s1690_s25 }
 0x2ee   :  { %16 = sbr.rel (!%p14_p9) target bundleno = 2 (0x2), region = 106 }
 0x2f3   :  { %1041 = vsyncpa [#allocation7], 1 }
 0x2f4   :  { %1043 = vsyncpa [#allocation7 + $0x1], 1 }

// kernel: nnet_vae_forward.10
= control target key start
LH: loop header
LB: loop body
LE: loop exit
PB: predicated region body
PF: predicated region fallthrough
CT: control target
= control target key end

     0   :  { %s1308_s21 = smov 0   ;;  %s1310_s22 = smov 0   ;;  %s1635_s0 = inlined_call_operand.vmem [shape: s32[8,1], index: 0, kind: input, shape index: {}]   ;;  %s1636_s1 = inlined_call_operand.vmem [shape: f32[8,8,32], index: 1, kind: input, shape index: {}]   ;;  %s1637_s2 = inlined_call_operand.vmem [shape: f32[3,32,32], index: 2, kind: input, shape index: {}]   ;;  %s1638_s3 = inlined_call_operand.vmem [shape: f32[3,32,32], index: 3, kind: input, shape index: {}]   ;;  %s1639_s4 = inlined_call_operand.vmem [shape: f32[3,1,32], index: 4, kind: input, shape index: {}]   ;;  %s1640_s5 = inlined_call_operand.vmem [shape: f32[3,1,32], index: 5, kind: input, shape index: {}]   ;;  %s1641_s6 = inlined_call_operand.vmem [shape: f32[8,8,32], index: 6, kind: output, shape index: {}]  }
   0x1   :  { %s1312_s23 = smov 0  }
   0x2 LB: > { %s25_s24 = sadd.s32 1, %s1264_s22  ;;  %p1094_p0 = scmp.ge.s32.totalorder %s1268_s23, 1  ;;  %s1268_s23 = sphi %s1312_s23, %s16_s23   ;;  %s1264_s22 = sphi %s1310_s22, %s1643_s22   ;;  %s1260_s21 = sphi %s1308_s21, %s1642_s21  }
   0x3   : > { %p26_p1 = scmp.ge.s32.totalorder %s25_s24, 2  ;;  %p241_p2 = scmp.lt.s32.totalorder %s1268_s23, 3 }
   0x5   : > { %s1645_s24 = smov (%p26_p1, %s25_s24), 0  ;;  %p242_p3 = pnand %p1094_p0, %p241_p2 }
   0x6   : > { %s1326_s25 = sshll.u32 (!%p242_p3), %s1260_s21, 2  ;;  %p1099_p5 = scmp.ne.s32.totalorder (!%p242_p3), %s1260_s21, 0 }
   0x7   : > { %245 = sbr.rel (%p242_p3) target bundleno = 743 (0x2e7), region = 44  ;;  %p286_p4 = scmp.lt.s32.totalorder (!%p242_p3), %s1326_s25, 7 }
   0xc   : > { %s287_s26 = scalar_select %p286_p4, %s1326_s25, 7 }
   0xd   : > { %306 = sbr.rel (%p1099_p5) target bundleno = 20 (0x14), region = 48 }
   0xe   : > { %s1096_s27 = sshll.u32 %s287_s26, 3 }
   0xf   : > { %s1333_s30 = scalar_lea.vmem %s1636_s1, %s1096_s27  ;;  %s1338_s9 = scalar_lea.vmem %s1641_s6, %s1096_s27 }
  0x12   : > { %vm307_vm0 = vcmask 261120   ;;  %v1270_v0 = vmov 0.0  }
  0x13   : > { %308 = vst.msk [vmem:[#allocation5] sm:$0xff] %vm307_vm0, %v1270_v0 }
  0x14 PF: > { %v316_v1 = vld [vmem:[%s1637_s2 + $0x18] sm:$0xff]  ;;  %v315_v3 = vld [vmem:[%s1637_s2 + $0x10] sm:$0xff]  ;;  %v314_v5 = vld [vmem:[%s1637_s2 + $0x8] sm:$0xff]  ;;  %v1271_v8 = vmov 0   ;;  %s724_s7 = sadd.s32 1, %s1326_s25  ;;  %vm321_vm1 = vcmask 261120   ;;  %v597_v16 = vstv %s1326_s25 }
  0x15   : > { %v1346_v2 = vld [vmem:[%s1638_s3 + $0x18] sm:$0xff]  ;;  %346 = vmatpush.msra.mxu0 %v316_v1  ;;  %v1355_v4 = vld [vmem:[%s1638_s3 + $0x10] sm:$0xff]  ;;  %v1363_v6 = vld [vmem:[%s1638_s3 + $0x8] sm:$0xff]  ;;  %1189 = vset.pattern.permute.xlu0 %v1271_v8  ;;  %v725_v17 = vstv %s724_s7  ;;  %v1272_v24 = vmov 0.0   ;;  %s853_s18 = sadd.s32 2, %s1326_s25  ;;  %s982_s19 = sadd.s32 3, %s1326_s25 }
  0x16   : > { %493 = vmatpush.msra.mxu3 %v1346_v2  ;;  %v1107_v7 = vld [vmem:[%s1637_s2 + $0x38] sm:$0xff]  ;;  %v1106_v9 = vld [vmem:[%s1637_s2 + $0x30] sm:$0xff]  ;;  %v313_v10 = vld [vmem:[%s1637_s2] sm:$0xff] }
  0x17   : > { %347 = vmatpush.msra.mxu0 %v315_v3  ;;  %389 = vmatpush.msra.mxu1 %v1107_v7  ;;  %v1379_v11 = vld [vmem:[%s1638_s3] sm:$0xff]  ;;  %v1388_v14 = vld [vmem:[%s1638_s3 + $0x38] sm:$0xff]  ;;  %v1105_v15 = vld [vmem:[%s1637_s2 + $0x28] sm:$0xff] }
  0x18   : > { %494 = vmatpush.msra.mxu3 %v1355_v4  ;;  %v309_v12 = vld [vmem:[%s1333_s30] sm:$0xff]  ;;  %v1398_v18 = vld [vmem:[%s1638_s3 + $0x30] sm:$0xff]  ;;  %v1116_v19 = vld [vmem:[%s1637_s2 + $0x58] sm:$0xff] }
  0x19   : > { %348 = vmatpush.msra.mxu0 %v314_v5  ;;  %390 = vmatpush.msra.mxu1 %v1106_v9  ;;  %v1104_v20 = vld [vmem:[%s1637_s2 + $0x20] sm:$0xff]  ;;  %v1412_v21 = vld [vmem:[%s1638_s3 + $0x28] sm:$0xff]  ;;  %v1115_v23 = vld [vmem:[%s1637_s2 + $0x50] sm:$0xff] }
  0x1a   : > { %495 = vmatpush.msra.mxu3 %v1363_v6  ;;  %v1383_v13 = vld [vmem:[#allocation5] sm:$0xff]  ;;  %432 = vmatpush.msra.mxu2 %v1116_v19  ;;  %v1114_v27 = vld [vmem:[%s1637_s2 + $0x48] sm:$0xff]  ;;  %v1443_v31 = vld [vmem:[%s1638_s3 + $0x58] sm:$0xff] }
  0x1b   : > { %349 = vmatpush.msra.mxu0 %v313_v10  ;;  %v1417_v22 = vld [vmem:[%s1635_s0] sm:$0xff]  ;;  %391 = vmatpush.msra.mxu1 %v1105_v15  ;;  %v1452_v32 = vld [vmem:[%s1638_s3 + $0x50] sm:$0xff]  ;;  %v1459_v33 = vld [vmem:[%s1638_s3 + $0x48] sm:$0xff] }
  0x1c   : > { %496 = vmatpush.msra.mxu3 %v1379_v11  ;;  %1100 = vmatmul.msk.f32.vlgmr.msra.gmra.mxu0 %vm321_vm1, %v309_v12  ;;  %vm598_vm2 = vcmp.lt.s32.totalorder %v597_v16, %v1417_v22  ;;  %vm726_vm3 = vcmp.lt.s32.totalorder %v725_v17, %v1417_v22  ;;  %v1123_v29 = vld [vmem:[%s1638_s3 + $0x20] sm:$0xff]  ;;  %v310_v36 = vld [vmem:[%s1333_s30 + $0x8] sm:$0xff]  ;;  %v311_v45 = vld [vmem:[%s1333_s30 + $0x10] sm:$0xff] }
  0x1d   : > { %1133 = vmatmul.msk.f32.vlgmr.msra.gmra.mxu3 %vm321_vm1, %v1383_v13  ;;  %v1138_v25 = vsel %vm598_vm2, 1.0, %v1272_v24  ;;  %v1144_v26 = vsel %vm726_vm3, 1.0, %v1272_v24  ;;  %643 = vmatpush.msrb.mxu0 %v1388_v14  ;;  %v1113_v30 = vld [vmem:[%s1637_s2 + $0x40] sm:$0xff]  ;;  %v312_v55 = vld [vmem:[%s1333_s30 + $0x18] sm:$0xff] }
  0x1e   : > { %516 = vmatpush.msrb.mxu3 %v1388_v14  ;;  %392 = vmatpush.msra.mxu1 %v1104_v20  ;;  %v1190_v28 = vpack.i.bf16 %v1144_v26, %v1138_v25  ;;  %v1468_v34 = vld [vmem:[%s1638_s3 + $0x40] sm:$0xff] }
  0x1f   : > { %1109 = vmatmul.msk.f32.vlgmr.msra.gmra.mxu1 %vm321_vm1, %v309_v12  ;;  %433 = vmatpush.msra.mxu2 %v1115_v23  ;;  %v1500_v35 = vld [vmem:[%s1639_s4] ss:$0 sm:$0xff]  ;;  %v1509_v39 = vld [vmem:[%s1639_s4 + $0x1] ss:$0 sm:$0xff]  ;;  %v1533_v49 = vld [vmem:[%s1639_s4 + $0x2] ss:$0 sm:$0xff] }
  0x20   : > { %517 = vmatpush.msrb.mxu3 %v1398_v18  ;;  %1191 = vperm.xlu0 %1189, %v1190_v28   ;;  %v1516_v40 = vld [vmem:[%s1640_s5] ss:$0 sm:$0xff]  ;;  %v1528_v48 = vld [vmem:[%s1640_s5 + $0x1] ss:$0 sm:$0xff]  ;;  %v1545_v1 = vld [vmem:[%s1640_s5 + $0x2] ss:$0 sm:$0xff] }
  0x21   : > { %434 = vmatpush.msra.mxu2 %v1114_v27  ;;  %644 = vmatpush.msrb.mxu0 %v1398_v18 }
  0x22   : > { %518 = vmatpush.msrb.mxu3 %v1412_v21  ;;  %663 = vmatpush.msrb.mxu1 %v1443_v31 }
  0x23   : > { %435 = vmatpush.msra.mxu2 %v1113_v30  ;;  %645 = vmatpush.msrb.mxu0 %v1412_v21 }
  0x24   : > { %519 = vmatpush.msrb.mxu3 %v1123_v29  ;;  %1118 = vmatmul.msk.f32.vlgmr.msra.gmra.mxu2 %vm321_vm1, %v309_v12 }
  0x25   : > { %1134 = vmatmul.msk.f32.vlgmr.msrb.gmra.mxu3 %vm321_vm1, %v1383_v13  ;;  %664 = vmatpush.msrb.mxu1 %v1452_v32 }
  0x26   : > { %539 = vmatpush.msra.mxu3 %v1443_v31  ;;  %752 = vmatpush.msrb.mxu2 %v1346_v2 }
  0x27   : > { %665 = vmatpush.msrb.mxu1 %v1459_v33  ;;  %646 = vmatpush.msrb.mxu0 %v1123_v29 }
  0x28   : > { %540 = vmatpush.msra.mxu3 %v1452_v32  ;;  %753 = vmatpush.msrb.mxu2 %v1355_v4 }
  0x29   : > { %666 = vmatpush.msrb.mxu1 %v1468_v34  ;;  %792 = vmatpush.msra.mxu0 %v1443_v31 }
  0x2a   : > { %541 = vmatpush.msra.mxu3 %v1459_v33  ;;  %754 = vmatpush.msrb.mxu2 %v1363_v6 }
  0x2b   : > { %793 = vmatpush.msra.mxu0 %v1452_v32  ;;  %881 = vmatpush.msra.mxu1 %v1346_v2 }
  0x2c   : > { %542 = vmatpush.msra.mxu3 %v1468_v34  ;;  %755 = vmatpush.msrb.mxu2 %v1379_v11 }
  0x2d   : > { %1135 = vmatmul.msk.f32.vlgmr.msra.gmra.mxu3 %vm321_vm1, %v1383_v13  ;;  %794 = vmatpush.msra.mxu0 %v1459_v33 }
  0x2e   : > { %623 = vmatpush.msrb.mxu3 %v1346_v2  ;;  %901 = vmatpush.msra.mxu2 %v1388_v14 }
  0x2f   : > { %795 = vmatpush.msra.mxu0 %v1468_v34  ;;  %882 = vmatpush.msra.mxu1 %v1355_v4 }
  0x30   : > { %624 = vmatpush.msrb.mxu3 %v1355_v4  ;;  %902 = vmatpush.msra.mxu2 %v1398_v18 }
  0x31   : > { %883 = vmatpush.msra.mxu1 %v1363_v6  ;;  %1101 = vmatmul.msk.f32.gmra.mxu0 %vm321_vm1, %v310_v36 }
  0x32   : > { %625 = vmatpush.msrb.mxu3 %v1363_v6  ;;  %903 = vmatpush.msra.mxu2 %v1412_v21 }
  0x33   : > { %884 = vmatpush.msra.mxu1 %v1379_v11  ;;  %1119 = vmatmul.msk.f32.gmra.mxu2 %vm321_vm1, %v310_v36 }
  0x34   : > { %626 = vmatpush.msrb.mxu3 %v1379_v11  ;;  %904 = vmatpush.msra.mxu2 %v1123_v29 }
  0x35   : > { %1110 = vmatmul.msk.f32.gmra.mxu1 %vm321_vm1, %v310_v36 }
  0x36   : > { %772 = vmatpush.msra.mxu3 %v1388_v14 }
  0x38   : > { %773 = vmatpush.msra.mxu3 %v1398_v18 }
  0x39   : > { %1102 = vmatmul.msk.f32.gmra.mxu0 %vm321_vm1, %v311_v45 }
  0x3a   : > { %774 = vmatpush.msra.mxu3 %v1412_v21 }
  0x3b   : > { %1120 = vmatmul.msk.f32.gmra.mxu2 %vm321_vm1, %v311_v45 }
  0x3c   : > { %775 = vmatpush.msra.mxu3 %v1123_v29 }
  0x3d   : > { %1111 = vmatmul.msk.f32.gmra.mxu1 %vm321_vm1, %v311_v45 }
  0x41   : > { %1103 = vmatmul.msk.f32.gmra.mxu0 %vm321_vm1, %v312_v55 }
  0x43   : > { %1121 = vmatmul.msk.f32.gmra.mxu2 %vm321_vm1, %v312_v55 }
  0x45   : > { %1112 = vmatmul.msk.f32.gmra.mxu1 %vm321_vm1, %v312_v55 }
  0x92   : > { %v1548_v28 = vpop.permute.xlu0 %1191 }
  0x99   : > { %v351_v37 = vpop.f32.mrf.mxu0 }
  0x9a   : > { %v352_v38 = vadd.f32 %v1500_v35, %v351_v37 }
  0x9c   : > { %363 = vst.msk [vmem:[#allocation2] sm:$0xff] %vm321_vm1, %v352_v38  ;;  %v394_v41 = vpop.f32.mrf.mxu1  ;;  %v1193_v38 = vunpack.i.l.bf16 %v1548_v28 }
  0x9d   : > { %v395_v42 = vadd.f32 %v1509_v39, %v394_v41 }
  0x9f   : > { %406 = vst.msk [vmem:[#allocation3] sm:$0xff] %vm321_vm1, %v395_v42 }
  0xa0   : > { %v498_v43 = vpop.f32.mrf.mxu3 }
  0xa1   : > { %v499_v44 = vadd.f32 %v1516_v40, %v498_v43 }
  0xa3   : > { %v547_v46 = vld [vmem:[#allocation2] sm:$0xff] }
  0xa4   : > { %v548_v47 = vadd.f32 %v547_v46, %v499_v44 }
  0xa6   : > { %v1136_v50 = vmul.f32 -1.442695, %v548_v47  ;;  %v568_v52 = vld [vmem:[#allocation3] sm:$0xff] }
  0xa7   : > { %v437_v54 = vpop.f32.mrf.mxu2 }
  0xa8   : > { %v521_v51 = vpop.f32.mrf.mxu3  ;;  %1206 = vpow2.f32 %v1136_v50  ;;  %v438_v56 = vadd.f32 %v1533_v49, %v437_v54 }
  0xa9   : > { %v522_v53 = vadd.f32 %v1528_v48, %v521_v51 }
  0xaa   : > { %449 = vst.msk [vmem:[#allocation4] sm:$0xff] %vm321_vm1, %v438_v56 }
  0xab   : > { %v569_v57 = vadd.f32 %v568_v52, %v522_v53 }
  0xad   : > { %v1137_v58 = vmul.f32 -1.442695, %v569_v57 }
  0xae   : > { %v1207_v59 = vpop.eup %1206 }
  0xaf   : > { %1208 = vpow2.f32 %v1137_v58  ;;  %v552_v60 = vadd.f32 1.0, %v1207_v59 }
  0xb0   : > { %v544_v3 = vpop.f32.mrf.mxu3 }
  0xb1   : > { %1210 = vrcp.f32 %v552_v60  ;;  %v564_v4 = vand.u32 2147483648, %v552_v60  ;;  %v562_v6 = vand.u32 2147483647, %v552_v60  ;;  %v545_v9 = vadd.f32 %v1545_v1, %v544_v3  ;;  %v589_v16 = vld [vmem:[#allocation4] sm:$0xff] }
  0xb2   : > { %vm558_vm5 = vweird.f32 %v552_v60  ;;  %v397_v43 = vpop.f32.mrf.mxu1 }
  0xb3   : > { %v565_v11 = vor.u32 1.1754944e-38, %v564_v4  ;;  %vm563_vm7 = vcmp.eq.f32.partialorder %v562_v6, 8.507059e+37  ;;  %v398_v45 = vadd.f32 %v1509_v39, %v397_v43  ;;  %v854_v4 = vstv %s853_s18 }
  0xb4   : > { %vm855_vm12 = vcmp.lt.s32.totalorder %v854_v4, %v1417_v22 }
  0xb5   : > { %v1209_v61 = vpop.eup %1208  ;;  %407 = vst.msk [vmem:[#allocation3 + $0x8] sm:$0xff] %vm321_vm1, %v398_v45 }
  0xb6   : > { %v573_v62 = vadd.f32 1.0, %v1209_v61  ;;  %v440_v52 = vpop.f32.mrf.mxu2 }
  0xb7   : > { %v1211_v63 = vpop.eup %1210  ;;  %v441_v55 = vadd.f32 %v1533_v49, %v440_v52 }
  0xb8   : > { %1212 = vrcp.f32 %v573_v62  ;;  %v554_v0 = vmul.f32 %v1211_v63, %v552_v60  ;;  %vm559_vm4 = vweird.f32 %v1211_v63  ;;  %v585_v18 = vand.u32 2147483648, %v573_v62 }
  0xb9   : > { %vm560_vm6 = vmor %vm558_vm5, %vm559_vm4  ;;  %v583_v20 = vand.u32 2147483647, %v573_v62  ;;  %vm579_vm9 = vweird.f32 %v573_v62  ;;  %450 = vst.msk [vmem:[#allocation4 + $0x8] sm:$0xff] %vm321_vm1, %v441_v55 }
  0xba   : > { %v555_v2 = vsub.f32 1.0, %v554_v0  ;;  %v586_v25 = vor.u32 1.1754944e-38, %v585_v18 }
  0xbb   : > { %vm584_vm11 = vcmp.eq.f32.partialorder %v583_v20, 8.507059e+37 }
  0xbc   : > { %v556_v5 = vmul.f32 %v1211_v63, %v555_v2  ;;  %v694_v54 = vld [vmem:[#allocation3 + $0x8] sm:$0xff] }
  0xbe   : > { %v1213_v7 = vpop.eup %1212  ;;  %v557_v10 = vadd.f32 %v1211_v63, %v556_v5  ;;  %v983_v5 = vstv %s982_s19  ;;  %v443_v6 = vpop.f32.mrf.mxu2 }
  0xbf   : > { %v575_v8 = vmul.f32 %v1213_v7, %v573_v62  ;;  %vm580_vm8 = vweird.f32 %v1213_v7  ;;  %vm984_vm13 = vcmp.lt.s32.totalorder %v983_v5, %v1417_v22 }
  0xc0   : > { %v561_v14 = vsel %vm560_vm6, %v1211_v63, %v557_v10  ;;  %vm581_vm10 = vmor %vm579_vm9, %vm580_vm8 }
  0xc1   : > { %v576_v12 = vsub.f32 1.0, %v575_v8  ;;  %v566_v15 = vsel %vm563_vm7, %v565_v11, %v561_v14  ;;  %v1158_v8 = vsel %vm984_vm13, 1.0, %v1272_v24 }
  0xc2   : > { %v590_v19 = vmul.f32 %v566_v15, %v545_v9  ;;  %v444_v9 = vadd.f32 %v1533_v49, %v443_v6 }
  0xc3   : > { %v577_v17 = vmul.f32 %v1213_v7, %v576_v12 }
  0xc4   : > { %v591_v23 = vadd.f32 %v590_v19, %v589_v16  ;;  %451 = vst.msk [vmem:[#allocation4 + $0x10] sm:$0xff] %vm321_vm1, %v444_v9 }
  0xc5   : > { %v578_v21 = vadd.f32 %v1213_v7, %v577_v17 }
  0xc6   : > { %1214 = vtanh.f32 %v591_v23  ;;  %v446_v17 = vpop.f32.mrf.mxu2 }
  0xc7   : > { %v582_v26 = vsel %vm581_vm10, %v1213_v7, %v578_v21  ;;  %v1151_v7 = vsel %vm855_vm12, 1.0, %v1272_v24  ;;  %v447_v19 = vadd.f32 %v1533_v49, %v446_v17 }
  0xc8   : > { %v587_v27 = vsel %vm584_vm11, %v586_v25, %v582_v26  ;;  %v1195_v11 = vpack.i.bf16 %v1158_v8, %v1151_v7 }
  0xc9   : > { %v593_v29 = vsub.f32 1.0, %v587_v27  ;;  %v595_v37 = vmul.f32 %v587_v27, %v1383_v13  ;;  %v354_v13 = vpop.f32.mrf.mxu0  ;;  %452 = vst.msk [vmem:[#allocation4 + $0x18] sm:$0xff] %vm321_vm1, %v447_v19 }
  0xca   : > { %v355_v44 = vadd.f32 %v1500_v35, %v354_v13  ;;  %1196 = vperm.xlu0 %1189, %v1195_v11  }
  0xcb   : > { %v845_v17 = vld [vmem:[#allocation4 + $0x10] sm:$0xff] }
  0xcc   : > { %v1215_v30 = vpop.eup %1214  ;;  %364 = vst.msk [vmem:[#allocation2 + $0x8] sm:$0xff] %vm321_vm1, %v355_v44 }
  0xcd   : > { %v594_v36 = vmul.f32 %v1215_v30, %v593_v29 }
  0xcf   : > { %v1552_v41 = vadd.f32 %v595_v37, %v594_v36  ;;  %v716_v36 = vld [vmem:[#allocation4 + $0x8] sm:$0xff] }
  0xd1   : > { %v606_v42 = vmul.f32 %v1193_v38, %v1552_v41  ;;  %1139 = vmatmul.msk.f32.vlgmr.msrb.gmra.mxu3 %vm321_vm1, %v1552_v41  ;;  %1140 = vmatmul.msk.f32.vlgmr.msrb.gmra.mxu0 %vm321_vm1, %v1552_v41  ;;  %v357_v46 = vpop.f32.mrf.mxu0 }
  0xd2   : > { %1141 = vmatmul.msk.f32.vlgmr.msrb.gmra.mxu1 %vm321_vm1, %v1552_v41  ;;  %921 = vmatpush.msrb.mxu3 %v1443_v31  ;;  %v400_v31 = vpop.f32.mrf.mxu1  ;;  %v358_v47 = vadd.f32 %v1500_v35, %v357_v46 }
  0xd3   : > { %607 = vst.msk [vmem:[%s1338_s9] sm:$0xff] %vm321_vm1, %v606_v42  ;;  %v672_v59 = vld [vmem:[#allocation2 + $0x8] sm:$0xff] }
  0xd4   : > { %922 = vmatpush.msrb.mxu3 %v1452_v32  ;;  %v401_v32 = vadd.f32 %v1509_v39, %v400_v31  ;;  %365 = vst.msk [vmem:[#allocation2 + $0x10] sm:$0xff] %vm321_vm1, %v358_v47  ;;  %v1194_v31 = vunpack.i.h.bf16 %v1548_v28 }
  0xd6   : > { %923 = vmatpush.msrb.mxu3 %v1459_v33  ;;  %408 = vst.msk [vmem:[#allocation3 + $0x10] sm:$0xff] %vm321_vm1, %v401_v32 }
  0xd8   : > { %924 = vmatpush.msrb.mxu3 %v1468_v34 }
  0xd9   : > { %v360_v33 = vpop.f32.mrf.mxu0 }
  0xda   : > { %v403_v34 = vpop.f32.mrf.mxu1  ;;  %v361_v50 = vadd.f32 %v1500_v35, %v360_v33 }
  0xdb   : > { %v404_v51 = vadd.f32 %v1509_v39, %v403_v34  ;;  %v801_v52 = vld [vmem:[#allocation2 + $0x10] sm:$0xff] }
  0xdc   : > { %366 = vst.msk [vmem:[#allocation2 + $0x18] sm:$0xff] %vm321_vm1, %v361_v50 }
  0xdd   : > { %409 = vst.msk [vmem:[#allocation3 + $0x18] sm:$0xff] %vm321_vm1, %v404_v51 }
 0x14e   : > { %v648_v53 = vpop.f32.mrf.mxu0 }
 0x14f   : > { %v649_v56 = vadd.f32 %v1528_v48, %v648_v53  ;;  %v668_v24 = vpop.f32.mrf.mxu1  ;;  %v823_v53 = vld [vmem:[#allocation3 + $0x10] sm:$0xff] }
 0x150   : > { %v669_v26 = vadd.f32 %v1545_v1, %v668_v24  ;;  %v1610_v24 = vpop.permute.xlu0 %1196 }
 0x151   : > { %v695_v57 = vadd.f32 %v694_v54, %v649_v56 }
 0x153   : > { %v1143_v58 = vmul.f32 -1.442695, %v695_v57 }
 0x154   : > { %v628_v35 = vpop.f32.mrf.mxu3 }
 0x155   : > { %1216 = vpow2.f32 %v1143_v58  ;;  %v629_v39 = vadd.f32 %v1516_v40, %v628_v35 }
 0x157   : > { %v673_v60 = vadd.f32 %v672_v59, %v629_v39 }
 0x159   : > { %v1142_v61 = vmul.f32 -1.442695, %v673_v60 }
 0x15b   : > { %v1217_v62 = vpop.eup %1216  ;;  %1218 = vpow2.f32 %v1142_v61 }
 0x15c   : > { %v699_v63 = vadd.f32 1.0, %v1217_v62 }
 0x15e   : > { %1220 = vrcp.f32 %v699_v63  ;;  %v711_v49 = vand.u32 2147483648, %v699_v63  ;;  %vm705_vm4 = vweird.f32 %v699_v63  ;;  %v709_v38 = vand.u32 2147483647, %v699_v63 }
 0x160   : > { %v712_v43 = vor.u32 1.1754944e-38, %v711_v49  ;;  %vm710_vm6 = vcmp.eq.f32.partialorder %v709_v38, 8.507059e+37  ;;  %v930_v38 = vld [vmem:[#allocation2 + $0x18] sm:$0xff] }
 0x161   : > { %v1219_v0 = vpop.eup %1218 }
 0x162   : > { %v677_v2 = vadd.f32 1.0, %v1219_v0 }
 0x164   : > { %1222 = vrcp.f32 %v677_v2  ;;  %v1221_v3 = vpop.eup %1220  ;;  %v689_v18 = vand.u32 2147483648, %v677_v2  ;;  %v687_v20 = vand.u32 2147483647, %v677_v2  ;;  %vm683_vm15 = vweird.f32 %v677_v2 }
 0x165   : > { %v701_v10 = vmul.f32 %v1221_v3, %v699_v63  ;;  %vm706_vm3 = vweird.f32 %v1221_v3 }
 0x166   : > { %v690_v25 = vor.u32 1.1754944e-38, %v689_v18  ;;  %vm688_vm2 = vcmp.eq.f32.partialorder %v687_v20, 8.507059e+37  ;;  %vm707_vm5 = vmor %vm705_vm4, %vm706_vm3 }
 0x167   : > { %v702_v15 = vsub.f32 1.0, %v701_v10 }
 0x169   : > { %v703_v21 = vmul.f32 %v1221_v3, %v702_v15 }
 0x16a   : > { %v1223_v12 = vpop.eup %1222 }
 0x16b   : > { %v679_v14 = vmul.f32 %v1223_v12, %v677_v2  ;;  %vm684_vm14 = vweird.f32 %v1223_v12  ;;  %v704_v30 = vadd.f32 %v1221_v3, %v703_v21 }
 0x16c   : > { %vm685_vm0 = vmor %vm683_vm15, %vm684_vm14 }
 0x16d   : > { %v680_v16 = vsub.f32 1.0, %v679_v14  ;;  %v708_v13 = vsel %vm707_vm5, %v1221_v3, %v704_v30 }
 0x16e   : > { %v713_v44 = vsel %vm710_vm6, %v712_v43, %v708_v13 }
 0x16f   : > { %v681_v22 = vmul.f32 %v1223_v12, %v680_v16  ;;  %v720_v45 = vsub.f32 1.0, %v713_v44  ;;  %v722_v32 = vmul.f32 %v713_v44, %v1552_v41 }
 0x171   : > { %v682_v23 = vadd.f32 %v1223_v12, %v681_v22 }
 0x173   : > { %v686_v27 = vsel %vm685_vm0, %v1223_v12, %v682_v23 }
 0x174   : > { %v691_v29 = vsel %vm688_vm2, %v690_v25, %v686_v27 }
 0x175   : > { %v717_v37 = vmul.f32 %v691_v29, %v669_v26  ;;  %v1198_v26 = vunpack.i.l.bf16 %v1610_v24 }
 0x177   : > { %v718_v42 = vadd.f32 %v717_v37, %v716_v36 }
 0x179   : > { %1224 = vtanh.f32 %v718_v42 }
 0x17f   : > { %v1225_v46 = vpop.eup %1224 }
 0x180   : > { %v721_v47 = vmul.f32 %v1225_v46, %v720_v45  ;;  %v952_v45 = vld [vmem:[#allocation3 + $0x18] sm:$0xff] }
 0x182   : > { %v1596_v33 = vadd.f32 %v722_v32, %v721_v47 }
 0x184   : > { %1146 = vmatmul.msk.f32.vlgmr.msrb.gmra.mxu2 %vm321_vm1, %v1596_v33  ;;  %1147 = vmatmul.msk.f32.vlgmr.msra.gmra.mxu3 %vm321_vm1, %v1596_v33  ;;  %v734_v34 = vmul.f32 %v1194_v31, %v1596_v33 }
 0x185   : > { %1148 = vmatmul.msk.f32.vlgmr.msra.gmra.mxu0 %vm321_vm1, %v1596_v33 }
 0x186   : > { %1145 = vst.msk [vmem:[%s1338_s9 + $0x8] sm:$0xff] %vm321_vm1, %v734_v34 }
 0x202   : > { %v797_v6 = vpop.f32.mrf.mxu0 }
 0x203   : > { %v798_v10 = vadd.f32 %v1545_v1, %v797_v6 }
 0x207   : > { %v757_v50 = vpop.f32.mrf.mxu2  ;;  %v777_v28 = vpop.f32.mrf.mxu3 }
 0x208   : > { %v758_v51 = vadd.f32 %v1516_v40, %v757_v50  ;;  %v778_v41 = vadd.f32 %v1528_v48, %v777_v28 }
 0x20a   : > { %v802_v54 = vadd.f32 %v801_v52, %v758_v51  ;;  %v824_v55 = vadd.f32 %v823_v53, %v778_v41 }
 0x20c   : > { %v1149_v56 = vmul.f32 -1.442695, %v802_v54  ;;  %v1150_v57 = vmul.f32 -1.442695, %v824_v55 }
 0x20e   : > { %1226 = vpow2.f32 %v1149_v56 }
 0x20f   : > { %1228 = vpow2.f32 %v1150_v57 }
 0x214   : > { %v1227_v58 = vpop.eup %1226 }
 0x215   : > { %v1229_v35 = vpop.eup %1228  ;;  %v806_v39 = vadd.f32 1.0, %v1227_v58 }
 0x216   : > { %v828_v59 = vadd.f32 1.0, %v1229_v35 }
 0x217   : > { %1230 = vrcp.f32 %v806_v39  ;;  %v818_v2 = vand.u32 2147483648, %v806_v39  ;;  %v816_v5 = vand.u32 2147483647, %v806_v39  ;;  %vm812_vm8 = vweird.f32 %v806_v39 }
 0x218   : > { %1232 = vrcp.f32 %v828_v59  ;;  %v840_v16 = vand.u32 2147483648, %v828_v59  ;;  %vm834_vm12 = vweird.f32 %v828_v59  ;;  %v838_v18 = vand.u32 2147483647, %v828_v59 }
 0x219   : > { %v819_v9 = vor.u32 1.1754944e-38, %v818_v2  ;;  %vm817_vm10 = vcmp.eq.f32.partialorder %v816_v5, 8.507059e+37 }
 0x21a   : > { %v841_v20 = vor.u32 1.1754944e-38, %v840_v16  ;;  %vm839_vm14 = vcmp.eq.f32.partialorder %v838_v18, 8.507059e+37 }
 0x21d   : > { %v1231_v60 = vpop.eup %1230 }
 0x21e   : > { %v1233_v61 = vpop.eup %1232  ;;  %v808_v62 = vmul.f32 %v1231_v60, %v806_v39  ;;  %vm813_vm7 = vweird.f32 %v1231_v60 }
 0x21f   : > { %v830_v63 = vmul.f32 %v1233_v61, %v828_v59  ;;  %vm814_vm9 = vmor %vm812_vm8, %vm813_vm7  ;;  %vm835_vm11 = vweird.f32 %v1233_v61 }
 0x220   : > { %v809_v0 = vsub.f32 1.0, %v808_v62  ;;  %vm836_vm13 = vmor %vm834_vm12, %vm835_vm11 }
 0x221   : > { %v831_v3 = vsub.f32 1.0, %v830_v63  ;;  %v974_v63 = vld [vmem:[#allocation4 + $0x18] sm:$0xff] }
 0x222   : > { %v810_v4 = vmul.f32 %v1231_v60, %v809_v0 }
 0x223   : > { %v832_v7 = vmul.f32 %v1233_v61, %v831_v3 }
 0x224   : > { %v811_v8 = vadd.f32 %v1231_v60, %v810_v4 }
 0x225   : > { %v833_v14 = vadd.f32 %v1233_v61, %v832_v7 }
 0x226   : > { %v815_v11 = vsel %vm814_vm9, %v1231_v60, %v811_v8 }
 0x227   : > { %v820_v12 = vsel %vm817_vm10, %v819_v9, %v815_v11  ;;  %v837_v22 = vsel %vm836_vm13, %v1233_v61, %v833_v14  ;;  %v1199_v9 = vunpack.i.h.bf16 %v1610_v24 }
 0x228   : > { %v846_v15 = vmul.f32 %v820_v12, %v798_v10  ;;  %v842_v21 = vsel %vm839_vm14, %v841_v20, %v837_v22 }
 0x229   : > { %v849_v23 = vsub.f32 1.0, %v842_v21  ;;  %v851_v29 = vmul.f32 %v842_v21, %v1596_v33 }
 0x22a   : > { %v847_v19 = vadd.f32 %v846_v15, %v845_v17 }
 0x22c   : > { %1234 = vtanh.f32 %v847_v19 }
 0x232   : > { %v1235_v25 = vpop.eup %1234 }
 0x233   : > { %v850_v27 = vmul.f32 %v1235_v25, %v849_v23 }
 0x235   : > { %v852_v30 = vadd.f32 %v851_v29, %v850_v27 }
 0x237   : > { %v863_v36 = vmul.f32 %v1198_v26, %v852_v30  ;;  %1153 = vmatmul.msk.f32.vlgmr.msra.gmra.mxu1 %vm321_vm1, %v852_v30  ;;  %1154 = vmatmul.msk.f32.vlgmr.msra.gmra.mxu2 %vm321_vm1, %v852_v30 }
 0x238   : > { %1155 = vmatmul.msk.f32.vlgmr.msrb.gmra.mxu3 %vm321_vm1, %v852_v30 }
 0x239   : > { %1152 = vst.msk [vmem:[%s1338_s9 + $0x10] sm:$0xff] %vm321_vm1, %v863_v36 }
 0x2b4   : > { %v886_v49 = vpop.f32.mrf.mxu1 }
 0x2b5   : > { %v887_v37 = vadd.f32 %v1516_v40, %v886_v49 }
 0x2b7   : > { %v931_v42 = vadd.f32 %v930_v38, %v887_v37 }
 0x2b9   : > { %v1156_v13 = vmul.f32 -1.442695, %v931_v42 }
 0x2ba   : > { %v906_v43 = vpop.f32.mrf.mxu2 }
 0x2bb   : > { %1236 = vpow2.f32 %v1156_v13  ;;  %v907_v44 = vadd.f32 %v1528_v48, %v906_v43  ;;  %v926_v54 = vpop.f32.mrf.mxu3 }
 0x2bc   : > { %v927_v58 = vadd.f32 %v1545_v1, %v926_v54 }
 0x2bd   : > { %v953_v46 = vadd.f32 %v952_v45, %v907_v44 }
 0x2bf   : > { %v1157_v31 = vmul.f32 -1.442695, %v953_v46 }
 0x2c1   : > { %v1237_v47 = vpop.eup %1236  ;;  %1238 = vpow2.f32 %v1157_v31 }
 0x2c2   : > { %v935_v32 = vadd.f32 1.0, %v1237_v47 }
 0x2c4   : > { %1240 = vrcp.f32 %v935_v32  ;;  %v947_v51 = vand.u32 2147483648, %v935_v32  ;;  %v945_v52 = vand.u32 2147483647, %v935_v32  ;;  %vm941_vm0 = vweird.f32 %v935_v32 }
 0x2c6   : > { %v948_v56 = vor.u32 1.1754944e-38, %v947_v51  ;;  %vm946_vm3 = vcmp.eq.f32.partialorder %v945_v52, 8.507059e+37 }
 0x2c7   : > { %v1239_v33 = vpop.eup %1238 }
 0x2c8   : > { %v957_v34 = vadd.f32 1.0, %v1239_v33 }
 0x2ca   : > { %v1241_v50 = vpop.eup %1240  ;;  %1242 = vrcp.f32 %v957_v34  ;;  %v969_v60 = vand.u32 2147483648, %v957_v34  ;;  %v967_v62 = vand.u32 2147483647, %v957_v34  ;;  %vm963_vm5 = vweird.f32 %v957_v34 }
 0x2cb   : > { %v937_v28 = vmul.f32 %v1241_v50, %v935_v32  ;;  %vm942_vm15 = vweird.f32 %v1241_v50 }
 0x2cc   : > { %vm943_vm2 = vmor %vm941_vm0, %vm942_vm15  ;;  %v970_v3 = vor.u32 1.1754944e-38, %v969_v60  ;;  %vm968_vm7 = vcmp.eq.f32.partialorder %v967_v62, 8.507059e+37 }
 0x2cd   : > { %v938_v40 = vsub.f32 1.0, %v937_v28 }
 0x2cf   : > { %v939_v41 = vmul.f32 %v1241_v50, %v938_v40 }
 0x2d0   : > { %v1243_v53 = vpop.eup %1242 }
 0x2d1   : > { %v959_v48 = vmul.f32 %v1243_v53, %v957_v34  ;;  %v940_v55 = vadd.f32 %v1241_v50, %v939_v41  ;;  %vm964_vm4 = vweird.f32 %v1243_v53 }
 0x2d2   : > { %vm965_vm6 = vmor %vm963_vm5, %vm964_vm4 }
 0x2d3   : > { %v960_v57 = vsub.f32 1.0, %v959_v48  ;;  %v944_v35 = vsel %vm943_vm2, %v1241_v50, %v940_v55 }
 0x2d4   : > { %v949_v39 = vsel %vm946_vm3, %v948_v56, %v944_v35 }
 0x2d5   : > { %v961_v59 = vmul.f32 %v1243_v53, %v960_v57  ;;  %v975_v61 = vmul.f32 %v949_v39, %v927_v58 }
 0x2d7   : > { %v962_v0 = vadd.f32 %v1243_v53, %v961_v59  ;;  %v976_v2 = vadd.f32 %v975_v61, %v974_v63 }
 0x2d9   : > { %v966_v4 = vsel %vm965_vm6, %v1243_v53, %v962_v0  ;;  %1244 = vtanh.f32 %v976_v2 }
 0x2da   : > { %v971_v5 = vsel %vm968_vm7, %v970_v3, %v966_v4 }
 0x2db   : > { %v978_v1 = vsub.f32 1.0, %v971_v5  ;;  %v980_v8 = vmul.f32 %v971_v5, %v852_v30 }
 0x2df   : > { %v1245_v6 = vpop.eup %1244 }
 0x2e0   : > { %v979_v7 = vmul.f32 %v1245_v6, %v978_v1 }
 0x2e2   : > { %v981_v10 = vadd.f32 %v980_v8, %v979_v7 }
 0x2e4   : > { %v992_v11 = vmul.f32 %v1199_v9, %v981_v10  ;;  %995 = vst.msk [vmem:[#allocation5] sm:$0xff] %vm321_vm1, %v981_v10 }
 0x2e6   : > { %1159 = vst.msk [vmem:[%s1338_s9 + $0x18] sm:$0xff] %vm321_vm1, %v992_v11 }
 0x2e7 PF: > { %s16_s23 = sadd.s32 1, %s1268_s23   ;;  %s1642_s21 = smov %s1264_s22 }
 0x2e8   : > { %p13_p6 = scmp.ge.s32.totalorder %s16_s23, 4   ;;  %s1643_s22 = smov %s1645_s24 }
 0x2ea   :  { %15 = sbr.rel (!%p13_p6) target bundleno = 2 (0x2), region = 101 }

// kernel: nnet_vae_forward.11
= control target key start
LH: loop header
LB: loop body
LE: loop exit
PB: predicated region body
PF: predicated region fallthrough
CT: control target
= control target key end

     0   :  { %vm30_vm0 = vcmask 261120   ;;  %vm96_vm1 = vcmask 130048   ;;  %s229_s1 = inlined_call_operand.vmem [shape: f32[32,16], index: 1, kind: input, shape index: {}]   ;;  %s230_s0 = inlined_call_operand.vmem [shape: f32[64,32], index: 0, kind: input, shape index: {}]   ;;  %s231_s2 = inlined_call_operand.vmem [shape: f32[1,16], index: 2, kind: input, shape index: {}]   ;;  %s232_s3 = inlined_call_operand.vmem [shape: f32[64,16], index: 3, kind: output, shape index: {}]  }
   0x1   :  { %v25_v0 = vld [vmem:[%s229_s1 + $0x18] sm:$0xff]  ;;  %v24_v1 = vld [vmem:[%s229_s1 + $0x10] sm:$0xff]  ;;  %v23_v2 = vld [vmem:[%s229_s1 + $0x8] sm:$0xff] }
   0x2   :  { %118 = vmatpush.msra.mxu2 %v25_v0  ;;  %119 = vmatpush.msra.mxu3 %v25_v0  ;;  %v22_v3 = vld [vmem:[%s229_s1] sm:$0xff]  ;;  %v20_v5 = vld [vmem:[%s230_s0 + $0x30] sm:$0xff]  ;;  %v19_v8 = vld [vmem:[%s230_s0 + $0x28] sm:$0xff] }
   0x3   :  { %67 = vmatpush.msra.mxu0 %v25_v0  ;;  %117 = vmatpush.msra.mxu1 %v25_v0  ;;  %v18_v4 = vld [vmem:[%s230_s0 + $0x20] sm:$0xff]  ;;  %v16_v7 = vld [vmem:[%s230_s0 + $0x10] sm:$0xff]  ;;  %v21_v9 = vld [vmem:[%s230_s0 + $0x38] sm:$0xff] }
   0x4   :  { %121 = vmatpush.msra.mxu2 %v24_v1  ;;  %122 = vmatpush.msra.mxu3 %v24_v1  ;;  %v14_v6 = vld [vmem:[%s230_s0] sm:$0xff]  ;;  %v15_v10 = vld [vmem:[%s230_s0 + $0x8] sm:$0xff]  ;;  %v17_v11 = vld [vmem:[%s230_s0 + $0x18] sm:$0xff] }
   0x5   :  { %68 = vmatpush.msra.mxu0 %v24_v1  ;;  %120 = vmatpush.msra.mxu1 %v24_v1  ;;  %v129_v12 = vld [vmem:[%s231_s2] ss:$0 sm:$0xff] }
   0x6   :  { %124 = vmatpush.msra.mxu2 %v23_v2  ;;  %125 = vmatpush.msra.mxu3 %v23_v2 }
   0x7   :  { %69 = vmatpush.msra.mxu0 %v23_v2  ;;  %123 = vmatpush.msra.mxu1 %v23_v2 }
   0x8   :  { %127 = vmatpush.msra.mxu2 %v22_v3  ;;  %128 = vmatpush.msra.mxu3 %v22_v3 }
   0x9   :  { %113 = vmatmul.msk.f32.vlgmr.msra.gmra.mxu2 %vm30_vm0, %v18_v4  ;;  %115 = vmatmul.msk.f32.vlgmr.msra.gmra.mxu3 %vm30_vm0, %v20_v5 }
   0xa   :  { %70 = vmatpush.msra.mxu0 %v22_v3  ;;  %126 = vmatpush.msra.mxu1 %v22_v3 }
   0xb   :  { %109 = vmatmul.msk.f32.vlgmr.msra.gmra.mxu0 %vm30_vm0, %v14_v6  ;;  %111 = vmatmul.msk.f32.vlgmr.msra.gmra.mxu1 %vm30_vm0, %v16_v7 }
  0x11   :  { %114 = vmatmul.msk.f32.gmra.mxu2 %vm30_vm0, %v19_v8  ;;  %116 = vmatmul.msk.f32.gmra.mxu3 %vm30_vm0, %v21_v9 }
  0x13   :  { %110 = vmatmul.msk.f32.gmra.mxu0 %vm30_vm0, %v15_v10  ;;  %112 = vmatmul.msk.f32.gmra.mxu1 %vm30_vm0, %v17_v11 }
  0x88   :  { %v72_v13 = vpop.f32.mrf.mxu0  ;;  %v78_v14 = vpop.f32.mrf.mxu1 }
  0x89   :  { %v73_v15 = vadd.f32 %v129_v12, %v72_v13  ;;  %v79_v16 = vadd.f32 %v129_v12, %v78_v14 }
  0x8b   :  { %97 = vst.msk [vmem:[%s232_s3] sm:$0xff] %vm96_vm1, %v73_v15 }
  0x8c   :  { %99 = vst.msk [vmem:[%s232_s3 + $0x10] sm:$0xff] %vm96_vm1, %v79_v16  ;;  %v84_v17 = vpop.f32.mrf.mxu2  ;;  %v90_v18 = vpop.f32.mrf.mxu3 }
  0x8d   :  { %v85_v19 = vadd.f32 %v129_v12, %v84_v17  ;;  %v91_v20 = vadd.f32 %v129_v12, %v90_v18 }
  0x8f   :  { %101 = vst.msk [vmem:[%s232_s3 + $0x20] sm:$0xff] %vm96_vm1, %v85_v19 }
  0x90   :  { %103 = vst.msk [vmem:[%s232_s3 + $0x30] sm:$0xff] %vm96_vm1, %v91_v20  ;;  %v75_v21 = vpop.f32.mrf.mxu0  ;;  %v81_v22 = vpop.f32.mrf.mxu1 }
  0x91   :  { %v76_v23 = vadd.f32 %v129_v12, %v75_v21  ;;  %v82_v24 = vadd.f32 %v129_v12, %v81_v22 }
  0x93   :  { %98 = vst.msk [vmem:[%s232_s3 + $0x8] sm:$0xff] %vm96_vm1, %v76_v23 }
  0x94   :  { %100 = vst.msk [vmem:[%s232_s3 + $0x18] sm:$0xff] %vm96_vm1, %v82_v24  ;;  %v87_v25 = vpop.f32.mrf.mxu2  ;;  %v93_v26 = vpop.f32.mrf.mxu3 }
  0x95   :  { %v88_v27 = vadd.f32 %v129_v12, %v87_v25  ;;  %v94_v28 = vadd.f32 %v129_v12, %v93_v26 }
  0x97   :  { %102 = vst.msk [vmem:[%s232_s3 + $0x28] sm:$0xff] %vm96_vm1, %v88_v27 }
  0x98   :  { %104 = vst.msk [vmem:[%s232_s3 + $0x38] sm:$0xff] %vm96_vm1, %v94_v28 }

</bundles_post_ra>
